<compile_context>
chip_gen: v7x
topology: tpu7x:2x2x1
jax: 0.10.0
libtpu: 0.0.40
codegen_flags: <defaults>
</compile_context>

<pallas_src>
import jax
import jax.numpy as jnp
from jax.experimental import pallas as pl
from jax.experimental.pallas import tpu as pltpu

# ---- small model dims consistent with the module's forward ----
B = 8                 # batch
T = 8                 # sequence length
E = 32                # embed_dim
H = 32                # hidden_dim
K = 2                 # num_keywords
L = 2                 # num_layers
VOCAB = 50
TOPIC_VOCAB = 28 + 5
NUM_LABELS = 100
CUTOFF0 = round(NUM_LABELS / 20)      # 5
CUTOFF1 = 4 * CUTOFF0                 # 20
HEAD_SIZE = CUTOFF0 + 2               # 7   (shortlist + 2 clusters)
PROJ0 = H // 4                        # 8   (div_value=4.0 default)
PROJ1 = H // 16                       # 2
CL0_SIZE = CUTOFF1 - CUTOFF0          # 15
CL1_SIZE = NUM_LABELS - CUTOFF1       # 80
N_ROWS = T * B                        # 64 rows fed to the adaptive softmax
LANES = 128

# bf16 weight-slab row offsets ([WSLAB_ROWS, 128])
W0_OFF = 0            # [2E+H=96, 4H]   stacked [W_ih0; W_hh0]
W1_OFF = 96           # [2H=64,  4H]    stacked [W_ih1; W_hh1]
WA_OFF = 160          # [H=32, 2H|pad]  [Wa | Wa@Wa]
UA_OFF = 192          # [2E=64, 2H|pad] blockdiag(Ua, Ua)
ASM_OFF = 256         # [H=32, 7|15|80|pad] fused adaptive-softmax weight
WSLAB_ROWS = 288

# f32 state/aux slab row offsets ([SSLAB_ROWS, 128])
#  rows 0:8   lanes 0:32 q0 | 32:64 topic0 | 64:96 topic1 | 96:98 phi | 98:100 cov0 | 100 va_b
#  rows 8:16  lanes 0:32 h0_l0 | 32:64 h0_l1 | 64:96 c0_l0 | 96:128 c0_l1
#  rows 16:24 row16 = b0, row17 = b1, row18 lanes 0:64 = [va | va]
#  rows 24:88 adaptive-softmax target-selection mask [64, 128]
SEL_OFF = 24
SSLAB_ROWS = 88


def _log_softmax(x):
    m = jnp.max(x, axis=-1, keepdims=True)
    s = x - m
    return s - jnp.log(jnp.sum(jnp.exp(s), axis=-1, keepdims=True))


# ===================== fused kernel: attention + 2-layer LSTM over time + adaptive softmax =====================
def mtalstm_kernel(emb_ref, w_ref, s_ref, big_ref, small_ref, states_sc, attn_sc):
    f32 = jnp.float32
    bf16 = jnp.bfloat16

    st0 = s_ref[0:8, :]                      # [B, 128] per-batch state row-block
    st1 = s_ref[8:16, :]
    aux = s_ref[16:24, :]

    query = st0[:, 0:H]                      # initial query = output.squeeze(0)
    topics0 = st0[:, H:2 * H]
    topics1 = st0[:, 2 * H:3 * H]
    phi0 = st0[:, 96:97]
    phi1 = st0[:, 97:98]
    cov0 = st0[:, 98:99]
    cov1 = st0[:, 99:100]
    vb = st0[:, 100:101]                     # va bias, replicated per batch row

    h_lo = st1[:, 0:H]
    h_hi = st1[:, H:2 * H]
    c_lo = st1[:, 2 * H:3 * H]
    c_hi = st1[:, 3 * H:4 * H]

    b0 = aux[0:1, :]                         # [1, 4H]
    b1 = aux[1:2, :]                         # [1, 4H]
    va2 = aux[2:3, :]                        # [1, 128]: lanes 0:64 = [va | va], rest 0

    # TODO(synk): an all-zero mask row makes phi 0 -> inf/nan, matching the reference behaviour.
    inv_phi0 = 1.0 / phi0
    inv_phi1 = 1.0 / phi1
    topics_diff = topics0 - topics1

    # Time-invariant Bahdanau keys [pk0 | pk1 | 0] in a single matmul (blockdiag(Ua, Ua)).
    pk = jnp.dot(st0[:, H:3 * H].astype(bf16), w_ref[UA_OFF:UA_OFF + 2 * E, :],
                 preferred_element_type=f32)                                   # [B, 128]

    for t in range(T):                       # statically unrolled, single launch
        # One matmul gives [q@Wa | q@Wa^2 | 0]; reproduces the reference's cumulative Wa quirk.
        q12 = jnp.dot(query.astype(bf16), w_ref[WA_OFF:WA_OFF + H, :],
                      preferred_element_type=f32)                              # [B, 128]
        z = jnp.tanh(q12 + pk) * va2
        e0 = jnp.sum(z[:, 0:H], axis=1, keepdims=True) + vb                    # [B, 1]
        e1 = jnp.sum(z[:, H:2 * H], axis=1, keepdims=True) + vb                # [B, 1]
        s0 = e0 * cov0
        s1 = e1 * cov1
        a0 = jax.nn.sigmoid(s0 - s1)         # 2-way softmax == sigmoid of the score difference
        a1 = 1.0 - a0
        mt = topics1 + a0 * topics_diff                                        # [B, E]
        cov0 = cov0 - a0 * inv_phi0
        cov1 = cov1 - a1 * inv_phi1
        attn_sc[8 * t:8 * (t + 1), :] = jnp.concatenate([a0, a1], axis=1)

        # --- layer-0 LSTM cell (PyTorch gate order i, f, g, o), fused [W_ih; W_hh] matmul ---
        x0 = jnp.concatenate([emb_ref[8 * t:8 * (t + 1), :], mt, h_lo], axis=1)   # [B, 2E+H]
        g0 = jnp.dot(x0.astype(bf16), w_ref[W0_OFF:W0_OFF + 2 * E + H, :],
                     preferred_element_type=f32) + b0                          # [B, 4H]
        c_lo = jax.nn.sigmoid(g0[:, H:2 * H]) * c_lo \
            + jax.nn.sigmoid(g0[:, 0:H]) * jnp.tanh(g0[:, 2 * H:3 * H])
        h_lo = jax.nn.sigmoid(g0[:, 3 * H:4 * H]) * jnp.tanh(c_lo)

        # TODO(synk): inter-layer LSTM dropout is training-mode only; eval semantics used here.
        x1 = jnp.concatenate([h_lo, h_hi], axis=1)                             # [B, 2H]
        g1 = jnp.dot(x1.astype(bf16), w_ref[W1_OFF:W1_OFF + 2 * H, :],
                     preferred_element_type=f32) + b1                          # [B, 4H]
        c_hi = jax.nn.sigmoid(g1[:, H:2 * H]) * c_hi \
            + jax.nn.sigmoid(g1[:, 0:H]) * jnp.tanh(g1[:, 2 * H:3 * H])
        h_hi = jax.nn.sigmoid(g1[:, 3 * H:4 * H]) * jnp.tanh(c_hi)

        query = h_hi
        states_sc[8 * t:8 * (t + 1), :] = h_hi

    # --- AdaptiveLogSoftmaxWithLoss forward (rows are the time-major LSTM outputs) ---
    flat = states_sc[...]                                                      # [N, H]
    logits = jnp.dot(flat.astype(bf16), w_ref[ASM_OFF:ASM_OFF + H, :],
                     preferred_element_type=f32)                               # [N, 128]
    head_lp = _log_softmax(logits[:, 0:HEAD_SIZE])                             # [N, 7]
    lp0 = _log_softmax(logits[:, HEAD_SIZE:HEAD_SIZE + CL0_SIZE])              # [N, 15]
    lp1 = _log_softmax(logits[:, HEAD_SIZE + CL0_SIZE:HEAD_SIZE + CL0_SIZE + CL1_SIZE])  # [N, 80]

    sel = s_ref[SEL_OFF:SEL_OFF + N_ROWS, :]                                   # [N, 128]
    nll = (jnp.sum(head_lp * sel[:, 0:HEAD_SIZE], axis=1, keepdims=True)
           + jnp.sum(lp0 * sel[:, HEAD_SIZE:HEAD_SIZE + CL0_SIZE], axis=1, keepdims=True)
           + jnp.sum(lp1 * sel[:, HEAD_SIZE + CL0_SIZE:HEAD_SIZE + CL0_SIZE + CL1_SIZE],
                     axis=1, keepdims=True))                                   # [N, 1]
    loss11 = -jnp.mean(nll, keepdims=True)                                     # [1, 1]
    loss_col = loss11 + jnp.zeros((B, 1), f32)                                 # broadcast rows

    # --- lane-dense writeback, once ---
    big_ref[...] = jnp.concatenate(
        [flat, attn_sc[...], nll, jnp.zeros((N_ROWS, LANES - H - K - 1), f32)], axis=1)
    small_ref[0:B, :] = jnp.concatenate([h_lo, h_hi, c_lo, c_hi], axis=1)      # [B, 128]
    small_ref[B:2 * B, :] = jnp.concatenate(
        [cov0, cov1, loss_col, jnp.zeros((B, LANES - K - 1), f32)], axis=1)    # [B, 128]


def run_mtalstm_fused(emb_flat, wslab, sslab):
    vmem = pltpu.MemorySpace.VMEM
    return pl.pallas_call(
        mtalstm_kernel,
        in_specs=[pl.BlockSpec(memory_space=vmem)] * 3,
        out_specs=[pl.BlockSpec(memory_space=vmem)] * 2,
        out_shape=[jax.ShapeDtypeStruct((N_ROWS, LANES), jnp.float32),
                   jax.ShapeDtypeStruct((2 * B, LANES), jnp.float32)],
        scratch_shapes=[pltpu.VMEM((N_ROWS, H), jnp.float32),   # per-step top-layer outputs
                        pltpu.VMEM((N_ROWS, K), jnp.float32)],  # per-step attention weights
        cost_estimate=pl.CostEstimate(flops=4_000_000, transcendentals=40_000,
                                      bytes_accessed=200_000),
    )(emb_flat, wslab, sslab)


# ===================== wrapper (glue: gathers, phi, slab packing, selection mask, reshapes) =====================
def mtalstm_forward(params, inputs, topics, output0, hidden, mask, target, coverage_vector):
    f32 = jnp.float32
    emb = params['embedding'][inputs]                          # [B, T, E] (gather = glue)
    topics_embed = params['embedding_topic'][topics]           # [B, K, E]
    phi = jnp.sum(mask, axis=1, keepdims=True) * jax.nn.sigmoid(
        topics_embed.reshape(B, K * E) @ params['Uf'])         # [B, K]
    emb_flat = jnp.transpose(emb, (1, 0, 2)).reshape(N_ROWS, E)     # time-major [T*B, E]
    h0, c0 = hidden

    # ---- packed bf16 MXU-weight slab (one-off layout work, no per-step cost) ----
    w0_stack = jnp.concatenate([params['w_ih0'], params['w_hh0']], axis=0)   # [96, 128]
    w1_stack = jnp.concatenate([params['w_ih1'], params['w_hh1']], axis=0)   # [64, 128]
    wa = params['Wa']
    wa_cat = jnp.concatenate([wa, wa @ wa, jnp.zeros((H, LANES - 2 * H), f32)], axis=1)
    ua_blk = jnp.zeros((2 * E, LANES), f32)
    ua_blk = ua_blk.at[0:E, 0:H].set(params['Ua']).at[E:2 * E, H:2 * H].set(params['Ua'])
    asm_w = jnp.concatenate(
        [params['asm_head'],
         params['asm_p0'] @ params['asm_w0'],                  # [H, 15] low-rank tail 0
         params['asm_p1'] @ params['asm_w1'],                  # [H, 80] low-rank tail 1
         jnp.zeros((H, LANES - HEAD_SIZE - CL0_SIZE - CL1_SIZE), f32)], axis=1)
    wslab = jnp.concatenate([w0_stack, w1_stack, wa_cat, ua_blk, asm_w],
                            axis=0).astype(jnp.bfloat16)       # [288, 128]

    # ---- packed f32 state / aux / selection slab ----
    va = params['va_w'][:, 0]
    vb = params['va_b'].reshape(())
    st0 = jnp.zeros((B, LANES), f32)
    st0 = st0.at[:, 0:H].set(output0[0])
    st0 = st0.at[:, H:2 * H].set(topics_embed[:, 0, :])
    st0 = st0.at[:, 2 * H:3 * H].set(topics_embed[:, 1, :])
    st0 = st0.at[:, 96:98].set(phi)
    st0 = st0.at[:, 98:100].set(coverage_vector)
    st0 = st0.at[:, 100].set(vb)
    st1 = jnp.zeros((B, LANES), f32)
    st1 = st1.at[:, 0:H].set(h0[0]).at[:, H:2 * H].set(h0[1])
    st1 = st1.at[:, 2 * H:3 * H].set(c0[0]).at[:, 3 * H:4 * H].set(c0[1])
    aux = jnp.zeros((8, LANES), f32)
    aux = aux.at[0, :].set(params['b0'][0]).at[1, :].set(params['b1'][0])
    aux = aux.at[2, 0:H].set(va).at[2, H:2 * H].set(va)

    # target -> selection mask over [head(7) | tail0(15) | tail1(80)] lanes (index glue)
    tgt = jnp.transpose(target).reshape(-1).astype(jnp.int32)   # time-major, matches row order
    lane = jnp.arange(LANES, dtype=jnp.int32)[None, :]
    in_head = tgt < CUTOFF0
    in_c0 = jnp.logical_and(tgt >= CUTOFF0, tgt < CUTOFF1)
    head_lane = jnp.where(in_head, tgt, jnp.where(in_c0, CUTOFF0, CUTOFF0 + 1))
    tail_lane = jnp.where(in_head, -1,
                          jnp.where(in_c0, HEAD_SIZE + tgt - CUTOFF0,
                                    HEAD_SIZE + CL0_SIZE + tgt - CUTOFF1))
    sel = ((lane == head_lane[:, None]).astype(f32)
           + (lane == tail_lane[:, None]).astype(f32))          # [64, 128]
    sslab = jnp.concatenate([st0, st1, aux, sel], axis=0)       # [88, 128]

    big, small = run_mtalstm_fused(emb_flat, wslab, sslab)

    output_states = big[:, 0:H].reshape(T, B, H).reshape(T, 1, B, H)
    attn = big[:, H:H + K].reshape(T, B, K)
    nll = big[:, H + K]
    hT = jnp.stack([small[0:B, 0:H], small[0:B, H:2 * H]], axis=0)
    cT = jnp.stack([small[0:B, 2 * H:3 * H], small[0:B, 3 * H:4 * H]], axis=0)
    covT = small[B:2 * B, 0:K]
    loss = small[B, K]
    return (nll, loss), output_states, (hT, cT), attn, covT


if __name__ == "__main__":
    key = jax.random.PRNGKey(0)
    ks = jax.random.split(key, 24)
    s = 0.1
    params = {
        'embedding':       jax.random.normal(ks[0], (VOCAB, E), jnp.float32) * s,
        'embedding_topic': jax.random.normal(ks[1], (TOPIC_VOCAB, E), jnp.float32) * s,
        'Uf':              jax.random.normal(ks[2], (K * E, K), jnp.float32) * s,
        'Ua':              jax.random.normal(ks[3], (E, H), jnp.float32) * s,
        'Wa':              jax.random.normal(ks[4], (H, H), jnp.float32) * s,
        'va_w':            jax.random.normal(ks[5], (H, 1), jnp.float32) * s,
        'va_b':            jax.random.normal(ks[6], (1, 1), jnp.float32) * s,
        'w_ih0':           jax.random.normal(ks[7], (2 * E, 4 * H), jnp.float32) * s,
        'w_hh0':           jax.random.normal(ks[8], (H, 4 * H), jnp.float32) * s,
        'b0':              jax.random.normal(ks[9], (1, 4 * H), jnp.float32) * s,
        'w_ih1':           jax.random.normal(ks[10], (H, 4 * H), jnp.float32) * s,
        'w_hh1':           jax.random.normal(ks[11], (H, 4 * H), jnp.float32) * s,
        'b1':              jax.random.normal(ks[12], (1, 4 * H), jnp.float32) * s,
        'asm_head':        jax.random.normal(ks[13], (H, HEAD_SIZE), jnp.float32) * s,
        'asm_p0':          jax.random.normal(ks[14], (H, PROJ0), jnp.float32) * s,
        'asm_w0':          jax.random.normal(ks[15], (PROJ0, CL0_SIZE), jnp.float32) * s,
        'asm_p1':          jax.random.normal(ks[16], (H, PROJ1), jnp.float32) * s,
        'asm_w1':          jax.random.normal(ks[17], (PROJ1, CL1_SIZE), jnp.float32) * s,
    }

    inputs = jax.random.randint(ks[18], (B, T), 0, VOCAB)
    topics = jax.random.randint(ks[19], (B, K), 0, TOPIC_VOCAB)
    target = jax.random.randint(ks[20], (B, T), 0, NUM_LABELS)
    mask = jnp.ones((B, T), jnp.float32)
    output0 = jnp.zeros((1, B, H), jnp.float32)
    hidden = (jnp.zeros((L, B, H), jnp.float32), jnp.zeros((L, B, H), jnp.float32))
    coverage = jnp.ones((B, K), jnp.float32)

    outs = mtalstm_forward(params, inputs, topics, output0, hidden, mask, target, coverage)
    jax.block_until_ready(outs)
    print("KERNEL_OK")
</pallas_src>

<mosaic_0001>
module attributes {stable_mosaic.version = 11 : i64} {
  func.func @mtalstm_kernel(%arg0: memref<64x32xf32, #tpu.memory_space<vmem>>, %arg1: memref<288x128xbf16, #tpu.memory_space<vmem>>, %arg2: memref<88x128xf32, #tpu.memory_space<vmem>>, %arg3: memref<64x128xf32, #tpu.memory_space<vmem>>, %arg4: memref<16x128xf32, #tpu.memory_space<vmem>>, %arg5: memref<64x32xf32, #tpu.memory_space<vmem>>, %arg6: memref<64x2xf32, #tpu.memory_space<vmem>>) attributes {dimension_semantics = [], scalar_prefetch = 0 : i64, scratch_operands = 2 : i64, tpu.core_type = #tpu.core_type<tc>} {
    %c0 = arith.constant 0 : index
    %c0_0 = arith.constant 0 : index
    %0 = vector.load %arg2[%c0, %c0_0] : memref<88x128xf32, #tpu.memory_space<vmem>>, vector<8x128xf32>
    %c8 = arith.constant 8 : index
    %c0_1 = arith.constant 0 : index
    %1 = vector.load %arg2[%c8, %c0_1] : memref<88x128xf32, #tpu.memory_space<vmem>>, vector<8x128xf32>
    %c16 = arith.constant 16 : index
    %c0_2 = arith.constant 0 : index
    %2 = vector.load %arg2[%c16, %c0_2] : memref<88x128xf32, #tpu.memory_space<vmem>>, vector<8x128xf32>
    %3 = vector.extract_strided_slice %0 {offsets = [0, 0], sizes = [8, 32], strides = [1, 1]} : vector<8x128xf32> to vector<8x32xf32>
    %4 = vector.extract_strided_slice %0 {offsets = [0, 32], sizes = [8, 32], strides = [1, 1]} : vector<8x128xf32> to vector<8x32xf32>
    %5 = vector.extract_strided_slice %0 {offsets = [0, 64], sizes = [8, 32], strides = [1, 1]} : vector<8x128xf32> to vector<8x32xf32>
    %6 = vector.extract_strided_slice %0 {offsets = [0, 96], sizes = [8, 1], strides = [1, 1]} : vector<8x128xf32> to vector<8x1xf32>
    %7 = vector.extract_strided_slice %0 {offsets = [0, 97], sizes = [8, 1], strides = [1, 1]} : vector<8x128xf32> to vector<8x1xf32>
    %8 = vector.extract_strided_slice %0 {offsets = [0, 98], sizes = [8, 1], strides = [1, 1]} : vector<8x128xf32> to vector<8x1xf32>
    %9 = vector.extract_strided_slice %0 {offsets = [0, 99], sizes = [8, 1], strides = [1, 1]} : vector<8x128xf32> to vector<8x1xf32>
    %10 = vector.extract_strided_slice %0 {offsets = [0, 100], sizes = [8, 1], strides = [1, 1]} : vector<8x128xf32> to vector<8x1xf32>
    %11 = vector.extract_strided_slice %1 {offsets = [0, 0], sizes = [8, 32], strides = [1, 1]} : vector<8x128xf32> to vector<8x32xf32>
    %12 = vector.extract_strided_slice %1 {offsets = [0, 32], sizes = [8, 32], strides = [1, 1]} : vector<8x128xf32> to vector<8x32xf32>
    %13 = vector.extract_strided_slice %1 {offsets = [0, 64], sizes = [8, 32], strides = [1, 1]} : vector<8x128xf32> to vector<8x32xf32>
    %14 = vector.extract_strided_slice %1 {offsets = [0, 96], sizes = [8, 32], strides = [1, 1]} : vector<8x128xf32> to vector<8x32xf32>
    %15 = vector.extract_strided_slice %2 {offsets = [0, 0], sizes = [1, 128], strides = [1, 1]} : vector<8x128xf32> to vector<1x128xf32>
    %16 = vector.extract_strided_slice %2 {offsets = [1, 0], sizes = [1, 128], strides = [1, 1]} : vector<8x128xf32> to vector<1x128xf32>
    %17 = vector.extract_strided_slice %2 {offsets = [2, 0], sizes = [1, 128], strides = [1, 1]} : vector<8x128xf32> to vector<1x128xf32>
    %cst = arith.constant 1.000000e+00 : f32
    %18 = vector.broadcast %cst : f32 to vector<8x1xf32>
    %19 = arith.divf %18, %6 : vector<8x1xf32>
    %cst_3 = arith.constant 1.000000e+00 : f32
    %20 = vector.broadcast %cst_3 : f32 to vector<8x1xf32>
    %21 = arith.divf %20, %7 : vector<8x1xf32>
    %22 = arith.subf %4, %5 : vector<8x32xf32>
    %23 = vector.extract_strided_slice %0 {offsets = [0, 32], sizes = [8, 64], strides = [1, 1]} : vector<8x128xf32> to vector<8x64xf32>
    %24 = arith.truncf %23 : vector<8x64xf32> to vector<8x64xbf16>
    %c192 = arith.constant 192 : index
    %c0_4 = arith.constant 0 : index
    %25 = vector.load %arg1[%c192, %c0_4] : memref<288x128xbf16, #tpu.memory_space<vmem>>, vector<64x128xbf16>
    %cst_5 = arith.constant dense<0.000000e+00> : vector<8x128xf32>
    %26 = tpu.matmul %24, %25, %cst_5 {dimension_numbers = #tpu.dot_dimension_numbers<[1], [0], [0], [1], [0, 0, 1, 1], [], []>} : vector<8x64xbf16>, vector<64x128xbf16>, vector<8x128xf32> -> vector<8x128xf32>
    %27 = arith.truncf %3 : vector<8x32xf32> to vector<8x32xbf16>
    %c160 = arith.constant 160 : index
    %c0_6 = arith.constant 0 : index
    %28 = vector.load %arg1[%c160, %c0_6] : memref<288x128xbf16, #tpu.memory_space<vmem>>, vector<32x128xbf16>
    %cst_7 = arith.constant dense<0.000000e+00> : vector<8x128xf32>
    %29 = tpu.matmul %27, %28, %cst_7 {dimension_numbers = #tpu.dot_dimension_numbers<[1], [0], [0], [1], [0, 0, 1, 1], [], []>} : vector<8x32xbf16>, vector<32x128xbf16>, vector<8x128xf32> -> vector<8x128xf32>
    %30 = arith.addf %29, %26 : vector<8x128xf32>
    %31 = math.tanh %30 : vector<8x128xf32>
    %32 = vector.broadcast %17 : vector<1x128xf32> to vector<8x128xf32>
    %33 = arith.mulf %31, %32 : vector<8x128xf32>
    %34 = vector.extract_strided_slice %33 {offsets = [0, 0], sizes = [8, 32], strides = [1, 1]} : vector<8x128xf32> to vector<8x32xf32>
    %cst_8 = arith.constant dense<0.000000e+00> : vector<8xf32>
    %35 = vector.multi_reduction <add>, %34, %cst_8 [1] : vector<8x32xf32> to vector<8xf32>
    %36 = vector.shape_cast %35 : vector<8xf32> to vector<8x1xf32>
    %37 = arith.addf %36, %10 : vector<8x1xf32>
    %38 = vector.extract_strided_slice %33 {offsets = [0, 32], sizes = [8, 32], strides = [1, 1]} : vector<8x128xf32> to vector<8x32xf32>
    %cst_9 = arith.constant dense<0.000000e+00> : vector<8xf32>
    %39 = vector.multi_reduction <add>, %38, %cst_9 [1] : vector<8x32xf32> to vector<8xf32>
    %40 = vector.shape_cast %39 : vector<8xf32> to vector<8x1xf32>
    %41 = arith.addf %40, %10 : vector<8x1xf32>
    %42 = arith.mulf %37, %8 : vector<8x1xf32>
    %43 = arith.mulf %41, %9 : vector<8x1xf32>
    %44 = arith.subf %42, %43 : vector<8x1xf32>
    %45 = arith.negf %44 : vector<8x1xf32>
    %46 = math.exp %45 : vector<8x1xf32>
    %cst_10 = arith.constant 1.000000e+00 : f32
    %47 = vector.broadcast %cst_10 : f32 to vector<8x1xf32>
    %48 = arith.addf %47, %46 : vector<8x1xf32>
    %49 = arith.divf %47, %48 : vector<8x1xf32>
    %cst_11 = arith.constant 1.000000e+00 : f32
    %50 = vector.broadcast %cst_11 : f32 to vector<8x1xf32>
    %51 = arith.subf %50, %49 : vector<8x1xf32>
    %52 = vector.broadcast %49 : vector<8x1xf32> to vector<8x32xf32>
    %53 = arith.mulf %52, %22 : vector<8x32xf32>
    %54 = arith.addf %5, %53 : vector<8x32xf32>
    %55 = arith.mulf %49, %19 : vector<8x1xf32>
    %56 = arith.subf %8, %55 : vector<8x1xf32>
    %57 = arith.mulf %51, %21 : vector<8x1xf32>
    %58 = arith.subf %9, %57 : vector<8x1xf32>
    %59 = tpu.concatenate %49, %51 in 1 : vector<8x1xf32>, vector<8x1xf32> -> vector<8x2xf32>
    %c0_12 = arith.constant 0 : index
    %c0_13 = arith.constant 0 : index
    %60 = vector.load %arg6[%c0_12, %c0_13] : memref<64x2xf32, #tpu.memory_space<vmem>>, vector<8x2xf32>
    tpu.vector_store %arg6[%c0_12, %c0_13], %59 {strides = array<i32>} : memref<64x2xf32, #tpu.memory_space<vmem>>, vector<8x2xf32>,
    %c0_14 = arith.constant 0 : index
    %c0_15 = arith.constant 0 : index
    %61 = vector.load %arg0[%c0_14, %c0_15] : memref<64x32xf32, #tpu.memory_space<vmem>>, vector<8x32xf32>
    %62 = tpu.concatenate %61, %54, %11 in 1 : vector<8x32xf32>, vector<8x32xf32>, vector<8x32xf32> -> vector<8x96xf32>
    %63 = arith.truncf %62 : vector<8x96xf32> to vector<8x96xbf16>
    %c0_16 = arith.constant 0 : index
    %c0_17 = arith.constant 0 : index
    %64 = vector.load %arg1[%c0_16, %c0_17] : memref<288x128xbf16, #tpu.memory_space<vmem>>, vector<96x128xbf16>
    %cst_18 = arith.constant dense<0.000000e+00> : vector<8x128xf32>
    %65 = tpu.matmul %63, %64, %cst_18 {dimension_numbers = #tpu.dot_dimension_numbers<[1], [0], [0], [1], [0, 0, 1, 1], [], []>} : vector<8x96xbf16>, vector<96x128xbf16>, vector<8x128xf32> -> vector<8x128xf32>
    %66 = vector.broadcast %15 : vector<1x128xf32> to vector<8x128xf32>
    %67 = arith.addf %65, %66 : vector<8x128xf32>
    %68 = vector.extract_strided_slice %67 {offsets = [0, 32], sizes = [8, 32], strides = [1, 1]} : vector<8x128xf32> to vector<8x32xf32>
    %69 = arith.negf %68 : vector<8x32xf32>
    %70 = math.exp %69 : vector<8x32xf32>
    %cst_19 = arith.constant 1.000000e+00 : f32
    %71 = vector.broadcast %cst_19 : f32 to vector<8x32xf32>
    %72 = arith.addf %71, %70 : vector<8x32xf32>
    %73 = arith.divf %71, %72 : vector<8x32xf32>
    %74 = arith.mulf %73, %13 : vector<8x32xf32>
    %75 = vector.extract_strided_slice %67 {offsets = [0, 0], sizes = [8, 32], strides = [1, 1]} : vector<8x128xf32> to vector<8x32xf32>
    %76 = arith.negf %75 : vector<8x32xf32>
    %77 = math.exp %76 : vector<8x32xf32>
    %cst_20 = arith.constant 1.000000e+00 : f32
    %78 = vector.broadcast %cst_20 : f32 to vector<8x32xf32>
    %79 = arith.addf %78, %77 : vector<8x32xf32>
    %80 = arith.divf %78, %79 : vector<8x32xf32>
    %81 = vector.extract_strided_slice %67 {offsets = [0, 64], sizes = [8, 32], strides = [1, 1]} : vector<8x128xf32> to vector<8x32xf32>
    %82 = math.tanh %81 : vector<8x32xf32>
    %83 = arith.mulf %80, %82 : vector<8x32xf32>
    %84 = arith.addf %74, %83 : vector<8x32xf32>
    %85 = vector.extract_strided_slice %67 {offsets = [0, 96], sizes = [8, 32], strides = [1, 1]} : vector<8x128xf32> to vector<8x32xf32>
    %86 = arith.negf %85 : vector<8x32xf32>
    %87 = math.exp %86 : vector<8x32xf32>
    %cst_21 = arith.constant 1.000000e+00 : f32
    %88 = vector.broadcast %cst_21 : f32 to vector<8x32xf32>
    %89 = arith.addf %88, %87 : vector<8x32xf32>
    %90 = arith.divf %88, %89 : vector<8x32xf32>
    %91 = math.tanh %84 : vector<8x32xf32>
    %92 = arith.mulf %90, %91 : vector<8x32xf32>
    %93 = tpu.concatenate %92, %12 in 1 : vector<8x32xf32>, vector<8x32xf32> -> vector<8x64xf32>
    %94 = arith.truncf %93 : vector<8x64xf32> to vector<8x64xbf16>
    %c96 = arith.constant 96 : index
    %c0_22 = arith.constant 0 : index
    %95 = vector.load %arg1[%c96, %c0_22] : memref<288x128xbf16, #tpu.memory_space<vmem>>, vector<64x128xbf16>
    %cst_23 = arith.constant dense<0.000000e+00> : vector<8x128xf32>
    %96 = tpu.matmul %94, %95, %cst_23 {dimension_numbers = #tpu.dot_dimension_numbers<[1], [0], [0], [1], [0, 0, 1, 1], [], []>} : vector<8x64xbf16>, vector<64x128xbf16>, vector<8x128xf32> -> vector<8x128xf32>
    %97 = vector.broadcast %16 : vector<1x128xf32> to vector<8x128xf32>
    %98 = arith.addf %96, %97 : vector<8x128xf32>
    %99 = vector.extract_strided_slice %98 {offsets = [0, 32], sizes = [8, 32], strides = [1, 1]} : vector<8x128xf32> to vector<8x32xf32>
    %100 = arith.negf %99 : vector<8x32xf32>
    %101 = math.exp %100 : vector<8x32xf32>
    %cst_24 = arith.constant 1.000000e+00 : f32
    %102 = vector.broadcast %cst_24 : f32 to vector<8x32xf32>
    %103 = arith.addf %102, %101 : vector<8x32xf32>
    %104 = arith.divf %102, %103 : vector<8x32xf32>
    %105 = arith.mulf %104, %14 : vector<8x32xf32>
    %106 = vector.extract_strided_slice %98 {offsets = [0, 0], sizes = [8, 32], strides = [1, 1]} : vector<8x128xf32> to vector<8x32xf32>
    %107 = arith.negf %106 : vector<8x32xf32>
    %108 = math.exp %107 : vector<8x32xf32>
    %cst_25 = arith.constant 1.000000e+00 : f32
    %109 = vector.broadcast %cst_25 : f32 to vector<8x32xf32>
    %110 = arith.addf %109, %108 : vector<8x32xf32>
    %111 = arith.divf %109, %110 : vector<8x32xf32>
    %112 = vector.extract_strided_slice %98 {offsets = [0, 64], sizes = [8, 32], strides = [1, 1]} : vector<8x128xf32> to vector<8x32xf32>
    %113 = math.tanh %112 : vector<8x32xf32>
    %114 = arith.mulf %111, %113 : vector<8x32xf32>
    %115 = arith.addf %105, %114 : vector<8x32xf32>
    %116 = vector.extract_strided_slice %98 {offsets = [0, 96], sizes = [8, 32], strides = [1, 1]} : vector<8x128xf32> to vector<8x32xf32>
    %117 = arith.negf %116 : vector<8x32xf32>
    %118 = math.exp %117 : vector<8x32xf32>
    %cst_26 = arith.constant 1.000000e+00 : f32
    %119 = vector.broadcast %cst_26 : f32 to vector<8x32xf32>
    %120 = arith.addf %119, %118 : vector<8x32xf32>
    %121 = arith.divf %119, %120 : vector<8x32xf32>
    %122 = math.tanh %115 : vector<8x32xf32>
    %123 = arith.mulf %121, %122 : vector<8x32xf32>
    %c0_27 = arith.constant 0 : index
    %c0_28 = arith.constant 0 : index
    %124 = vector.load %arg5[%c0_27, %c0_28] : memref<64x32xf32, #tpu.memory_space<vmem>>, vector<8x32xf32>
    tpu.vector_store %arg5[%c0_27, %c0_28], %123 {strides = array<i32>} : memref<64x32xf32, #tpu.memory_space<vmem>>, vector<8x32xf32>,
    %125 = arith.truncf %123 : vector<8x32xf32> to vector<8x32xbf16>
    %c160_29 = arith.constant 160 : index
    %c0_30 = arith.constant 0 : index
    %126 = vector.load %arg1[%c160_29, %c0_30] : memref<288x128xbf16, #tpu.memory_space<vmem>>, vector<32x128xbf16>
    %cst_31 = arith.constant dense<0.000000e+00> : vector<8x128xf32>
    %127 = tpu.matmul %125, %126, %cst_31 {dimension_numbers = #tpu.dot_dimension_numbers<[1], [0], [0], [1], [0, 0, 1, 1], [], []>} : vector<8x32xbf16>, vector<32x128xbf16>, vector<8x128xf32> -> vector<8x128xf32>
    %128 = arith.addf %127, %26 : vector<8x128xf32>
    %129 = math.tanh %128 : vector<8x128xf32>
    %130 = vector.broadcast %17 : vector<1x128xf32> to vector<8x128xf32>
    %131 = arith.mulf %129, %130 : vector<8x128xf32>
    %132 = vector.extract_strided_slice %131 {offsets = [0, 0], sizes = [8, 32], strides = [1, 1]} : vector<8x128xf32> to vector<8x32xf32>
    %cst_32 = arith.constant dense<0.000000e+00> : vector<8xf32>
    %133 = vector.multi_reduction <add>, %132, %cst_32 [1] : vector<8x32xf32> to vector<8xf32>
    %134 = vector.shape_cast %133 : vector<8xf32> to vector<8x1xf32>
    %135 = arith.addf %134, %10 : vector<8x1xf32>
    %136 = vector.extract_strided_slice %131 {offsets = [0, 32], sizes = [8, 32], strides = [1, 1]} : vector<8x128xf32> to vector<8x32xf32>
    %cst_33 = arith.constant dense<0.000000e+00> : vector<8xf32>
    %137 = vector.multi_reduction <add>, %136, %cst_33 [1] : vector<8x32xf32> to vector<8xf32>
    %138 = vector.shape_cast %137 : vector<8xf32> to vector<8x1xf32>
    %139 = arith.addf %138, %10 : vector<8x1xf32>
    %140 = arith.mulf %135, %56 : vector<8x1xf32>
    %141 = arith.mulf %139, %58 : vector<8x1xf32>
    %142 = arith.subf %140, %141 : vector<8x1xf32>
    %143 = arith.negf %142 : vector<8x1xf32>
    %144 = math.exp %143 : vector<8x1xf32>
    %cst_34 = arith.constant 1.000000e+00 : f32
    %145 = vector.broadcast %cst_34 : f32 to vector<8x1xf32>
    %146 = arith.addf %145, %144 : vector<8x1xf32>
    %147 = arith.divf %145, %146 : vector<8x1xf32>
    %cst_35 = arith.constant 1.000000e+00 : f32
    %148 = vector.broadcast %cst_35 : f32 to vector<8x1xf32>
    %149 = arith.subf %148, %147 : vector<8x1xf32>
    %150 = vector.broadcast %147 : vector<8x1xf32> to vector<8x32xf32>
    %151 = arith.mulf %150, %22 : vector<8x32xf32>
    %152 = arith.addf %5, %151 : vector<8x32xf32>
    %153 = arith.mulf %147, %19 : vector<8x1xf32>
    %154 = arith.subf %56, %153 : vector<8x1xf32>
    %155 = arith.mulf %149, %21 : vector<8x1xf32>
    %156 = arith.subf %58, %155 : vector<8x1xf32>
    %157 = tpu.concatenate %147, %149 in 1 : vector<8x1xf32>, vector<8x1xf32> -> vector<8x2xf32>
    %c8_36 = arith.constant 8 : index
    %c0_37 = arith.constant 0 : index
    %158 = vector.load %arg6[%c8_36, %c0_37] : memref<64x2xf32, #tpu.memory_space<vmem>>, vector<8x2xf32>
    tpu.vector_store %arg6[%c8_36, %c0_37], %157 {strides = array<i32>} : memref<64x2xf32, #tpu.memory_space<vmem>>, vector<8x2xf32>,
    %c8_38 = arith.constant 8 : index
    %c0_39 = arith.constant 0 : index
    %159 = vector.load %arg0[%c8_38, %c0_39] : memref<64x32xf32, #tpu.memory_space<vmem>>, vector<8x32xf32>
    %160 = tpu.concatenate %159, %152, %92 in 1 : vector<8x32xf32>, vector<8x32xf32>, vector<8x32xf32> -> vector<8x96xf32>
    %161 = arith.truncf %160 : vector<8x96xf32> to vector<8x96xbf16>
    %c0_40 = arith.constant 0 : index
    %c0_41 = arith.constant 0 : index
    %162 = vector.load %arg1[%c0_40, %c0_41] : memref<288x128xbf16, #tpu.memory_space<vmem>>, vector<96x128xbf16>
    %cst_42 = arith.constant dense<0.000000e+00> : vector<8x128xf32>
    %163 = tpu.matmul %161, %162, %cst_42 {dimension_numbers = #tpu.dot_dimension_numbers<[1], [0], [0], [1], [0, 0, 1, 1], [], []>} : vector<8x96xbf16>, vector<96x128xbf16>, vector<8x128xf32> -> vector<8x128xf32>
    %164 = vector.broadcast %15 : vector<1x128xf32> to vector<8x128xf32>
    %165 = arith.addf %163, %164 : vector<8x128xf32>
    %166 = vector.extract_strided_slice %165 {offsets = [0, 32], sizes = [8, 32], strides = [1, 1]} : vector<8x128xf32> to vector<8x32xf32>
    %167 = arith.negf %166 : vector<8x32xf32>
    %168 = math.exp %167 : vector<8x32xf32>
    %cst_43 = arith.constant 1.000000e+00 : f32
    %169 = vector.broadcast %cst_43 : f32 to vector<8x32xf32>
    %170 = arith.addf %169, %168 : vector<8x32xf32>
    %171 = arith.divf %169, %170 : vector<8x32xf32>
    %172 = arith.mulf %171, %84 : vector<8x32xf32>
    %173 = vector.extract_strided_slice %165 {offsets = [0, 0], sizes = [8, 32], strides = [1, 1]} : vector<8x128xf32> to vector<8x32xf32>
    %174 = arith.negf %173 : vector<8x32xf32>
    %175 = math.exp %174 : vector<8x32xf32>
    %cst_44 = arith.constant 1.000000e+00 : f32
    %176 = vector.broadcast %cst_44 : f32 to vector<8x32xf32>
    %177 = arith.addf %176, %175 : vector<8x32xf32>
    %178 = arith.divf %176, %177 : vector<8x32xf32>
    %179 = vector.extract_strided_slice %165 {offsets = [0, 64], sizes = [8, 32], strides = [1, 1]} : vector<8x128xf32> to vector<8x32xf32>
    %180 = math.tanh %179 : vector<8x32xf32>
    %181 = arith.mulf %178, %180 : vector<8x32xf32>
    %182 = arith.addf %172, %181 : vector<8x32xf32>
    %183 = vector.extract_strided_slice %165 {offsets = [0, 96], sizes = [8, 32], strides = [1, 1]} : vector<8x128xf32> to vector<8x32xf32>
    %184 = arith.negf %183 : vector<8x32xf32>
    %185 = math.exp %184 : vector<8x32xf32>
    %cst_45 = arith.constant 1.000000e+00 : f32
    %186 = vector.broadcast %cst_45 : f32 to vector<8x32xf32>
    %187 = arith.addf %186, %185 : vector<8x32xf32>
    %188 = arith.divf %186, %187 : vector<8x32xf32>
    %189 = math.tanh %182 : vector<8x32xf32>
    %190 = arith.mulf %188, %189 : vector<8x32xf32>
    %191 = tpu.concatenate %190, %123 in 1 : vector<8x32xf32>, vector<8x32xf32> -> vector<8x64xf32>
    %192 = arith.truncf %191 : vector<8x64xf32> to vector<8x64xbf16>
    %c96_46 = arith.constant 96 : index
    %c0_47 = arith.constant 0 : index
    %193 = vector.load %arg1[%c96_46, %c0_47] : memref<288x128xbf16, #tpu.memory_space<vmem>>, vector<64x128xbf16>
    %cst_48 = arith.constant dense<0.000000e+00> : vector<8x128xf32>
    %194 = tpu.matmul %192, %193, %cst_48 {dimension_numbers = #tpu.dot_dimension_numbers<[1], [0], [0], [1], [0, 0, 1, 1], [], []>} : vector<8x64xbf16>, vector<64x128xbf16>, vector<8x128xf32> -> vector<8x128xf32>
    %195 = vector.broadcast %16 : vector<1x128xf32> to vector<8x128xf32>
    %196 = arith.addf %194, %195 : vector<8x128xf32>
    %197 = vector.extract_strided_slice %196 {offsets = [0, 32], sizes = [8, 32], strides = [1, 1]} : vector<8x128xf32> to vector<8x32xf32>
    %198 = arith.negf %197 : vector<8x32xf32>
    %199 = math.exp %198 : vector<8x32xf32>
    %cst_49 = arith.constant 1.000000e+00 : f32
    %200 = vector.broadcast %cst_49 : f32 to vector<8x32xf32>
    %201 = arith.addf %200, %199 : vector<8x32xf32>
    %202 = arith.divf %200, %201 : vector<8x32xf32>
    %203 = arith.mulf %202, %115 : vector<8x32xf32>
    %204 = vector.extract_strided_slice %196 {offsets = [0, 0], sizes = [8, 32], strides = [1, 1]} : vector<8x128xf32> to vector<8x32xf32>
    %205 = arith.negf %204 : vector<8x32xf32>
    %206 = math.exp %205 : vector<8x32xf32>
    %cst_50 = arith.constant 1.000000e+00 : f32
    %207 = vector.broadcast %cst_50 : f32 to vector<8x32xf32>
    %208 = arith.addf %207, %206 : vector<8x32xf32>
    %209 = arith.divf %207, %208 : vector<8x32xf32>
    %210 = vector.extract_strided_slice %196 {offsets = [0, 64], sizes = [8, 32], strides = [1, 1]} : vector<8x128xf32> to vector<8x32xf32>
    %211 = math.tanh %210 : vector<8x32xf32>
    %212 = arith.mulf %209, %211 : vector<8x32xf32>
    %213 = arith.addf %203, %212 : vector<8x32xf32>
    %214 = vector.extract_strided_slice %196 {offsets = [0, 96], sizes = [8, 32], strides = [1, 1]} : vector<8x128xf32> to vector<8x32xf32>
    %215 = arith.negf %214 : vector<8x32xf32>
    %216 = math.exp %215 : vector<8x32xf32>
    %cst_51 = arith.constant 1.000000e+00 : f32
    %217 = vector.broadcast %cst_51 : f32 to vector<8x32xf32>
    %218 = arith.addf %217, %216 : vector<8x32xf32>
    %219 = arith.divf %217, %218 : vector<8x32xf32>
    %220 = math.tanh %213 : vector<8x32xf32>
    %221 = arith.mulf %219, %220 : vector<8x32xf32>
    %c8_52 = arith.constant 8 : index
    %c0_53 = arith.constant 0 : index
    %222 = vector.load %arg5[%c8_52, %c0_53] : memref<64x32xf32, #tpu.memory_space<vmem>>, vector<8x32xf32>
    tpu.vector_store %arg5[%c8_52, %c0_53], %221 {strides = array<i32>} : memref<64x32xf32, #tpu.memory_space<vmem>>, vector<8x32xf32>,
    %223 = arith.truncf %221 : vector<8x32xf32> to vector<8x32xbf16>
    %c160_54 = arith.constant 160 : index
    %c0_55 = arith.constant 0 : index
    %224 = vector.load %arg1[%c160_54, %c0_55] : memref<288x128xbf16, #tpu.memory_space<vmem>>, vector<32x128xbf16>
    %cst_56 = arith.constant dense<0.000000e+00> : vector<8x128xf32>
    %225 = tpu.matmul %223, %224, %cst_56 {dimension_numbers = #tpu.dot_dimension_numbers<[1], [0], [0], [1], [0, 0, 1, 1], [], []>} : vector<8x32xbf16>, vector<32x128xbf16>, vector<8x128xf32> -> vector<8x128xf32>
    %226 = arith.addf %225, %26 : vector<8x128xf32>
    %227 = math.tanh %226 : vector<8x128xf32>
    %228 = vector.broadcast %17 : vector<1x128xf32> to vector<8x128xf32>
    %229 = arith.mulf %227, %228 : vector<8x128xf32>
    %230 = vector.extract_strided_slice %229 {offsets = [0, 0], sizes = [8, 32], strides = [1, 1]} : vector<8x128xf32> to vector<8x32xf32>
    %cst_57 = arith.constant dense<0.000000e+00> : vector<8xf32>
    %231 = vector.multi_reduction <add>, %230, %cst_57 [1] : vector<8x32xf32> to vector<8xf32>
    %232 = vector.shape_cast %231 : vector<8xf32> to vector<8x1xf32>
    %233 = arith.addf %232, %10 : vector<8x1xf32>
    %234 = vector.extract_strided_slice %229 {offsets = [0, 32], sizes = [8, 32], strides = [1, 1]} : vector<8x128xf32> to vector<8x32xf32>
    %cst_58 = arith.constant dense<0.000000e+00> : vector<8xf32>
    %235 = vector.multi_reduction <add>, %234, %cst_58 [1] : vector<8x32xf32> to vector<8xf32>
    %236 = vector.shape_cast %235 : vector<8xf32> to vector<8x1xf32>
    %237 = arith.addf %236, %10 : vector<8x1xf32>
    %238 = arith.mulf %233, %154 : vector<8x1xf32>
    %239 = arith.mulf %237, %156 : vector<8x1xf32>
    %240 = arith.subf %238, %239 : vector<8x1xf32>
    %241 = arith.negf %240 : vector<8x1xf32>
    %242 = math.exp %241 : vector<8x1xf32>
    %cst_59 = arith.constant 1.000000e+00 : f32
    %243 = vector.broadcast %cst_59 : f32 to vector<8x1xf32>
    %244 = arith.addf %243, %242 : vector<8x1xf32>
    %245 = arith.divf %243, %244 : vector<8x1xf32>
    %cst_60 = arith.constant 1.000000e+00 : f32
    %246 = vector.broadcast %cst_60 : f32 to vector<8x1xf32>
    %247 = arith.subf %246, %245 : vector<8x1xf32>
    %248 = vector.broadcast %245 : vector<8x1xf32> to vector<8x32xf32>
    %249 = arith.mulf %248, %22 : vector<8x32xf32>
    %250 = arith.addf %5, %249 : vector<8x32xf32>
    %251 = arith.mulf %245, %19 : vector<8x1xf32>
    %252 = arith.subf %154, %251 : vector<8x1xf32>
    %253 = arith.mulf %247, %21 : vector<8x1xf32>
    %254 = arith.subf %156, %253 : vector<8x1xf32>
    %255 = tpu.concatenate %245, %247 in 1 : vector<8x1xf32>, vector<8x1xf32> -> vector<8x2xf32>
    %c16_61 = arith.constant 16 : index
    %c0_62 = arith.constant 0 : index
    %256 = vector.load %arg6[%c16_61, %c0_62] : memref<64x2xf32, #tpu.memory_space<vmem>>, vector<8x2xf32>
    tpu.vector_store %arg6[%c16_61, %c0_62], %255 {strides = array<i32>} : memref<64x2xf32, #tpu.memory_space<vmem>>, vector<8x2xf32>,
    %c16_63 = arith.constant 16 : index
    %c0_64 = arith.constant 0 : index
    %257 = vector.load %arg0[%c16_63, %c0_64] : memref<64x32xf32, #tpu.memory_space<vmem>>, vector<8x32xf32>
    %258 = tpu.concatenate %257, %250, %190 in 1 : vector<8x32xf32>, vector<8x32xf32>, vector<8x32xf32> -> vector<8x96xf32>
    %259 = arith.truncf %258 : vector<8x96xf32> to vector<8x96xbf16>
    %c0_65 = arith.constant 0 : index
    %c0_66 = arith.constant 0 : index
    %260 = vector.load %arg1[%c0_65, %c0_66] : memref<288x128xbf16, #tpu.memory_space<vmem>>, vector<96x128xbf16>
    %cst_67 = arith.constant dense<0.000000e+00> : vector<8x128xf32>
    %261 = tpu.matmul %259, %260, %cst_67 {dimension_numbers = #tpu.dot_dimension_numbers<[1], [0], [0], [1], [0, 0, 1, 1], [], []>} : vector<8x96xbf16>, vector<96x128xbf16>, vector<8x128xf32> -> vector<8x128xf32>
    %262 = vector.broadcast %15 : vector<1x128xf32> to vector<8x128xf32>
    %263 = arith.addf %261, %262 : vector<8x128xf32>
    %264 = vector.extract_strided_slice %263 {offsets = [0, 32], sizes = [8, 32], strides = [1, 1]} : vector<8x128xf32> to vector<8x32xf32>
    %265 = arith.negf %264 : vector<8x32xf32>
    %266 = math.exp %265 : vector<8x32xf32>
    %cst_68 = arith.constant 1.000000e+00 : f32
    %267 = vector.broadcast %cst_68 : f32 to vector<8x32xf32>
    %268 = arith.addf %267, %266 : vector<8x32xf32>
    %269 = arith.divf %267, %268 : vector<8x32xf32>
    %270 = arith.mulf %269, %182 : vector<8x32xf32>
    %271 = vector.extract_strided_slice %263 {offsets = [0, 0], sizes = [8, 32], strides = [1, 1]} : vector<8x128xf32> to vector<8x32xf32>
    %272 = arith.negf %271 : vector<8x32xf32>
    %273 = math.exp %272 : vector<8x32xf32>
    %cst_69 = arith.constant 1.000000e+00 : f32
    %274 = vector.broadcast %cst_69 : f32 to vector<8x32xf32>
    %275 = arith.addf %274, %273 : vector<8x32xf32>
    %276 = arith.divf %274, %275 : vector<8x32xf32>
    %277 = vector.extract_strided_slice %263 {offsets = [0, 64], sizes = [8, 32], strides = [1, 1]} : vector<8x128xf32> to vector<8x32xf32>
    %278 = math.tanh %277 : vector<8x32xf32>
    %279 = arith.mulf %276, %278 : vector<8x32xf32>
    %280 = arith.addf %270, %279 : vector<8x32xf32>
    %281 = vector.extract_strided_slice %263 {offsets = [0, 96], sizes = [8, 32], strides = [1, 1]} : vector<8x128xf32> to vector<8x32xf32>
    %282 = arith.negf %281 : vector<8x32xf32>
    %283 = math.exp %282 : vector<8x32xf32>
    %cst_70 = arith.constant 1.000000e+00 : f32
    %284 = vector.broadcast %cst_70 : f32 to vector<8x32xf32>
    %285 = arith.addf %284, %283 : vector<8x32xf32>
    %286 = arith.divf %284, %285 : vector<8x32xf32>
    %287 = math.tanh %280 : vector<8x32xf32>
    %288 = arith.mulf %286, %287 : vector<8x32xf32>
    %289 = tpu.concatenate %288, %221 in 1 : vector<8x32xf32>, vector<8x32xf32> -> vector<8x64xf32>
    %290 = arith.truncf %289 : vector<8x64xf32> to vector<8x64xbf16>
    %c96_71 = arith.constant 96 : index
    %c0_72 = arith.constant 0 : index
    %291 = vector.load %arg1[%c96_71, %c0_72] : memref<288x128xbf16, #tpu.memory_space<vmem>>, vector<64x128xbf16>
    %cst_73 = arith.constant dense<0.000000e+00> : vector<8x128xf32>
    %292 = tpu.matmul %290, %291, %cst_73 {dimension_numbers = #tpu.dot_dimension_numbers<[1], [0], [0], [1], [0, 0, 1, 1], [], []>} : vector<8x64xbf16>, vector<64x128xbf16>, vector<8x128xf32> -> vector<8x128xf32>
    %293 = vector.broadcast %16 : vector<1x128xf32> to vector<8x128xf32>
    %294 = arith.addf %292, %293 : vector<8x128xf32>
    %295 = vector.extract_strided_slice %294 {offsets = [0, 32], sizes = [8, 32], strides = [1, 1]} : vector<8x128xf32> to vector<8x32xf32>
    %296 = arith.negf %295 : vector<8x32xf32>
    %297 = math.exp %296 : vector<8x32xf32>
    %cst_74 = arith.constant 1.000000e+00 : f32
    %298 = vector.broadcast %cst_74 : f32 to vector<8x32xf32>
    %299 = arith.addf %298, %297 : vector<8x32xf32>
    %300 = arith.divf %298, %299 : vector<8x32xf32>
    %301 = arith.mulf %300, %213 : vector<8x32xf32>
    %302 = vector.extract_strided_slice %294 {offsets = [0, 0], sizes = [8, 32], strides = [1, 1]} : vector<8x128xf32> to vector<8x32xf32>
    %303 = arith.negf %302 : vector<8x32xf32>
    %304 = math.exp %303 : vector<8x32xf32>
    %cst_75 = arith.constant 1.000000e+00 : f32
    %305 = vector.broadcast %cst_75 : f32 to vector<8x32xf32>
    %306 = arith.addf %305, %304 : vector<8x32xf32>
    %307 = arith.divf %305, %306 : vector<8x32xf32>
    %308 = vector.extract_strided_slice %294 {offsets = [0, 64], sizes = [8, 32], strides = [1, 1]} : vector<8x128xf32> to vector<8x32xf32>
    %309 = math.tanh %308 : vector<8x32xf32>
    %310 = arith.mulf %307, %309 : vector<8x32xf32>
    %311 = arith.addf %301, %310 : vector<8x32xf32>
    %312 = vector.extract_strided_slice %294 {offsets = [0, 96], sizes = [8, 32], strides = [1, 1]} : vector<8x128xf32> to vector<8x32xf32>
    %313 = arith.negf %312 : vector<8x32xf32>
    %314 = math.exp %313 : vector<8x32xf32>
    %cst_76 = arith.constant 1.000000e+00 : f32
    %315 = vector.broadcast %cst_76 : f32 to vector<8x32xf32>
    %316 = arith.addf %315, %314 : vector<8x32xf32>
    %317 = arith.divf %315, %316 : vector<8x32xf32>
    %318 = math.tanh %311 : vector<8x32xf32>
    %319 = arith.mulf %317, %318 : vector<8x32xf32>
    %c16_77 = arith.constant 16 : index
    %c0_78 = arith.constant 0 : index
    %320 = vector.load %arg5[%c16_77, %c0_78] : memref<64x32xf32, #tpu.memory_space<vmem>>, vector<8x32xf32>
    tpu.vector_store %arg5[%c16_77, %c0_78], %319 {strides = array<i32>} : memref<64x32xf32, #tpu.memory_space<vmem>>, vector<8x32xf32>,
    %321 = arith.truncf %319 : vector<8x32xf32> to vector<8x32xbf16>
    %c160_79 = arith.constant 160 : index
    %c0_80 = arith.constant 0 : index
    %322 = vector.load %arg1[%c160_79, %c0_80] : memref<288x128xbf16, #tpu.memory_space<vmem>>, vector<32x128xbf16>
    %cst_81 = arith.constant dense<0.000000e+00> : vector<8x128xf32>
    %323 = tpu.matmul %321, %322, %cst_81 {dimension_numbers = #tpu.dot_dimension_numbers<[1], [0], [0], [1], [0, 0, 1, 1], [], []>} : vector<8x32xbf16>, vector<32x128xbf16>, vector<8x128xf32> -> vector<8x128xf32>
    %324 = arith.addf %323, %26 : vector<8x128xf32>
    %325 = math.tanh %324 : vector<8x128xf32>
    %326 = vector.broadcast %17 : vector<1x128xf32> to vector<8x128xf32>
    %327 = arith.mulf %325, %326 : vector<8x128xf32>
    %328 = vector.extract_strided_slice %327 {offsets = [0, 0], sizes = [8, 32], strides = [1, 1]} : vector<8x128xf32> to vector<8x32xf32>
    %cst_82 = arith.constant dense<0.000000e+00> : vector<8xf32>
    %329 = vector.multi_reduction <add>, %328, %cst_82 [1] : vector<8x32xf32> to vector<8xf32>
    %330 = vector.shape_cast %329 : vector<8xf32> to vector<8x1xf32>
    %331 = arith.addf %330, %10 : vector<8x1xf32>
    %332 = vector.extract_strided_slice %327 {offsets = [0, 32], sizes = [8, 32], strides = [1, 1]} : vector<8x128xf32> to vector<8x32xf32>
    %cst_83 = arith.constant dense<0.000000e+00> : vector<8xf32>
    %333 = vector.multi_reduction <add>, %332, %cst_83 [1] : vector<8x32xf32> to vector<8xf32>
    %334 = vector.shape_cast %333 : vector<8xf32> to vector<8x1xf32>
    %335 = arith.addf %334, %10 : vector<8x1xf32>
    %336 = arith.mulf %331, %252 : vector<8x1xf32>
    %337 = arith.mulf %335, %254 : vector<8x1xf32>
    %338 = arith.subf %336, %337 : vector<8x1xf32>
    %339 = arith.negf %338 : vector<8x1xf32>
    %340 = math.exp %339 : vector<8x1xf32>
    %cst_84 = arith.constant 1.000000e+00 : f32
    %341 = vector.broadcast %cst_84 : f32 to vector<8x1xf32>
    %342 = arith.addf %341, %340 : vector<8x1xf32>
    %343 = arith.divf %341, %342 : vector<8x1xf32>
    %cst_85 = arith.constant 1.000000e+00 : f32
    %344 = vector.broadcast %cst_85 : f32 to vector<8x1xf32>
    %345 = arith.subf %344, %343 : vector<8x1xf32>
    %346 = vector.broadcast %343 : vector<8x1xf32> to vector<8x32xf32>
    %347 = arith.mulf %346, %22 : vector<8x32xf32>
    %348 = arith.addf %5, %347 : vector<8x32xf32>
    %349 = arith.mulf %343, %19 : vector<8x1xf32>
    %350 = arith.subf %252, %349 : vector<8x1xf32>
    %351 = arith.mulf %345, %21 : vector<8x1xf32>
    %352 = arith.subf %254, %351 : vector<8x1xf32>
    %353 = tpu.concatenate %343, %345 in 1 : vector<8x1xf32>, vector<8x1xf32> -> vector<8x2xf32>
    %c24 = arith.constant 24 : index
    %c0_86 = arith.constant 0 : index
    %354 = vector.load %arg6[%c24, %c0_86] : memref<64x2xf32, #tpu.memory_space<vmem>>, vector<8x2xf32>
    tpu.vector_store %arg6[%c24, %c0_86], %353 {strides = array<i32>} : memref<64x2xf32, #tpu.memory_space<vmem>>, vector<8x2xf32>,
    %c24_87 = arith.constant 24 : index
    %c0_88 = arith.constant 0 : index
    %355 = vector.load %arg0[%c24_87, %c0_88] : memref<64x32xf32, #tpu.memory_space<vmem>>, vector<8x32xf32>
    %356 = tpu.concatenate %355, %348, %288 in 1 : vector<8x32xf32>, vector<8x32xf32>, vector<8x32xf32> -> vector<8x96xf32>
    %357 = arith.truncf %356 : vector<8x96xf32> to vector<8x96xbf16>
    %c0_89 = arith.constant 0 : index
    %c0_90 = arith.constant 0 : index
    %358 = vector.load %arg1[%c0_89, %c0_90] : memref<288x128xbf16, #tpu.memory_space<vmem>>, vector<96x128xbf16>
    %cst_91 = arith.constant dense<0.000000e+00> : vector<8x128xf32>
    %359 = tpu.matmul %357, %358, %cst_91 {dimension_numbers = #tpu.dot_dimension_numbers<[1], [0], [0], [1], [0, 0, 1, 1], [], []>} : vector<8x96xbf16>, vector<96x128xbf16>, vector<8x128xf32> -> vector<8x128xf32>
    %360 = vector.broadcast %15 : vector<1x128xf32> to vector<8x128xf32>
    %361 = arith.addf %359, %360 : vector<8x128xf32>
    %362 = vector.extract_strided_slice %361 {offsets = [0, 32], sizes = [8, 32], strides = [1, 1]} : vector<8x128xf32> to vector<8x32xf32>
    %363 = arith.negf %362 : vector<8x32xf32>
    %364 = math.exp %363 : vector<8x32xf32>
    %cst_92 = arith.constant 1.000000e+00 : f32
    %365 = vector.broadcast %cst_92 : f32 to vector<8x32xf32>
    %366 = arith.addf %365, %364 : vector<8x32xf32>
    %367 = arith.divf %365, %366 : vector<8x32xf32>
    %368 = arith.mulf %367, %280 : vector<8x32xf32>
    %369 = vector.extract_strided_slice %361 {offsets = [0, 0], sizes = [8, 32], strides = [1, 1]} : vector<8x128xf32> to vector<8x32xf32>
    %370 = arith.negf %369 : vector<8x32xf32>
    %371 = math.exp %370 : vector<8x32xf32>
    %cst_93 = arith.constant 1.000000e+00 : f32
    %372 = vector.broadcast %cst_93 : f32 to vector<8x32xf32>
    %373 = arith.addf %372, %371 : vector<8x32xf32>
    %374 = arith.divf %372, %373 : vector<8x32xf32>
    %375 = vector.extract_strided_slice %361 {offsets = [0, 64], sizes = [8, 32], strides = [1, 1]} : vector<8x128xf32> to vector<8x32xf32>
    %376 = math.tanh %375 : vector<8x32xf32>
    %377 = arith.mulf %374, %376 : vector<8x32xf32>
    %378 = arith.addf %368, %377 : vector<8x32xf32>
    %379 = vector.extract_strided_slice %361 {offsets = [0, 96], sizes = [8, 32], strides = [1, 1]} : vector<8x128xf32> to vector<8x32xf32>
    %380 = arith.negf %379 : vector<8x32xf32>
    %381 = math.exp %380 : vector<8x32xf32>
    %cst_94 = arith.constant 1.000000e+00 : f32
    %382 = vector.broadcast %cst_94 : f32 to vector<8x32xf32>
    %383 = arith.addf %382, %381 : vector<8x32xf32>
    %384 = arith.divf %382, %383 : vector<8x32xf32>
    %385 = math.tanh %378 : vector<8x32xf32>
    %386 = arith.mulf %384, %385 : vector<8x32xf32>
    %387 = tpu.concatenate %386, %319 in 1 : vector<8x32xf32>, vector<8x32xf32> -> vector<8x64xf32>
    %388 = arith.truncf %387 : vector<8x64xf32> to vector<8x64xbf16>
    %c96_95 = arith.constant 96 : index
    %c0_96 = arith.constant 0 : index
    %389 = vector.load %arg1[%c96_95, %c0_96] : memref<288x128xbf16, #tpu.memory_space<vmem>>, vector<64x128xbf16>
    %cst_97 = arith.constant dense<0.000000e+00> : vector<8x128xf32>
    %390 = tpu.matmul %388, %389, %cst_97 {dimension_numbers = #tpu.dot_dimension_numbers<[1], [0], [0], [1], [0, 0, 1, 1], [], []>} : vector<8x64xbf16>, vector<64x128xbf16>, vector<8x128xf32> -> vector<8x128xf32>
    %391 = vector.broadcast %16 : vector<1x128xf32> to vector<8x128xf32>
    %392 = arith.addf %390, %391 : vector<8x128xf32>
    %393 = vector.extract_strided_slice %392 {offsets = [0, 32], sizes = [8, 32], strides = [1, 1]} : vector<8x128xf32> to vector<8x32xf32>
    %394 = arith.negf %393 : vector<8x32xf32>
    %395 = math.exp %394 : vector<8x32xf32>
    %cst_98 = arith.constant 1.000000e+00 : f32
    %396 = vector.broadcast %cst_98 : f32 to vector<8x32xf32>
    %397 = arith.addf %396, %395 : vector<8x32xf32>
    %398 = arith.divf %396, %397 : vector<8x32xf32>
    %399 = arith.mulf %398, %311 : vector<8x32xf32>
    %400 = vector.extract_strided_slice %392 {offsets = [0, 0], sizes = [8, 32], strides = [1, 1]} : vector<8x128xf32> to vector<8x32xf32>
    %401 = arith.negf %400 : vector<8x32xf32>
    %402 = math.exp %401 : vector<8x32xf32>
    %cst_99 = arith.constant 1.000000e+00 : f32
    %403 = vector.broadcast %cst_99 : f32 to vector<8x32xf32>
    %404 = arith.addf %403, %402 : vector<8x32xf32>
    %405 = arith.divf %403, %404 : vector<8x32xf32>
    %406 = vector.extract_strided_slice %392 {offsets = [0, 64], sizes = [8, 32], strides = [1, 1]} : vector<8x128xf32> to vector<8x32xf32>
    %407 = math.tanh %406 : vector<8x32xf32>
    %408 = arith.mulf %405, %407 : vector<8x32xf32>
    %409 = arith.addf %399, %408 : vector<8x32xf32>
    %410 = vector.extract_strided_slice %392 {offsets = [0, 96], sizes = [8, 32], strides = [1, 1]} : vector<8x128xf32> to vector<8x32xf32>
    %411 = arith.negf %410 : vector<8x32xf32>
    %412 = math.exp %411 : vector<8x32xf32>
    %cst_100 = arith.constant 1.000000e+00 : f32
    %413 = vector.broadcast %cst_100 : f32 to vector<8x32xf32>
    %414 = arith.addf %413, %412 : vector<8x32xf32>
    %415 = arith.divf %413, %414 : vector<8x32xf32>
    %416 = math.tanh %409 : vector<8x32xf32>
    %417 = arith.mulf %415, %416 : vector<8x32xf32>
    %c24_101 = arith.constant 24 : index
    %c0_102 = arith.constant 0 : index
    %418 = vector.load %arg5[%c24_101, %c0_102] : memref<64x32xf32, #tpu.memory_space<vmem>>, vector<8x32xf32>
    tpu.vector_store %arg5[%c24_101, %c0_102], %417 {strides = array<i32>} : memref<64x32xf32, #tpu.memory_space<vmem>>, vector<8x32xf32>,
    %419 = arith.truncf %417 : vector<8x32xf32> to vector<8x32xbf16>
    %c160_103 = arith.constant 160 : index
    %c0_104 = arith.constant 0 : index
    %420 = vector.load %arg1[%c160_103, %c0_104] : memref<288x128xbf16, #tpu.memory_space<vmem>>, vector<32x128xbf16>
    %cst_105 = arith.constant dense<0.000000e+00> : vector<8x128xf32>
    %421 = tpu.matmul %419, %420, %cst_105 {dimension_numbers = #tpu.dot_dimension_numbers<[1], [0], [0], [1], [0, 0, 1, 1], [], []>} : vector<8x32xbf16>, vector<32x128xbf16>, vector<8x128xf32> -> vector<8x128xf32>
    %422 = arith.addf %421, %26 : vector<8x128xf32>
    %423 = math.tanh %422 : vector<8x128xf32>
    %424 = vector.broadcast %17 : vector<1x128xf32> to vector<8x128xf32>
    %425 = arith.mulf %423, %424 : vector<8x128xf32>
    %426 = vector.extract_strided_slice %425 {offsets = [0, 0], sizes = [8, 32], strides = [1, 1]} : vector<8x128xf32> to vector<8x32xf32>
    %cst_106 = arith.constant dense<0.000000e+00> : vector<8xf32>
    %427 = vector.multi_reduction <add>, %426, %cst_106 [1] : vector<8x32xf32> to vector<8xf32>
    %428 = vector.shape_cast %427 : vector<8xf32> to vector<8x1xf32>
    %429 = arith.addf %428, %10 : vector<8x1xf32>
    %430 = vector.extract_strided_slice %425 {offsets = [0, 32], sizes = [8, 32], strides = [1, 1]} : vector<8x128xf32> to vector<8x32xf32>
    %cst_107 = arith.constant dense<0.000000e+00> : vector<8xf32>
    %431 = vector.multi_reduction <add>, %430, %cst_107 [1] : vector<8x32xf32> to vector<8xf32>
    %432 = vector.shape_cast %431 : vector<8xf32> to vector<8x1xf32>
    %433 = arith.addf %432, %10 : vector<8x1xf32>
    %434 = arith.mulf %429, %350 : vector<8x1xf32>
    %435 = arith.mulf %433, %352 : vector<8x1xf32>
    %436 = arith.subf %434, %435 : vector<8x1xf32>
    %437 = arith.negf %436 : vector<8x1xf32>
    %438 = math.exp %437 : vector<8x1xf32>
    %cst_108 = arith.constant 1.000000e+00 : f32
    %439 = vector.broadcast %cst_108 : f32 to vector<8x1xf32>
    %440 = arith.addf %439, %438 : vector<8x1xf32>
    %441 = arith.divf %439, %440 : vector<8x1xf32>
    %cst_109 = arith.constant 1.000000e+00 : f32
    %442 = vector.broadcast %cst_109 : f32 to vector<8x1xf32>
    %443 = arith.subf %442, %441 : vector<8x1xf32>
    %444 = vector.broadcast %441 : vector<8x1xf32> to vector<8x32xf32>
    %445 = arith.mulf %444, %22 : vector<8x32xf32>
    %446 = arith.addf %5, %445 : vector<8x32xf32>
    %447 = arith.mulf %441, %19 : vector<8x1xf32>
    %448 = arith.subf %350, %447 : vector<8x1xf32>
    %449 = arith.mulf %443, %21 : vector<8x1xf32>
    %450 = arith.subf %352, %449 : vector<8x1xf32>
    %451 = tpu.concatenate %441, %443 in 1 : vector<8x1xf32>, vector<8x1xf32> -> vector<8x2xf32>
    %c32 = arith.constant 32 : index
    %c0_110 = arith.constant 0 : index
    %452 = vector.load %arg6[%c32, %c0_110] : memref<64x2xf32, #tpu.memory_space<vmem>>, vector<8x2xf32>
    tpu.vector_store %arg6[%c32, %c0_110], %451 {strides = array<i32>} : memref<64x2xf32, #tpu.memory_space<vmem>>, vector<8x2xf32>,
    %c32_111 = arith.constant 32 : index
    %c0_112 = arith.constant 0 : index
    %453 = vector.load %arg0[%c32_111, %c0_112] : memref<64x32xf32, #tpu.memory_space<vmem>>, vector<8x32xf32>
    %454 = tpu.concatenate %453, %446, %386 in 1 : vector<8x32xf32>, vector<8x32xf32>, vector<8x32xf32> -> vector<8x96xf32>
    %455 = arith.truncf %454 : vector<8x96xf32> to vector<8x96xbf16>
    %c0_113 = arith.constant 0 : index
    %c0_114 = arith.constant 0 : index
    %456 = vector.load %arg1[%c0_113, %c0_114] : memref<288x128xbf16, #tpu.memory_space<vmem>>, vector<96x128xbf16>
    %cst_115 = arith.constant dense<0.000000e+00> : vector<8x128xf32>
    %457 = tpu.matmul %455, %456, %cst_115 {dimension_numbers = #tpu.dot_dimension_numbers<[1], [0], [0], [1], [0, 0, 1, 1], [], []>} : vector<8x96xbf16>, vector<96x128xbf16>, vector<8x128xf32> -> vector<8x128xf32>
    %458 = vector.broadcast %15 : vector<1x128xf32> to vector<8x128xf32>
    %459 = arith.addf %457, %458 : vector<8x128xf32>
    %460 = vector.extract_strided_slice %459 {offsets = [0, 32], sizes = [8, 32], strides = [1, 1]} : vector<8x128xf32> to vector<8x32xf32>
    %461 = arith.negf %460 : vector<8x32xf32>
    %462 = math.exp %461 : vector<8x32xf32>
    %cst_116 = arith.constant 1.000000e+00 : f32
    %463 = vector.broadcast %cst_116 : f32 to vector<8x32xf32>
    %464 = arith.addf %463, %462 : vector<8x32xf32>
    %465 = arith.divf %463, %464 : vector<8x32xf32>
    %466 = arith.mulf %465, %378 : vector<8x32xf32>
    %467 = vector.extract_strided_slice %459 {offsets = [0, 0], sizes = [8, 32], strides = [1, 1]} : vector<8x128xf32> to vector<8x32xf32>
    %468 = arith.negf %467 : vector<8x32xf32>
    %469 = math.exp %468 : vector<8x32xf32>
    %cst_117 = arith.constant 1.000000e+00 : f32
    %470 = vector.broadcast %cst_117 : f32 to vector<8x32xf32>
    %471 = arith.addf %470, %469 : vector<8x32xf32>
    %472 = arith.divf %470, %471 : vector<8x32xf32>
    %473 = vector.extract_strided_slice %459 {offsets = [0, 64], sizes = [8, 32], strides = [1, 1]} : vector<8x128xf32> to vector<8x32xf32>
    %474 = math.tanh %473 : vector<8x32xf32>
    %475 = arith.mulf %472, %474 : vector<8x32xf32>
    %476 = arith.addf %466, %475 : vector<8x32xf32>
    %477 = vector.extract_strided_slice %459 {offsets = [0, 96], sizes = [8, 32], strides = [1, 1]} : vector<8x128xf32> to vector<8x32xf32>
    %478 = arith.negf %477 : vector<8x32xf32>
    %479 = math.exp %478 : vector<8x32xf32>
    %cst_118 = arith.constant 1.000000e+00 : f32
    %480 = vector.broadcast %cst_118 : f32 to vector<8x32xf32>
    %481 = arith.addf %480, %479 : vector<8x32xf32>
    %482 = arith.divf %480, %481 : vector<8x32xf32>
    %483 = math.tanh %476 : vector<8x32xf32>
    %484 = arith.mulf %482, %483 : vector<8x32xf32>
    %485 = tpu.concatenate %484, %417 in 1 : vector<8x32xf32>, vector<8x32xf32> -> vector<8x64xf32>
    %486 = arith.truncf %485 : vector<8x64xf32> to vector<8x64xbf16>
    %c96_119 = arith.constant 96 : index
    %c0_120 = arith.constant 0 : index
    %487 = vector.load %arg1[%c96_119, %c0_120] : memref<288x128xbf16, #tpu.memory_space<vmem>>, vector<64x128xbf16>
    %cst_121 = arith.constant dense<0.000000e+00> : vector<8x128xf32>
    %488 = tpu.matmul %486, %487, %cst_121 {dimension_numbers = #tpu.dot_dimension_numbers<[1], [0], [0], [1], [0, 0, 1, 1], [], []>} : vector<8x64xbf16>, vector<64x128xbf16>, vector<8x128xf32> -> vector<8x128xf32>
    %489 = vector.broadcast %16 : vector<1x128xf32> to vector<8x128xf32>
    %490 = arith.addf %488, %489 : vector<8x128xf32>
    %491 = vector.extract_strided_slice %490 {offsets = [0, 32], sizes = [8, 32], strides = [1, 1]} : vector<8x128xf32> to vector<8x32xf32>
    %492 = arith.negf %491 : vector<8x32xf32>
    %493 = math.exp %492 : vector<8x32xf32>
    %cst_122 = arith.constant 1.000000e+00 : f32
    %494 = vector.broadcast %cst_122 : f32 to vector<8x32xf32>
    %495 = arith.addf %494, %493 : vector<8x32xf32>
    %496 = arith.divf %494, %495 : vector<8x32xf32>
    %497 = arith.mulf %496, %409 : vector<8x32xf32>
    %498 = vector.extract_strided_slice %490 {offsets = [0, 0], sizes = [8, 32], strides = [1, 1]} : vector<8x128xf32> to vector<8x32xf32>
    %499 = arith.negf %498 : vector<8x32xf32>
    %500 = math.exp %499 : vector<8x32xf32>
    %cst_123 = arith.constant 1.000000e+00 : f32
    %501 = vector.broadcast %cst_123 : f32 to vector<8x32xf32>
    %502 = arith.addf %501, %500 : vector<8x32xf32>
    %503 = arith.divf %501, %502 : vector<8x32xf32>
    %504 = vector.extract_strided_slice %490 {offsets = [0, 64], sizes = [8, 32], strides = [1, 1]} : vector<8x128xf32> to vector<8x32xf32>
    %505 = math.tanh %504 : vector<8x32xf32>
    %506 = arith.mulf %503, %505 : vector<8x32xf32>
    %507 = arith.addf %497, %506 : vector<8x32xf32>
    %508 = vector.extract_strided_slice %490 {offsets = [0, 96], sizes = [8, 32], strides = [1, 1]} : vector<8x128xf32> to vector<8x32xf32>
    %509 = arith.negf %508 : vector<8x32xf32>
    %510 = math.exp %509 : vector<8x32xf32>
    %cst_124 = arith.constant 1.000000e+00 : f32
    %511 = vector.broadcast %cst_124 : f32 to vector<8x32xf32>
    %512 = arith.addf %511, %510 : vector<8x32xf32>
    %513 = arith.divf %511, %512 : vector<8x32xf32>
    %514 = math.tanh %507 : vector<8x32xf32>
    %515 = arith.mulf %513, %514 : vector<8x32xf32>
    %c32_125 = arith.constant 32 : index
    %c0_126 = arith.constant 0 : index
    %516 = vector.load %arg5[%c32_125, %c0_126] : memref<64x32xf32, #tpu.memory_space<vmem>>, vector<8x32xf32>
    tpu.vector_store %arg5[%c32_125, %c0_126], %515 {strides = array<i32>} : memref<64x32xf32, #tpu.memory_space<vmem>>, vector<8x32xf32>,
    %517 = arith.truncf %515 : vector<8x32xf32> to vector<8x32xbf16>
    %c160_127 = arith.constant 160 : index
    %c0_128 = arith.constant 0 : index
    %518 = vector.load %arg1[%c160_127, %c0_128] : memref<288x128xbf16, #tpu.memory_space<vmem>>, vector<32x128xbf16>
    %cst_129 = arith.constant dense<0.000000e+00> : vector<8x128xf32>
    %519 = tpu.matmul %517, %518, %cst_129 {dimension_numbers = #tpu.dot_dimension_numbers<[1], [0], [0], [1], [0, 0, 1, 1], [], []>} : vector<8x32xbf16>, vector<32x128xbf16>, vector<8x128xf32> -> vector<8x128xf32>
    %520 = arith.addf %519, %26 : vector<8x128xf32>
    %521 = math.tanh %520 : vector<8x128xf32>
    %522 = vector.broadcast %17 : vector<1x128xf32> to vector<8x128xf32>
    %523 = arith.mulf %521, %522 : vector<8x128xf32>
    %524 = vector.extract_strided_slice %523 {offsets = [0, 0], sizes = [8, 32], strides = [1, 1]} : vector<8x128xf32> to vector<8x32xf32>
    %cst_130 = arith.constant dense<0.000000e+00> : vector<8xf32>
    %525 = vector.multi_reduction <add>, %524, %cst_130 [1] : vector<8x32xf32> to vector<8xf32>
    %526 = vector.shape_cast %525 : vector<8xf32> to vector<8x1xf32>
    %527 = arith.addf %526, %10 : vector<8x1xf32>
    %528 = vector.extract_strided_slice %523 {offsets = [0, 32], sizes = [8, 32], strides = [1, 1]} : vector<8x128xf32> to vector<8x32xf32>
    %cst_131 = arith.constant dense<0.000000e+00> : vector<8xf32>
    %529 = vector.multi_reduction <add>, %528, %cst_131 [1] : vector<8x32xf32> to vector<8xf32>
    %530 = vector.shape_cast %529 : vector<8xf32> to vector<8x1xf32>
    %531 = arith.addf %530, %10 : vector<8x1xf32>
    %532 = arith.mulf %527, %448 : vector<8x1xf32>
    %533 = arith.mulf %531, %450 : vector<8x1xf32>
    %534 = arith.subf %532, %533 : vector<8x1xf32>
    %535 = arith.negf %534 : vector<8x1xf32>
    %536 = math.exp %535 : vector<8x1xf32>
    %cst_132 = arith.constant 1.000000e+00 : f32
    %537 = vector.broadcast %cst_132 : f32 to vector<8x1xf32>
    %538 = arith.addf %537, %536 : vector<8x1xf32>
    %539 = arith.divf %537, %538 : vector<8x1xf32>
    %cst_133 = arith.constant 1.000000e+00 : f32
    %540 = vector.broadcast %cst_133 : f32 to vector<8x1xf32>
    %541 = arith.subf %540, %539 : vector<8x1xf32>
    %542 = vector.broadcast %539 : vector<8x1xf32> to vector<8x32xf32>
    %543 = arith.mulf %542, %22 : vector<8x32xf32>
    %544 = arith.addf %5, %543 : vector<8x32xf32>
    %545 = arith.mulf %539, %19 : vector<8x1xf32>
    %546 = arith.subf %448, %545 : vector<8x1xf32>
    %547 = arith.mulf %541, %21 : vector<8x1xf32>
    %548 = arith.subf %450, %547 : vector<8x1xf32>
    %549 = tpu.concatenate %539, %541 in 1 : vector<8x1xf32>, vector<8x1xf32> -> vector<8x2xf32>
    %c40 = arith.constant 40 : index
    %c0_134 = arith.constant 0 : index
    %550 = vector.load %arg6[%c40, %c0_134] : memref<64x2xf32, #tpu.memory_space<vmem>>, vector<8x2xf32>
    tpu.vector_store %arg6[%c40, %c0_134], %549 {strides = array<i32>} : memref<64x2xf32, #tpu.memory_space<vmem>>, vector<8x2xf32>,
    %c40_135 = arith.constant 40 : index
    %c0_136 = arith.constant 0 : index
    %551 = vector.load %arg0[%c40_135, %c0_136] : memref<64x32xf32, #tpu.memory_space<vmem>>, vector<8x32xf32>
    %552 = tpu.concatenate %551, %544, %484 in 1 : vector<8x32xf32>, vector<8x32xf32>, vector<8x32xf32> -> vector<8x96xf32>
    %553 = arith.truncf %552 : vector<8x96xf32> to vector<8x96xbf16>
    %c0_137 = arith.constant 0 : index
    %c0_138 = arith.constant 0 : index
    %554 = vector.load %arg1[%c0_137, %c0_138] : memref<288x128xbf16, #tpu.memory_space<vmem>>, vector<96x128xbf16>
    %cst_139 = arith.constant dense<0.000000e+00> : vector<8x128xf32>
    %555 = tpu.matmul %553, %554, %cst_139 {dimension_numbers = #tpu.dot_dimension_numbers<[1], [0], [0], [1], [0, 0, 1, 1], [], []>} : vector<8x96xbf16>, vector<96x128xbf16>, vector<8x128xf32> -> vector<8x128xf32>
    %556 = vector.broadcast %15 : vector<1x128xf32> to vector<8x128xf32>
    %557 = arith.addf %555, %556 : vector<8x128xf32>
    %558 = vector.extract_strided_slice %557 {offsets = [0, 32], sizes = [8, 32], strides = [1, 1]} : vector<8x128xf32> to vector<8x32xf32>
    %559 = arith.negf %558 : vector<8x32xf32>
    %560 = math.exp %559 : vector<8x32xf32>
    %cst_140 = arith.constant 1.000000e+00 : f32
    %561 = vector.broadcast %cst_140 : f32 to vector<8x32xf32>
    %562 = arith.addf %561, %560 : vector<8x32xf32>
    %563 = arith.divf %561, %562 : vector<8x32xf32>
    %564 = arith.mulf %563, %476 : vector<8x32xf32>
    %565 = vector.extract_strided_slice %557 {offsets = [0, 0], sizes = [8, 32], strides = [1, 1]} : vector<8x128xf32> to vector<8x32xf32>
    %566 = arith.negf %565 : vector<8x32xf32>
    %567 = math.exp %566 : vector<8x32xf32>
    %cst_141 = arith.constant 1.000000e+00 : f32
    %568 = vector.broadcast %cst_141 : f32 to vector<8x32xf32>
    %569 = arith.addf %568, %567 : vector<8x32xf32>
    %570 = arith.divf %568, %569 : vector<8x32xf32>
    %571 = vector.extract_strided_slice %557 {offsets = [0, 64], sizes = [8, 32], strides = [1, 1]} : vector<8x128xf32> to vector<8x32xf32>
    %572 = math.tanh %571 : vector<8x32xf32>
    %573 = arith.mulf %570, %572 : vector<8x32xf32>
    %574 = arith.addf %564, %573 : vector<8x32xf32>
    %575 = vector.extract_strided_slice %557 {offsets = [0, 96], sizes = [8, 32], strides = [1, 1]} : vector<8x128xf32> to vector<8x32xf32>
    %576 = arith.negf %575 : vector<8x32xf32>
    %577 = math.exp %576 : vector<8x32xf32>
    %cst_142 = arith.constant 1.000000e+00 : f32
    %578 = vector.broadcast %cst_142 : f32 to vector<8x32xf32>
    %579 = arith.addf %578, %577 : vector<8x32xf32>
    %580 = arith.divf %578, %579 : vector<8x32xf32>
    %581 = math.tanh %574 : vector<8x32xf32>
    %582 = arith.mulf %580, %581 : vector<8x32xf32>
    %583 = tpu.concatenate %582, %515 in 1 : vector<8x32xf32>, vector<8x32xf32> -> vector<8x64xf32>
    %584 = arith.truncf %583 : vector<8x64xf32> to vector<8x64xbf16>
    %c96_143 = arith.constant 96 : index
    %c0_144 = arith.constant 0 : index
    %585 = vector.load %arg1[%c96_143, %c0_144] : memref<288x128xbf16, #tpu.memory_space<vmem>>, vector<64x128xbf16>
    %cst_145 = arith.constant dense<0.000000e+00> : vector<8x128xf32>
    %586 = tpu.matmul %584, %585, %cst_145 {dimension_numbers = #tpu.dot_dimension_numbers<[1], [0], [0], [1], [0, 0, 1, 1], [], []>} : vector<8x64xbf16>, vector<64x128xbf16>, vector<8x128xf32> -> vector<8x128xf32>
    %587 = vector.broadcast %16 : vector<1x128xf32> to vector<8x128xf32>
    %588 = arith.addf %586, %587 : vector<8x128xf32>
    %589 = vector.extract_strided_slice %588 {offsets = [0, 32], sizes = [8, 32], strides = [1, 1]} : vector<8x128xf32> to vector<8x32xf32>
    %590 = arith.negf %589 : vector<8x32xf32>
    %591 = math.exp %590 : vector<8x32xf32>
    %cst_146 = arith.constant 1.000000e+00 : f32
    %592 = vector.broadcast %cst_146 : f32 to vector<8x32xf32>
    %593 = arith.addf %592, %591 : vector<8x32xf32>
    %594 = arith.divf %592, %593 : vector<8x32xf32>
    %595 = arith.mulf %594, %507 : vector<8x32xf32>
    %596 = vector.extract_strided_slice %588 {offsets = [0, 0], sizes = [8, 32], strides = [1, 1]} : vector<8x128xf32> to vector<8x32xf32>
    %597 = arith.negf %596 : vector<8x32xf32>
    %598 = math.exp %597 : vector<8x32xf32>
    %cst_147 = arith.constant 1.000000e+00 : f32
    %599 = vector.broadcast %cst_147 : f32 to vector<8x32xf32>
    %600 = arith.addf %599, %598 : vector<8x32xf32>
    %601 = arith.divf %599, %600 : vector<8x32xf32>
    %602 = vector.extract_strided_slice %588 {offsets = [0, 64], sizes = [8, 32], strides = [1, 1]} : vector<8x128xf32> to vector<8x32xf32>
    %603 = math.tanh %602 : vector<8x32xf32>
    %604 = arith.mulf %601, %603 : vector<8x32xf32>
    %605 = arith.addf %595, %604 : vector<8x32xf32>
    %606 = vector.extract_strided_slice %588 {offsets = [0, 96], sizes = [8, 32], strides = [1, 1]} : vector<8x128xf32> to vector<8x32xf32>
    %607 = arith.negf %606 : vector<8x32xf32>
    %608 = math.exp %607 : vector<8x32xf32>
    %cst_148 = arith.constant 1.000000e+00 : f32
    %609 = vector.broadcast %cst_148 : f32 to vector<8x32xf32>
    %610 = arith.addf %609, %608 : vector<8x32xf32>
    %611 = arith.divf %609, %610 : vector<8x32xf32>
    %612 = math.tanh %605 : vector<8x32xf32>
    %613 = arith.mulf %611, %612 : vector<8x32xf32>
    %c40_149 = arith.constant 40 : index
    %c0_150 = arith.constant 0 : index
    %614 = vector.load %arg5[%c40_149, %c0_150] : memref<64x32xf32, #tpu.memory_space<vmem>>, vector<8x32xf32>
    tpu.vector_store %arg5[%c40_149, %c0_150], %613 {strides = array<i32>} : memref<64x32xf32, #tpu.memory_space<vmem>>, vector<8x32xf32>,
    %615 = arith.truncf %613 : vector<8x32xf32> to vector<8x32xbf16>
    %c160_151 = arith.constant 160 : index
    %c0_152 = arith.constant 0 : index
    %616 = vector.load %arg1[%c160_151, %c0_152] : memref<288x128xbf16, #tpu.memory_space<vmem>>, vector<32x128xbf16>
    %cst_153 = arith.constant dense<0.000000e+00> : vector<8x128xf32>
    %617 = tpu.matmul %615, %616, %cst_153 {dimension_numbers = #tpu.dot_dimension_numbers<[1], [0], [0], [1], [0, 0, 1, 1], [], []>} : vector<8x32xbf16>, vector<32x128xbf16>, vector<8x128xf32> -> vector<8x128xf32>
    %618 = arith.addf %617, %26 : vector<8x128xf32>
    %619 = math.tanh %618 : vector<8x128xf32>
    %620 = vector.broadcast %17 : vector<1x128xf32> to vector<8x128xf32>
    %621 = arith.mulf %619, %620 : vector<8x128xf32>
    %622 = vector.extract_strided_slice %621 {offsets = [0, 0], sizes = [8, 32], strides = [1, 1]} : vector<8x128xf32> to vector<8x32xf32>
    %cst_154 = arith.constant dense<0.000000e+00> : vector<8xf32>
    %623 = vector.multi_reduction <add>, %622, %cst_154 [1] : vector<8x32xf32> to vector<8xf32>
    %624 = vector.shape_cast %623 : vector<8xf32> to vector<8x1xf32>
    %625 = arith.addf %624, %10 : vector<8x1xf32>
    %626 = vector.extract_strided_slice %621 {offsets = [0, 32], sizes = [8, 32], strides = [1, 1]} : vector<8x128xf32> to vector<8x32xf32>
    %cst_155 = arith.constant dense<0.000000e+00> : vector<8xf32>
    %627 = vector.multi_reduction <add>, %626, %cst_155 [1] : vector<8x32xf32> to vector<8xf32>
    %628 = vector.shape_cast %627 : vector<8xf32> to vector<8x1xf32>
    %629 = arith.addf %628, %10 : vector<8x1xf32>
    %630 = arith.mulf %625, %546 : vector<8x1xf32>
    %631 = arith.mulf %629, %548 : vector<8x1xf32>
    %632 = arith.subf %630, %631 : vector<8x1xf32>
    %633 = arith.negf %632 : vector<8x1xf32>
    %634 = math.exp %633 : vector<8x1xf32>
    %cst_156 = arith.constant 1.000000e+00 : f32
    %635 = vector.broadcast %cst_156 : f32 to vector<8x1xf32>
    %636 = arith.addf %635, %634 : vector<8x1xf32>
    %637 = arith.divf %635, %636 : vector<8x1xf32>
    %cst_157 = arith.constant 1.000000e+00 : f32
    %638 = vector.broadcast %cst_157 : f32 to vector<8x1xf32>
    %639 = arith.subf %638, %637 : vector<8x1xf32>
    %640 = vector.broadcast %637 : vector<8x1xf32> to vector<8x32xf32>
    %641 = arith.mulf %640, %22 : vector<8x32xf32>
    %642 = arith.addf %5, %641 : vector<8x32xf32>
    %643 = arith.mulf %637, %19 : vector<8x1xf32>
    %644 = arith.subf %546, %643 : vector<8x1xf32>
    %645 = arith.mulf %639, %21 : vector<8x1xf32>
    %646 = arith.subf %548, %645 : vector<8x1xf32>
    %647 = tpu.concatenate %637, %639 in 1 : vector<8x1xf32>, vector<8x1xf32> -> vector<8x2xf32>
    %c48 = arith.constant 48 : index
    %c0_158 = arith.constant 0 : index
    %648 = vector.load %arg6[%c48, %c0_158] : memref<64x2xf32, #tpu.memory_space<vmem>>, vector<8x2xf32>
    tpu.vector_store %arg6[%c48, %c0_158], %647 {strides = array<i32>} : memref<64x2xf32, #tpu.memory_space<vmem>>, vector<8x2xf32>,
    %c48_159 = arith.constant 48 : index
    %c0_160 = arith.constant 0 : index
    %649 = vector.load %arg0[%c48_159, %c0_160] : memref<64x32xf32, #tpu.memory_space<vmem>>, vector<8x32xf32>
    %650 = tpu.concatenate %649, %642, %582 in 1 : vector<8x32xf32>, vector<8x32xf32>, vector<8x32xf32> -> vector<8x96xf32>
    %651 = arith.truncf %650 : vector<8x96xf32> to vector<8x96xbf16>
    %c0_161 = arith.constant 0 : index
    %c0_162 = arith.constant 0 : index
    %652 = vector.load %arg1[%c0_161, %c0_162] : memref<288x128xbf16, #tpu.memory_space<vmem>>, vector<96x128xbf16>
    %cst_163 = arith.constant dense<0.000000e+00> : vector<8x128xf32>
    %653 = tpu.matmul %651, %652, %cst_163 {dimension_numbers = #tpu.dot_dimension_numbers<[1], [0], [0], [1], [0, 0, 1, 1], [], []>} : vector<8x96xbf16>, vector<96x128xbf16>, vector<8x128xf32> -> vector<8x128xf32>
    %654 = vector.broadcast %15 : vector<1x128xf32> to vector<8x128xf32>
    %655 = arith.addf %653, %654 : vector<8x128xf32>
    %656 = vector.extract_strided_slice %655 {offsets = [0, 32], sizes = [8, 32], strides = [1, 1]} : vector<8x128xf32> to vector<8x32xf32>
    %657 = arith.negf %656 : vector<8x32xf32>
    %658 = math.exp %657 : vector<8x32xf32>
    %cst_164 = arith.constant 1.000000e+00 : f32
    %659 = vector.broadcast %cst_164 : f32 to vector<8x32xf32>
    %660 = arith.addf %659, %658 : vector<8x32xf32>
    %661 = arith.divf %659, %660 : vector<8x32xf32>
    %662 = arith.mulf %661, %574 : vector<8x32xf32>
    %663 = vector.extract_strided_slice %655 {offsets = [0, 0], sizes = [8, 32], strides = [1, 1]} : vector<8x128xf32> to vector<8x32xf32>
    %664 = arith.negf %663 : vector<8x32xf32>
    %665 = math.exp %664 : vector<8x32xf32>
    %cst_165 = arith.constant 1.000000e+00 : f32
    %666 = vector.broadcast %cst_165 : f32 to vector<8x32xf32>
    %667 = arith.addf %666, %665 : vector<8x32xf32>
    %668 = arith.divf %666, %667 : vector<8x32xf32>
    %669 = vector.extract_strided_slice %655 {offsets = [0, 64], sizes = [8, 32], strides = [1, 1]} : vector<8x128xf32> to vector<8x32xf32>
    %670 = math.tanh %669 : vector<8x32xf32>
    %671 = arith.mulf %668, %670 : vector<8x32xf32>
    %672 = arith.addf %662, %671 : vector<8x32xf32>
    %673 = vector.extract_strided_slice %655 {offsets = [0, 96], sizes = [8, 32], strides = [1, 1]} : vector<8x128xf32> to vector<8x32xf32>
    %674 = arith.negf %673 : vector<8x32xf32>
    %675 = math.exp %674 : vector<8x32xf32>
    %cst_166 = arith.constant 1.000000e+00 : f32
    %676 = vector.broadcast %cst_166 : f32 to vector<8x32xf32>
    %677 = arith.addf %676, %675 : vector<8x32xf32>
    %678 = arith.divf %676, %677 : vector<8x32xf32>
    %679 = math.tanh %672 : vector<8x32xf32>
    %680 = arith.mulf %678, %679 : vector<8x32xf32>
    %681 = tpu.concatenate %680, %613 in 1 : vector<8x32xf32>, vector<8x32xf32> -> vector<8x64xf32>
    %682 = arith.truncf %681 : vector<8x64xf32> to vector<8x64xbf16>
    %c96_167 = arith.constant 96 : index
    %c0_168 = arith.constant 0 : index
    %683 = vector.load %arg1[%c96_167, %c0_168] : memref<288x128xbf16, #tpu.memory_space<vmem>>, vector<64x128xbf16>
    %cst_169 = arith.constant dense<0.000000e+00> : vector<8x128xf32>
    %684 = tpu.matmul %682, %683, %cst_169 {dimension_numbers = #tpu.dot_dimension_numbers<[1], [0], [0], [1], [0, 0, 1, 1], [], []>} : vector<8x64xbf16>, vector<64x128xbf16>, vector<8x128xf32> -> vector<8x128xf32>
    %685 = vector.broadcast %16 : vector<1x128xf32> to vector<8x128xf32>
    %686 = arith.addf %684, %685 : vector<8x128xf32>
    %687 = vector.extract_strided_slice %686 {offsets = [0, 32], sizes = [8, 32], strides = [1, 1]} : vector<8x128xf32> to vector<8x32xf32>
    %688 = arith.negf %687 : vector<8x32xf32>
    %689 = math.exp %688 : vector<8x32xf32>
    %cst_170 = arith.constant 1.000000e+00 : f32
    %690 = vector.broadcast %cst_170 : f32 to vector<8x32xf32>
    %691 = arith.addf %690, %689 : vector<8x32xf32>
    %692 = arith.divf %690, %691 : vector<8x32xf32>
    %693 = arith.mulf %692, %605 : vector<8x32xf32>
    %694 = vector.extract_strided_slice %686 {offsets = [0, 0], sizes = [8, 32], strides = [1, 1]} : vector<8x128xf32> to vector<8x32xf32>
    %695 = arith.negf %694 : vector<8x32xf32>
    %696 = math.exp %695 : vector<8x32xf32>
    %cst_171 = arith.constant 1.000000e+00 : f32
    %697 = vector.broadcast %cst_171 : f32 to vector<8x32xf32>
    %698 = arith.addf %697, %696 : vector<8x32xf32>
    %699 = arith.divf %697, %698 : vector<8x32xf32>
    %700 = vector.extract_strided_slice %686 {offsets = [0, 64], sizes = [8, 32], strides = [1, 1]} : vector<8x128xf32> to vector<8x32xf32>
    %701 = math.tanh %700 : vector<8x32xf32>
    %702 = arith.mulf %699, %701 : vector<8x32xf32>
    %703 = arith.addf %693, %702 : vector<8x32xf32>
    %704 = vector.extract_strided_slice %686 {offsets = [0, 96], sizes = [8, 32], strides = [1, 1]} : vector<8x128xf32> to vector<8x32xf32>
    %705 = arith.negf %704 : vector<8x32xf32>
    %706 = math.exp %705 : vector<8x32xf32>
    %cst_172 = arith.constant 1.000000e+00 : f32
    %707 = vector.broadcast %cst_172 : f32 to vector<8x32xf32>
    %708 = arith.addf %707, %706 : vector<8x32xf32>
    %709 = arith.divf %707, %708 : vector<8x32xf32>
    %710 = math.tanh %703 : vector<8x32xf32>
    %711 = arith.mulf %709, %710 : vector<8x32xf32>
    %c48_173 = arith.constant 48 : index
    %c0_174 = arith.constant 0 : index
    %712 = vector.load %arg5[%c48_173, %c0_174] : memref<64x32xf32, #tpu.memory_space<vmem>>, vector<8x32xf32>
    tpu.vector_store %arg5[%c48_173, %c0_174], %711 {strides = array<i32>} : memref<64x32xf32, #tpu.memory_space<vmem>>, vector<8x32xf32>,
    %713 = arith.truncf %711 : vector<8x32xf32> to vector<8x32xbf16>
    %c160_175 = arith.constant 160 : index
    %c0_176 = arith.constant 0 : index
    %714 = vector.load %arg1[%c160_175, %c0_176] : memref<288x128xbf16, #tpu.memory_space<vmem>>, vector<32x128xbf16>
    %cst_177 = arith.constant dense<0.000000e+00> : vector<8x128xf32>
    %715 = tpu.matmul %713, %714, %cst_177 {dimension_numbers = #tpu.dot_dimension_numbers<[1], [0], [0], [1], [0, 0, 1, 1], [], []>} : vector<8x32xbf16>, vector<32x128xbf16>, vector<8x128xf32> -> vector<8x128xf32>
    %716 = arith.addf %715, %26 : vector<8x128xf32>
    %717 = math.tanh %716 : vector<8x128xf32>
    %718 = vector.broadcast %17 : vector<1x128xf32> to vector<8x128xf32>
    %719 = arith.mulf %717, %718 : vector<8x128xf32>
    %720 = vector.extract_strided_slice %719 {offsets = [0, 0], sizes = [8, 32], strides = [1, 1]} : vector<8x128xf32> to vector<8x32xf32>
    %cst_178 = arith.constant dense<0.000000e+00> : vector<8xf32>
    %721 = vector.multi_reduction <add>, %720, %cst_178 [1] : vector<8x32xf32> to vector<8xf32>
    %722 = vector.shape_cast %721 : vector<8xf32> to vector<8x1xf32>
    %723 = arith.addf %722, %10 : vector<8x1xf32>
    %724 = vector.extract_strided_slice %719 {offsets = [0, 32], sizes = [8, 32], strides = [1, 1]} : vector<8x128xf32> to vector<8x32xf32>
    %cst_179 = arith.constant dense<0.000000e+00> : vector<8xf32>
    %725 = vector.multi_reduction <add>, %724, %cst_179 [1] : vector<8x32xf32> to vector<8xf32>
    %726 = vector.shape_cast %725 : vector<8xf32> to vector<8x1xf32>
    %727 = arith.addf %726, %10 : vector<8x1xf32>
    %728 = arith.mulf %723, %644 : vector<8x1xf32>
    %729 = arith.mulf %727, %646 : vector<8x1xf32>
    %730 = arith.subf %728, %729 : vector<8x1xf32>
    %731 = arith.negf %730 : vector<8x1xf32>
    %732 = math.exp %731 : vector<8x1xf32>
    %cst_180 = arith.constant 1.000000e+00 : f32
    %733 = vector.broadcast %cst_180 : f32 to vector<8x1xf32>
    %734 = arith.addf %733, %732 : vector<8x1xf32>
    %735 = arith.divf %733, %734 : vector<8x1xf32>
    %cst_181 = arith.constant 1.000000e+00 : f32
    %736 = vector.broadcast %cst_181 : f32 to vector<8x1xf32>
    %737 = arith.subf %736, %735 : vector<8x1xf32>
    %738 = vector.broadcast %735 : vector<8x1xf32> to vector<8x32xf32>
    %739 = arith.mulf %738, %22 : vector<8x32xf32>
    %740 = arith.addf %5, %739 : vector<8x32xf32>
    %741 = arith.mulf %735, %19 : vector<8x1xf32>
    %742 = arith.subf %644, %741 : vector<8x1xf32>
    %743 = arith.mulf %737, %21 : vector<8x1xf32>
    %744 = arith.subf %646, %743 : vector<8x1xf32>
    %745 = tpu.concatenate %735, %737 in 1 : vector<8x1xf32>, vector<8x1xf32> -> vector<8x2xf32>
    %c56 = arith.constant 56 : index
    %c0_182 = arith.constant 0 : index
    %746 = vector.load %arg6[%c56, %c0_182] : memref<64x2xf32, #tpu.memory_space<vmem>>, vector<8x2xf32>
    tpu.vector_store %arg6[%c56, %c0_182], %745 {strides = array<i32>} : memref<64x2xf32, #tpu.memory_space<vmem>>, vector<8x2xf32>,
    %c56_183 = arith.constant 56 : index
    %c0_184 = arith.constant 0 : index
    %747 = vector.load %arg0[%c56_183, %c0_184] : memref<64x32xf32, #tpu.memory_space<vmem>>, vector<8x32xf32>
    %748 = tpu.concatenate %747, %740, %680 in 1 : vector<8x32xf32>, vector<8x32xf32>, vector<8x32xf32> -> vector<8x96xf32>
    %749 = arith.truncf %748 : vector<8x96xf32> to vector<8x96xbf16>
    %c0_185 = arith.constant 0 : index
    %c0_186 = arith.constant 0 : index
    %750 = vector.load %arg1[%c0_185, %c0_186] : memref<288x128xbf16, #tpu.memory_space<vmem>>, vector<96x128xbf16>
    %cst_187 = arith.constant dense<0.000000e+00> : vector<8x128xf32>
    %751 = tpu.matmul %749, %750, %cst_187 {dimension_numbers = #tpu.dot_dimension_numbers<[1], [0], [0], [1], [0, 0, 1, 1], [], []>} : vector<8x96xbf16>, vector<96x128xbf16>, vector<8x128xf32> -> vector<8x128xf32>
    %752 = vector.broadcast %15 : vector<1x128xf32> to vector<8x128xf32>
    %753 = arith.addf %751, %752 : vector<8x128xf32>
    %754 = vector.extract_strided_slice %753 {offsets = [0, 32], sizes = [8, 32], strides = [1, 1]} : vector<8x128xf32> to vector<8x32xf32>
    %755 = arith.negf %754 : vector<8x32xf32>
    %756 = math.exp %755 : vector<8x32xf32>
    %cst_188 = arith.constant 1.000000e+00 : f32
    %757 = vector.broadcast %cst_188 : f32 to vector<8x32xf32>
    %758 = arith.addf %757, %756 : vector<8x32xf32>
    %759 = arith.divf %757, %758 : vector<8x32xf32>
    %760 = arith.mulf %759, %672 : vector<8x32xf32>
    %761 = vector.extract_strided_slice %753 {offsets = [0, 0], sizes = [8, 32], strides = [1, 1]} : vector<8x128xf32> to vector<8x32xf32>
    %762 = arith.negf %761 : vector<8x32xf32>
    %763 = math.exp %762 : vector<8x32xf32>
    %cst_189 = arith.constant 1.000000e+00 : f32
    %764 = vector.broadcast %cst_189 : f32 to vector<8x32xf32>
    %765 = arith.addf %764, %763 : vector<8x32xf32>
    %766 = arith.divf %764, %765 : vector<8x32xf32>
    %767 = vector.extract_strided_slice %753 {offsets = [0, 64], sizes = [8, 32], strides = [1, 1]} : vector<8x128xf32> to vector<8x32xf32>
    %768 = math.tanh %767 : vector<8x32xf32>
    %769 = arith.mulf %766, %768 : vector<8x32xf32>
    %770 = arith.addf %760, %769 : vector<8x32xf32>
    %771 = vector.extract_strided_slice %753 {offsets = [0, 96], sizes = [8, 32], strides = [1, 1]} : vector<8x128xf32> to vector<8x32xf32>
    %772 = arith.negf %771 : vector<8x32xf32>
    %773 = math.exp %772 : vector<8x32xf32>
    %cst_190 = arith.constant 1.000000e+00 : f32
    %774 = vector.broadcast %cst_190 : f32 to vector<8x32xf32>
    %775 = arith.addf %774, %773 : vector<8x32xf32>
    %776 = arith.divf %774, %775 : vector<8x32xf32>
    %777 = math.tanh %770 : vector<8x32xf32>
    %778 = arith.mulf %776, %777 : vector<8x32xf32>
    %779 = tpu.concatenate %778, %711 in 1 : vector<8x32xf32>, vector<8x32xf32> -> vector<8x64xf32>
    %780 = arith.truncf %779 : vector<8x64xf32> to vector<8x64xbf16>
    %c96_191 = arith.constant 96 : index
    %c0_192 = arith.constant 0 : index
    %781 = vector.load %arg1[%c96_191, %c0_192] : memref<288x128xbf16, #tpu.memory_space<vmem>>, vector<64x128xbf16>
    %cst_193 = arith.constant dense<0.000000e+00> : vector<8x128xf32>
    %782 = tpu.matmul %780, %781, %cst_193 {dimension_numbers = #tpu.dot_dimension_numbers<[1], [0], [0], [1], [0, 0, 1, 1], [], []>} : vector<8x64xbf16>, vector<64x128xbf16>, vector<8x128xf32> -> vector<8x128xf32>
    %783 = vector.broadcast %16 : vector<1x128xf32> to vector<8x128xf32>
    %784 = arith.addf %782, %783 : vector<8x128xf32>
    %785 = vector.extract_strided_slice %784 {offsets = [0, 32], sizes = [8, 32], strides = [1, 1]} : vector<8x128xf32> to vector<8x32xf32>
    %786 = arith.negf %785 : vector<8x32xf32>
    %787 = math.exp %786 : vector<8x32xf32>
    %cst_194 = arith.constant 1.000000e+00 : f32
    %788 = vector.broadcast %cst_194 : f32 to vector<8x32xf32>
    %789 = arith.addf %788, %787 : vector<8x32xf32>
    %790 = arith.divf %788, %789 : vector<8x32xf32>
    %791 = arith.mulf %790, %703 : vector<8x32xf32>
    %792 = vector.extract_strided_slice %784 {offsets = [0, 0], sizes = [8, 32], strides = [1, 1]} : vector<8x128xf32> to vector<8x32xf32>
    %793 = arith.negf %792 : vector<8x32xf32>
    %794 = math.exp %793 : vector<8x32xf32>
    %cst_195 = arith.constant 1.000000e+00 : f32
    %795 = vector.broadcast %cst_195 : f32 to vector<8x32xf32>
    %796 = arith.addf %795, %794 : vector<8x32xf32>
    %797 = arith.divf %795, %796 : vector<8x32xf32>
    %798 = vector.extract_strided_slice %784 {offsets = [0, 64], sizes = [8, 32], strides = [1, 1]} : vector<8x128xf32> to vector<8x32xf32>
    %799 = math.tanh %798 : vector<8x32xf32>
    %800 = arith.mulf %797, %799 : vector<8x32xf32>
    %801 = arith.addf %791, %800 : vector<8x32xf32>
    %802 = vector.extract_strided_slice %784 {offsets = [0, 96], sizes = [8, 32], strides = [1, 1]} : vector<8x128xf32> to vector<8x32xf32>
    %803 = arith.negf %802 : vector<8x32xf32>
    %804 = math.exp %803 : vector<8x32xf32>
    %cst_196 = arith.constant 1.000000e+00 : f32
    %805 = vector.broadcast %cst_196 : f32 to vector<8x32xf32>
    %806 = arith.addf %805, %804 : vector<8x32xf32>
    %807 = arith.divf %805, %806 : vector<8x32xf32>
    %808 = math.tanh %801 : vector<8x32xf32>
    %809 = arith.mulf %807, %808 : vector<8x32xf32>
    %c56_197 = arith.constant 56 : index
    %c0_198 = arith.constant 0 : index
    %810 = vector.load %arg5[%c56_197, %c0_198] : memref<64x32xf32, #tpu.memory_space<vmem>>, vector<8x32xf32>
    tpu.vector_store %arg5[%c56_197, %c0_198], %809 {strides = array<i32>} : memref<64x32xf32, #tpu.memory_space<vmem>>, vector<8x32xf32>,
    %c0_199 = arith.constant 0 : index
    %c0_200 = arith.constant 0 : index
    %811 = vector.load %arg5[%c0_199, %c0_200] : memref<64x32xf32, #tpu.memory_space<vmem>>, vector<64x32xf32>
    %812 = arith.truncf %811 : vector<64x32xf32> to vector<64x32xbf16>
    %c256 = arith.constant 256 : index
    %c0_201 = arith.constant 0 : index
    %813 = vector.load %arg1[%c256, %c0_201] : memref<288x128xbf16, #tpu.memory_space<vmem>>, vector<32x128xbf16>
    %cst_202 = arith.constant dense<0.000000e+00> : vector<64x128xf32>
    %814 = tpu.matmul %812, %813, %cst_202 {dimension_numbers = #tpu.dot_dimension_numbers<[1], [0], [0], [1], [0, 0, 1, 1], [], []>} : vector<64x32xbf16>, vector<32x128xbf16>, vector<64x128xf32> -> vector<64x128xf32>
    %815 = vector.extract_strided_slice %814 {offsets = [0, 0], sizes = [64, 7], strides = [1, 1]} : vector<64x128xf32> to vector<64x7xf32>
    %cst_203 = arith.constant dense<0xFF800000> : vector<64xf32>
    %816 = vector.multi_reduction <maximumf>, %815, %cst_203 [1] : vector<64x7xf32> to vector<64xf32>
    %817 = vector.shape_cast %816 : vector<64xf32> to vector<64x1xf32>
    %818 = vector.broadcast %817 : vector<64x1xf32> to vector<64x7xf32>
    %819 = arith.subf %815, %818 : vector<64x7xf32>
    %820 = math.exp %819 : vector<64x7xf32>
    %cst_204 = arith.constant dense<0.000000e+00> : vector<64xf32>
    %821 = vector.multi_reduction <add>, %820, %cst_204 [1] : vector<64x7xf32> to vector<64xf32>
    %822 = vector.shape_cast %821 : vector<64xf32> to vector<64x1xf32>
    %823 = math.log %822 : vector<64x1xf32>
    %824 = vector.broadcast %823 : vector<64x1xf32> to vector<64x7xf32>
    %825 = arith.subf %819, %824 : vector<64x7xf32>
    %826 = vector.extract_strided_slice %814 {offsets = [0, 7], sizes = [64, 15], strides = [1, 1]} : vector<64x128xf32> to vector<64x15xf32>
    %cst_205 = arith.constant dense<0xFF800000> : vector<64xf32>
    %827 = vector.multi_reduction <maximumf>, %826, %cst_205 [1] : vector<64x15xf32> to vector<64xf32>
    %828 = vector.shape_cast %827 : vector<64xf32> to vector<64x1xf32>
    %829 = vector.broadcast %828 : vector<64x1xf32> to vector<64x15xf32>
    %830 = arith.subf %826, %829 : vector<64x15xf32>
    %831 = math.exp %830 : vector<64x15xf32>
    %cst_206 = arith.constant dense<0.000000e+00> : vector<64xf32>
    %832 = vector.multi_reduction <add>, %831, %cst_206 [1] : vector<64x15xf32> to vector<64xf32>
    %833 = vector.shape_cast %832 : vector<64xf32> to vector<64x1xf32>
    %834 = math.log %833 : vector<64x1xf32>
    %835 = vector.broadcast %834 : vector<64x1xf32> to vector<64x15xf32>
    %836 = arith.subf %830, %835 : vector<64x15xf32>
    %837 = vector.extract_strided_slice %814 {offsets = [0, 22], sizes = [64, 80], strides = [1, 1]} : vector<64x128xf32> to vector<64x80xf32>
    %cst_207 = arith.constant dense<0xFF800000> : vector<64xf32>
    %838 = vector.multi_reduction <maximumf>, %837, %cst_207 [1] : vector<64x80xf32> to vector<64xf32>
    %839 = vector.shape_cast %838 : vector<64xf32> to vector<64x1xf32>
    %840 = vector.broadcast %839 : vector<64x1xf32> to vector<64x80xf32>
    %841 = arith.subf %837, %840 : vector<64x80xf32>
    %842 = math.exp %841 : vector<64x80xf32>
    %cst_208 = arith.constant dense<0.000000e+00> : vector<64xf32>
    %843 = vector.multi_reduction <add>, %842, %cst_208 [1] : vector<64x80xf32> to vector<64xf32>
    %844 = vector.shape_cast %843 : vector<64xf32> to vector<64x1xf32>
    %845 = math.log %844 : vector<64x1xf32>
    %846 = vector.broadcast %845 : vector<64x1xf32> to vector<64x80xf32>
    %847 = arith.subf %841, %846 : vector<64x80xf32>
    %c24_209 = arith.constant 24 : index
    %c0_210 = arith.constant 0 : index
    %848 = vector.load %arg2[%c24_209, %c0_210] : memref<88x128xf32, #tpu.memory_space<vmem>>, vector<64x128xf32>
    %849 = vector.extract_strided_slice %848 {offsets = [0, 0], sizes = [64, 7], strides = [1, 1]} : vector<64x128xf32> to vector<64x7xf32>
    %850 = arith.mulf %825, %849 : vector<64x7xf32>
    %cst_211 = arith.constant dense<0.000000e+00> : vector<64xf32>
    %851 = vector.multi_reduction <add>, %850, %cst_211 [1] : vector<64x7xf32> to vector<64xf32>
    %852 = vector.shape_cast %851 : vector<64xf32> to vector<64x1xf32>
    %853 = vector.extract_strided_slice %848 {offsets = [0, 7], sizes = [64, 15], strides = [1, 1]} : vector<64x128xf32> to vector<64x15xf32>
    %854 = arith.mulf %836, %853 : vector<64x15xf32>
    %cst_212 = arith.constant dense<0.000000e+00> : vector<64xf32>
    %855 = vector.multi_reduction <add>, %854, %cst_212 [1] : vector<64x15xf32> to vector<64xf32>
    %856 = vector.shape_cast %855 : vector<64xf32> to vector<64x1xf32>
    %857 = arith.addf %852, %856 : vector<64x1xf32>
    %858 = vector.extract_strided_slice %848 {offsets = [0, 22], sizes = [64, 80], strides = [1, 1]} : vector<64x128xf32> to vector<64x80xf32>
    %859 = arith.mulf %847, %858 : vector<64x80xf32>
    %cst_213 = arith.constant dense<0.000000e+00> : vector<64xf32>
    %860 = vector.multi_reduction <add>, %859, %cst_213 [1] : vector<64x80xf32> to vector<64xf32>
    %861 = vector.shape_cast %860 : vector<64xf32> to vector<64x1xf32>
    %862 = arith.addf %857, %861 : vector<64x1xf32>
    %863 = vector.shape_cast %862 : vector<64x1xf32> to vector<1x64x1xf32>
    %cst_214 = arith.constant dense<0.000000e+00> : vector<1xf32>
    %864 = vector.multi_reduction <add>, %863, %cst_214 [1, 2] : vector<1x64x1xf32> to vector<1xf32>
    %865 = vector.shape_cast %864 : vector<1xf32> to vector<1x1x1xf32>
    %866 = vector.extract %865[0, 0, 0] : f32 from vector<1x1x1xf32>
    %867 = vector.broadcast %866 : f32 to vector<1x1xf32>
    %cst_215 = arith.constant 6.400000e+01 : f32
    %868 = vector.broadcast %cst_215 : f32 to vector<1x1xf32>
    %869 = arith.divf %867, %868 : vector<1x1xf32>
    %cst_216 = arith.constant 0.000000e+00 : f32
    %870 = vector.broadcast %cst_216 : f32 to vector<1x1xf32>
    %871 = arith.subf %870, %869 : vector<1x1xf32>
    %cst_217 = arith.constant 0.000000e+00 : f32
    %872 = vector.broadcast %cst_217 : f32 to vector<8x1xf32>
    %873 = vector.broadcast %871 : vector<1x1xf32> to vector<8x1xf32>
    %874 = arith.addf %873, %872 : vector<8x1xf32>
    %c0_218 = arith.constant 0 : index
    %c0_219 = arith.constant 0 : index
    %875 = vector.load %arg6[%c0_218, %c0_219] : memref<64x2xf32, #tpu.memory_space<vmem>>, vector<64x2xf32>
    %cst_220 = arith.constant 0.000000e+00 : f32
    %876 = vector.broadcast %cst_220 : f32 to vector<64x93xf32>
    %877 = tpu.concatenate %811, %875, %862, %876 in 1 : vector<64x32xf32>, vector<64x2xf32>, vector<64x1xf32>, vector<64x93xf32> -> vector<64x128xf32>
    %c0_221 = arith.constant 0 : index
    %c0_222 = arith.constant 0 : index
    %878 = vector.load %arg3[%c0_221, %c0_222] : memref<64x128xf32, #tpu.memory_space<vmem>>, vector<64x128xf32>
    tpu.vector_store %arg3[%c0_221, %c0_222], %877 {strides = array<i32>} : memref<64x128xf32, #tpu.memory_space<vmem>>, vector<64x128xf32>,
    %879 = tpu.concatenate %778, %809, %770, %801 in 1 : vector<8x32xf32>, vector<8x32xf32>, vector<8x32xf32>, vector<8x32xf32> -> vector<8x128xf32>
    %c0_223 = arith.constant 0 : index
    %c0_224 = arith.constant 0 : index
    %880 = vector.load %arg4[%c0_223, %c0_224] : memref<16x128xf32, #tpu.memory_space<vmem>>, vector<8x128xf32>
    tpu.vector_store %arg4[%c0_223, %c0_224], %879 {strides = array<i32>} : memref<16x128xf32, #tpu.memory_space<vmem>>, vector<8x128xf32>,
    %cst_225 = arith.constant 0.000000e+00 : f32
    %881 = vector.broadcast %cst_225 : f32 to vector<8x125xf32>
    %882 = tpu.concatenate %742, %744, %874, %881 in 1 : vector<8x1xf32>, vector<8x1xf32>, vector<8x1xf32>, vector<8x125xf32> -> vector<8x128xf32>
    %c8_226 = arith.constant 8 : index
    %c0_227 = arith.constant 0 : index
    %883 = vector.load %arg4[%c8_226, %c0_227] : memref<16x128xf32, #tpu.memory_space<vmem>>, vector<8x128xf32>
    tpu.vector_store %arg4[%c8_226, %c0_227], %882 {strides = array<i32>} : memref<16x128xf32, #tpu.memory_space<vmem>>, vector<8x128xf32>,
    return
  }
}

</mosaic_0001>

<bundles_post_ra>
// kernel: tpu_custom_call.1
= control target key start
LH: loop header
LB: loop body
LE: loop exit
PB: predicated region body
PF: predicated region fallthrough
CT: control target
= control target key end

     0   :  { %10 = vsyncpa [#allocation5], 0  ;;  %s6358_s0 = inlined_call_operand.vmem [shape: f32[64,32], index: 0, kind: input, shape index: {}]   ;;  %s6359_s1 = inlined_call_operand.hbm [shape: bf16[288,128], index: 1, kind: input, shape index: {}]   ;;  %s6360_s2 = inlined_call_operand.vmem [shape: f32[88,128], index: 2, kind: input, shape index: {}]   ;;  %s6361_s3 = inlined_call_operand.hbm [shape: f32[64,128], index: 3, kind: output, shape index: {0}]   ;;  %s6362_s4 = inlined_call_operand.hbm [shape: f32[16,128], index: 4, kind: output, shape index: {1}]  }
   0x1   :  { %11 = vsyncpa [#allocation6], 0 }
   0x2   :  { %12 = vsyncpa [#allocation9], 0  ;;  %s4996_s15 = smov [#allocation4]   ;;  %s4924_s19 = scalar_lea.hbm %s6359_s1, 2304 }
   0x3   :  { %s20_s16 = sshll.u32 %s4996_s15, 4  ;;  %p4925_p0 = scmp.ne.s32.totalorder %s6359_s1, %s4924_s19  ;;  %s21_s16 = int_to_ptr.vmem [resolvable:$true] %s20_s16 }
   0x4   :  { %p4928_p1 = scmp.lt.u32.totalorder %s4924_s19, %s6359_s1 }
   0x6   :  { %p4930_p2 = pnand %p4928_p1, %p4925_p0 }
   0x8   :  { %4933 = shalt.err (!%p4930_p2)
}
   0x9   :  { %s4934_s24 = scalar_lea.vmem %s21_s16, 2304  ;;  %p4939_p4 = scmp.lt.s32.totalorder %s21_s16, %s21_s16 }
   0xa   :  { %p4935_p3 = scmp.ne.s32.totalorder %s21_s16, %s4934_s24  ;;  %p4940_p5 = scmp.lt.s32.totalorder %s4934_s24, %s4934_s24 }
   0xc   :  { %p4941_p6 = por %p4940_p5, %p4939_p4 }
   0xe   :  { %p4942_p7 = pnand %p4941_p6, %p4935_p3 }
  0x10   :  { %4945 = shalt.err (!%p4942_p7)
}
  0x11   :  { %s4997_s25 = smov 64   ;;  %s4998_s26 = smov 4  }
  0x12   :  { %26 = dma.hbm_to_vmem [thread:$0]  %s6359_s1, 2304, %s21_s16, [#allocation5], %s4997_s25, %s4997_s25, %s4998_s26  }
  0x13   :  { %4990 = dma.done.wait [#allocation5], 2304  }
  0x14   :  { %4991 = vsyncadd [#allocation5], 4294964992  ;;  %v4999_v0 = vmov 0.0   ;;  %vm5000_vm0 = vmmov 0   ;;  %v5067_v1 = vld [vmem:[%s6360_s2] sm:$0xff]  ;;  %v4538_v3 = vld [vmem:[#allocation4 + $0x60] sm:$0xff]   ;;  %v184_v14 = vlaneseq }
  0x15   :  { %4165 = vmatprep.subr.bf16.mxu0 %v4999_v0  ;;  %4177 = vmatprep.subr.bf16.mxu1 %v4999_v0  ;;  %v43_v2 = vpack.c.bf16 %v5067_v1, %v5067_v1  ;;  %v4539_v4 = vld [vmem:[#allocation4 + $0x68] sm:$0xff]   ;;  %s5001_s1 = smov 96   ;;  %v4540_v5 = vld [vmem:[#allocation4 + $0x50] sm:$0xff]   ;;  %v4542_v6 = vld [vmem:[#allocation4 + $0x58] sm:$0xff]   ;;  %vm139_vm1 = vcmask 261120   ;;  %vm79_vm2 = vcmask 523264  }
  0x16   :  { %4181 = vmatprep.mubr.msk.bf16.mxu1 %vm5000_vm0, %v4999_v0  ;;  %4173 = vmatprep.mubr.msk.bf16.mxu0 %vm5000_vm0, %v4999_v0  ;;  %v4541_v7 = vld [vmem:[#allocation4 + $0x70] sm:$0xff]   ;;  %v4543_v8 = vld [vmem:[#allocation4 + $0x78] sm:$0xff]   ;;  %v5087_v19 = vshrl.u32 %v184_v14, 7  ;;  %s5002_s7 = smov 2   ;;  %s5003_s8 = smov 1   ;;  %v5004_v29 = vmov 100  }
  0x17   :  { %53 = vrot.lane.b32.xlu0 %v43_v2, %s5001_s1  ;;  %4166 = vmatpush3.bf16.msra.mxu0 %v4538_v3  ;;  %v5093_v22 = vld [vmem:[%s6360_s2 + $0x10] sm:$0xff]  ;;  %v4544_v43 = vld [vmem:[#allocation4] sm:$0xff]   ;;  %v4545_v45 = vld [vmem:[#allocation4 + $0x8] sm:$0xff]   ;;  %s5005_s9 = smov 32   ;;  %vm322_vm3 = vcmask 785408   ;;  %s5006_s14 = smov 3  }
  0x18   :  { %4167 = vmatprep.subr.bf16.mxu0 %v4999_v0  ;;  %4178 = vmatpush3.bf16.msra.mxu1 %v4540_v5  ;;  %v186_v21 = vsub.s32 2, %v5087_v19  ;;  %v4546_v47 = vld [vmem:[#allocation4 + $0x10] sm:$0xff]   ;;  %v4547_v50 = vld [vmem:[#allocation4 + $0x18] sm:$0xff]   ;;  %v4548_v52 = vld [vmem:[#allocation4 + $0x20] sm:$0xff]   ;;  %v284_v62 = vsub.s32 0, %v5087_v19  ;;  %s5007_s15 = smov 126  }
  0x19   :  { %4179 = vmatprep.subr.bf16.mxu1 %v4999_v0  ;;  %4501 = vset.pattern.permute.xlu0 %v5004_v29  ;;  %v5124_v51 = vld [vmem:[%s6360_s2 + $0x8] sm:$0xff]  ;;  %v4549_v53 = vld [vmem:[#allocation4 + $0x28] sm:$0xff]   ;;  %s5008_s16 = smov 127   ;;  %vm254_vm4 = vcmask 7168   ;;  %vm256_vm5 = vcmask 15360   ;;  %vm3174_vm6 = vcmask 56320  }
  0x1a   :  { %v5096_v23 = vrot.slane %v5093_v22, %v186_v21  ;;  %4502 = vset.pattern.permute.xlu1 %v5004_v29  ;;  %v258_v56 = vld [vmem:[%s6358_s0] sm:$0xff]  ;;  %v5148_v63 = vrot.slane %v5093_v22, %v284_v62  ;;  %v4551_v21 = vld [vmem:[#allocation4 + $0x38] sm:$0xff]   ;;  %vm3271_vm7 = vcmask 179256   ;;  %vm3401_vm8 = vcmask 834736   ;;  %s5011_s11 = smov 121   ;;  %s5012_s12 = smov 106  }
  0x1b   :  { %4168 = vmatpush3.bf16.msra.mxu0 %v4539_v4  ;;  %vm3352_vm9 = vcmask 121856   ;;  %vm3482_vm10 = vcmask 654336   ;;  %vm3792_vm11 = vcmask 277504   ;;  %vm3801_vm12 = vcmask 285696  }
  0x1c   :  { %4169 = vmatprep.subr.bf16.mxu0 %v4999_v0  ;;  %4180 = vmatpush3.bf16.msra.mxu1 %v4542_v6 }
  0x1d   :  { %4185 = vmatprep.subr.bf16.mxu1 %v4999_v0 }
  0x1f   :  { %4170 = vmatpush3.bf16.msra.mxu0 %v4541_v7  ;;  %4182 = vmatmul.mubr.msk.bf16.vlgmr.msra.gmra.mrb[0].mxu1 %vm139_vm1, %v43_v2 }
  0x20   :  { %4171 = vmatprep.subr.bf16.mxu0 %v4999_v0  ;;  %4197 = vmatprep.mubr.msk.bf16.mxu1 %vm5000_vm0, %v4999_v0 }
  0x21   :  { %4186 = vmatpush3.bf16.msra.mxu1 %v4544_v43 }
  0x22   :  { %4187 = vmatprep.subr.bf16.mxu1 %v4999_v0 }
  0x23   :  { %4172 = vmatpush3.bf16.msra.mxu0 %v4543_v8 }
  0x24   :  { %4201 = vmatprep.subr.bf16.mxu0 %v4999_v0 }
  0x25   :  { %4188 = vmatpush3.bf16.msra.mxu1 %v4545_v45 }
  0x26   :  { %4189 = vmatprep.subr.bf16.mxu1 %v4999_v0 }
  0x29   :  { %4190 = vmatpush3.bf16.msra.mxu1 %v4546_v47 }
  0x2a   :  { %4191 = vmatprep.subr.bf16.mxu1 %v4999_v0 }
  0x2d   :  { %4192 = vmatpush3.bf16.msra.mxu1 %v4547_v50  ;;  %v4554_v50 = vld [vmem:[#allocation4 + $0x50] sm:$0xff]  }
  0x2e   :  { %4193 = vmatprep.subr.bf16.mxu1 %v4999_v0 }
  0x31   :  { %4194 = vmatpush3.bf16.msra.mxu1 %v4548_v52  ;;  %v4555_v52 = vld [vmem:[#allocation4 + $0x58] sm:$0xff]  }
  0x32   :  { %4195 = vmatprep.subr.bf16.mxu1 %v4999_v0 }
  0x35   :  { %4196 = vmatpush3.bf16.msra.mxu1 %v4549_v53 }
  0x36   :  { %4213 = vmatprep.subr.bf16.mxu1 %v4999_v0 }
  0x89   :  { %v54_v9 = vpop.permute.xlu0 %53 }
  0x8a   :  { %4174 = vmatmul.mubr.msk.bf16.vlgmr.msra.gmra.mrb[0].mxu0 %vm79_vm2, %v54_v9 }
  0x8b   :  { %4209 = vmatprep.mubr.msk.bf16.mxu0 %vm5000_vm0, %v4999_v0 }
  0xf2   :  { %v177_v10 = vpop.f32.mrb[0].mxu1 }
  0xf3   :  { %v4183_v11 = vpop.f32.mrb[1].mxu1 }
  0xf4   :  { %v180_v12 = vpop.f32.mrb[2].mxu1 }
  0xf5   :  { %v4184_v13 = vpop.f32.mrb[3].mxu1 }
 0x15d   :  { %v5084_v15 = vpop.f32.mrb[0].mxu0 }
 0x15e   :  { %v4175_v16 = vpop.f32.mrb[1].mxu0  ;;  %v178_v17 = vadd.f32 %v177_v10, %v5084_v15 }
 0x15f   :  { %v120_v18 = vpop.f32.mrb[2].mxu0 }
 0x160   :  { %v4176_v20 = vpop.f32.mrb[3].mxu0  ;;  %4640 = vtanh.f32 %v178_v17 }
 0x161   :  { %v4550_v20 = vld [vmem:[#allocation4 + $0x30] sm:$0xff]  }
 0x162   :  { %4202 = vmatpush3.bf16.msra.mxu0 %v4550_v20 }
 0x163   :  { %4203 = vmatprep.subr.bf16.mxu0 %v4999_v0 }
 0x166   :  { %4204 = vmatpush3.bf16.msra.mxu0 %v4551_v21 }
 0x167   :  { %4205 = vmatprep.subr.bf16.mxu0 %v4999_v0 }
 0x16a   :  { %v4641_v24 = vpop.eup %4640 }
 0x16b   :  { %v188_v25 = vmul.f32 %v4641_v24, %v5096_v23  ;;  %v4552_v24 = vld [vmem:[#allocation4 + $0x40] sm:$0xff]  }
 0x16c   :  { %4206 = vmatpush3.bf16.msra.mxu0 %v4552_v24 }
 0x16d   :  { %194 = vrot.lane.b32.xlu0 %v188_v25, %s5001_s1  ;;  %v189_v26 = vsel %vm139_vm1, %v188_v25, 0.0  ;;  %4207 = vmatprep.subr.bf16.mxu0 %v4999_v0 }
 0x16e   :  { %190 = vadd.xlane.f32.xlu1 %v189_v26  ;;  %v4553_v26 = vld [vmem:[#allocation4 + $0x48] sm:$0xff]  }
 0x170   :  { %4208 = vmatpush3.bf16.msra.mxu0 %v4553_v26 }
 0x171   :  { %201 = vrot.lane.b32.xlu0 %v5067_v1, %s5002_s7  ;;  %4237 = vmatprep.subr.bf16.mxu0 %v4999_v0 }
 0x1df   :  { %v195_v27 = vpop.permute.xlu0 %194 }
 0x1e0   :  { %v197_v28 = vsel %vm139_vm1, %v195_v27, 0.0 }
 0x1e1   :  { %198 = vadd.xlane.f32.xlu1 %v197_v28 }
 0x1e3   :  { %v202_v33 = vpop.permute.xlu0 %201 }
 0x1f2   :  { %205 = vrot.lane.b32.xlu1 %v5067_v1, %s5003_s8 }
 0x1fb   :  { %v191_v30 = vpop.xlane.xlu1 %190 }
 0x1fc   :  { %v192_v32 = vadd.f32 %v191_v30, %v5067_v1 }
 0x1fe   :  { %v204_v36 = vmul.f32 %v202_v33, %v192_v32  ;;  %v409_v32 = vsub.s32 1, %v5087_v19 }
 0x200   :  { %v5172_v33 = vrot.slane %v5093_v22, %v409_v32 }
 0x26e   :  { %v199_v31 = vpop.xlane.xlu1 %198 }
 0x26f   :  { %v200_v34 = vadd.f32 %v199_v31, %v5067_v1 }
 0x272   :  { %v206_v35 = vpop.permute.xlu1 %205 }
 0x273   :  { %v208_v37 = vmul.f32 %v206_v35, %v200_v34 }
 0x275   :  { %v209_v38 = vsub.f32 %v204_v36, %v208_v37 }
 0x277   :  { %v3887_v39 = vmul.f32 -1.442695, %v209_v38 }
 0x279   :  { %4642 = vpow2.f32 %v3887_v39 }
 0x283   :  { %v4643_v40 = vpop.eup %4642 }
 0x284   :  { %v213_v41 = vadd.f32 1.0, %v4643_v40 }
 0x286   :  { %4644 = vrcp.f32 %v213_v41 }
 0x290   :  { %v5108_v42 = vpop.eup %4644 }
 0x291   :  { %219 = vperm.xlu0 %4501, %v5108_v42  }
 0x295   :  { %39 = vrot.lane.b32.xlu0 %v5067_v1, %s5001_s1 }
 0x310   :  { %v220_v44 = vpop.permute.xlu0 %219 }
 0x314   :  { %v40_v46 = vpop.permute.xlu0 %39 }
 0x315   :  { %v5115_v48 = vsub.f32 %v5067_v1, %v40_v46 }
 0x317   :  { %v222_v49 = vmul.f32 %v220_v44, %v5115_v48 }
 0x319   :  { %224 = vrot.lane.b32.xlu0 %v222_v49, %s5005_s9 }
 0x31d   :  { %264 = vrot.lane.b32.xlu0 %v5124_v51, %s4997_s25 }
 0x321   :  { %372 = vrot.lane.b32.xlu0 %v5124_v51, %s5001_s1 }
 0x38b   :  { %v225_v54 = vpop.permute.xlu0 %224 }
 0x38c   :  { %v227_v55 = vadd.f32 %v225_v54, %v5067_v1 }
 0x38e   :  { %260 = vrot.lane.b32.xlu1 %v227_v55, %s5001_s1 }
 0x38f   :  { %v5138_v57 = vpop.permute.xlu0 %264 }
 0x393   :  { %v373_v14 = vpop.permute.xlu0 %372 }
 0x400   :  { %v261_v58 = vpop.permute.xlu1 %260 }
 0x401   :  { %v267_v59 = vsel %vm139_vm1, %v258_v56, %v261_v58 }
 0x402   :  { %v268_v60 = vsel %vm79_vm2, %v267_v59, %v5138_v57 }
 0x403   :  { %v269_v61 = vpack.c.bf16 %v268_v60, %v268_v60 }
 0x405   :  { %4198 = vmatmul.mubr.msk.bf16.vlgmr.msra.gmra.mrb[4].mxu1 %vm322_vm3, %v269_v61 }
 0x406   :  { %4217 = vmatprep.mubr.msk.bf16.mxu1 %vm5000_vm0, %v4999_v0  ;;  %4214 = vmatpush3.bf16.msra.mxu1 %v4554_v50 }
 0x407   :  { %4215 = vmatprep.subr.bf16.mxu1 %v4999_v0 }
 0x40a   :  { %4216 = vmatpush3.bf16.msra.mxu1 %v4555_v52 }
 0x40b   :  { %4221 = vmatprep.subr.bf16.mxu1 %v4999_v0 }
 0x4d8   :  { %v360_v2 = vpop.f32.mrb[4].mxu1 }
 0x4d9   :  { %v361_v3 = vadd.f32 %v360_v2, %v5148_v63  ;;  %v4199_v4 = vpop.f32.mrb[5].mxu1 }
 0x4da   :  { %v363_v5 = vpop.f32.mrb[6].mxu1 }
 0x4db   :  { %4646 = vtanh.f32 %v361_v3  ;;  %v4200_v6 = vpop.f32.mrb[7].mxu1  ;;  %v3895_v8 = vmul.f32 -1.442695, %v361_v3 }
 0x4dd   :  { %4648 = vpow2.f32 %v3895_v8 }
 0x4e5   :  { %v4647_v7 = vpop.eup %4646 }
 0x4e6   :  { %378 = vrot.lane.b32.xlu1 %v4647_v7, %s4997_s25  ;;  %v216_v7 = vsub.f32 1.0, %v5108_v42 }
 0x4e7   :  { %v4649_v9 = vpop.eup %4648 }
 0x4e8   :  { %v369_v10 = vadd.f32 1.0, %v4649_v9 }
 0x4ea   :  { %4650 = vrcp.f32 %v369_v10 }
 0x4f4   :  { %v4651_v11 = vpop.eup %4650 }
 0x4f5   :  { %v375_v16 = vmul.f32 %v4651_v11, %v373_v14 }
 0x558   :  { %v379_v12 = vpop.permute.xlu1 %378 }
 0x559   :  { %v381_v13 = vmul.f32 %v4651_v11, %v379_v12 }
 0x55b   :  { %383 = vrot.lane.b32.xlu1 %v381_v13, %s5005_s9 }
 0x5cd   :  { %v384_v17 = vpop.permute.xlu1 %383 }
 0x5ce   :  { %v5153_v18 = vadd.f32 %v384_v17, %v375_v16 }
 0x5d0   :  { %4652 = vtanh.f32 %v5153_v18 }
 0x5da   :  { %v4653_v25 = vpop.eup %4652 }
 0x5db   :  { %389 = vrot.lane.b32.xlu0 %v4653_v25, %s4997_s25 }
 0x64d   :  { %v390_v27 = vpop.permute.xlu0 %389 }
 0x64e   :  { %v5161_v28 = vmul.f32 %v4651_v11, %v390_v27 }
 0x650   :  { %394 = vrot.lane.b32.xlu1 %v5161_v28, %s5005_s9 }
 0x6c2   :  { %v395_v29 = vpop.permute.xlu1 %394 }
 0x6c3   :  { %v397_v30 = vsel %vm139_vm1, %v395_v29, %v5124_v51 }
 0x6c4   :  { %v398_v31 = vpack.c.bf16 %v397_v30, %v397_v30 }
 0x6c6   :  { %4210 = vmatmul.mubr.msk.bf16.vlgmr.msra.gmra.mrb[4].mxu0 %vm79_vm2, %v398_v31 }
 0x6c7   :  { %4245 = vmatprep.mubr.msk.bf16.mxu0 %vm5000_vm0, %v4999_v0 }
 0x799   :  { %v472_v34 = vpop.f32.mrb[4].mxu0 }
 0x79a   :  { %v473_v35 = vadd.f32 %v472_v34, %v5172_v33  ;;  %v4211_v36 = vpop.f32.mrb[5].mxu0 }
 0x79b   :  { %v475_v37 = vpop.f32.mrb[6].mxu0  ;;  %v4557_v36 = vld [vmem:[#allocation4 + $0x8] sm:$0xff]  }
 0x79c   :  { %4654 = vtanh.f32 %v473_v35  ;;  %v4212_v38 = vpop.f32.mrb[7].mxu0  ;;  %v3901_v40 = vmul.f32 -1.442695, %v473_v35  ;;  %v4556_v35 = vld [vmem:[#allocation4] sm:$0xff]  }
 0x79d   :  { %v4558_v38 = vld [vmem:[#allocation4 + $0x10] sm:$0xff]  }
 0x79e   :  { %4656 = vpow2.f32 %v3901_v40  ;;  %v4559_v40 = vld [vmem:[#allocation4 + $0x18] sm:$0xff]  }
 0x7a6   :  { %v4655_v39 = vpop.eup %4654 }
 0x7a7   :  { %487 = vrot.lane.b32.xlu0 %v4655_v39, %s4997_s25 }
 0x7a8   :  { %v4657_v41 = vpop.eup %4656 }
 0x7a9   :  { %v481_v43 = vadd.f32 1.0, %v4657_v41  ;;  %v4560_v41 = vld [vmem:[#allocation4 + $0x20] sm:$0xff]  }
 0x7ab   :  { %4658 = vrcp.f32 %v481_v43  ;;  %v4561_v43 = vld [vmem:[#allocation4 + $0x28] sm:$0xff]  }
 0x7b5   :  { %v4659_v44 = vpop.eup %4658 }
 0x7b6   :  { %v484_v22 = vmul.f32 %v4659_v44, %v5138_v57 }
 0x819   :  { %v488_v19 = vpop.permute.xlu0 %487 }
 0x81a   :  { %v490_v45 = vmul.f32 %v4659_v44, %v488_v19 }
 0x81c   :  { %492 = vrot.lane.b32.xlu1 %v490_v45, %s5005_s9 }
 0x88e   :  { %v493_v46 = vpop.permute.xlu1 %492 }
 0x88f   :  { %v5178_v47 = vadd.f32 %v493_v46, %v484_v22  ;;  %v634_v22 = vld [vmem:[%s6358_s0 + $0x8] sm:$0xff] }
 0x891   :  { %4660 = vtanh.f32 %v5178_v47 }
 0x892   :  { %4662 = vrcp.f32 %v5067_v1 }
 0x89b   :  { %v4661_v49 = vpop.eup %4660 }
 0x89c   :  { %498 = vrot.lane.b32.xlu0 %v4661_v49, %s4997_s25  ;;  %v4663_v51 = vpop.eup %4662 }
 0x8a0   :  { %229 = vrot.lane.b32.xlu0 %v4663_v51, %s4998_s26 }
 0x90e   :  { %v499_v53 = vpop.permute.xlu0 %498 }
 0x90f   :  { %v5186_v54 = vmul.f32 %v4659_v44, %v499_v53 }
 0x911   :  { %v507_v55 = vpack.c.bf16 %v5186_v54, %v5186_v54 }
 0x912   :  { %v5191_v56 = vpop.permute.xlu0 %229 }
 0x913   :  { %513 = vrot.lane.b32.xlu1 %v507_v55, %s5005_s9  ;;  %v232_v57 = vmul.f32 %v5108_v42, %v5191_v56 }
 0x917   :  { %238 = vrot.lane.b32.xlu1 %v4663_v51, %s5006_s14 }
 0x91b   :  { %234 = vrot.lane.b32.xlu1 %v232_v57, %s5007_s15 }
 0x985   :  { %v514_v58 = vpop.permute.xlu1 %513 }
 0x986   :  { %4218 = vmatmul.mubr.msk.bf16.vlgmr.msra.gmra.mrb[8].mxu1 %vm139_vm1, %v514_v58 }
 0x987   :  { %4233 = vmatprep.mubr.msk.bf16.mxu1 %vm5000_vm0, %v4999_v0  ;;  %4222 = vmatpush3.bf16.msra.mxu1 %v4556_v35 }
 0x988   :  { %4223 = vmatprep.subr.bf16.mxu1 %v4999_v0 }
 0x989   :  { %v5201_v5 = vpop.permute.xlu1 %238 }
 0x98a   :  { %v241_v8 = vmul.f32 %v5201_v5, %v216_v7 }
 0x98b   :  { %4224 = vmatpush3.bf16.msra.mxu1 %v4557_v36 }
 0x98c   :  { %4225 = vmatprep.subr.bf16.mxu1 %v4999_v0 }
 0x98d   :  { %v235_v13 = vpop.permute.xlu1 %234 }
 0x98e   :  { %v5217_v14 = vsub.f32 %v5067_v1, %v235_v13  ;;  %v4564_v13 = vld [vmem:[#allocation4 + $0x40] sm:$0xff]  }
 0x98f   :  { %4226 = vmatpush3.bf16.msra.mxu1 %v4558_v38 }
 0x990   :  { %4227 = vmatprep.subr.bf16.mxu1 %v4999_v0 }
 0x993   :  { %4228 = vmatpush3.bf16.msra.mxu1 %v4559_v40 }
 0x994   :  { %4229 = vmatprep.subr.bf16.mxu1 %v4999_v0 }
 0x997   :  { %4230 = vmatpush3.bf16.msra.mxu1 %v4560_v41 }
 0x998   :  { %4231 = vmatprep.subr.bf16.mxu1 %v4999_v0 }
 0x99b   :  { %4232 = vmatpush3.bf16.msra.mxu1 %v4561_v43 }
 0x99c   :  { %4257 = vmatprep.subr.bf16.mxu1 %v4999_v0 }
 0xa59   :  { %v564_v59 = vpop.f32.mrb[8].mxu1 }
 0xa5a   :  { %v565_v60 = vadd.f32 %v564_v59, %v5084_v15  ;;  %v4219_v61 = vpop.f32.mrb[9].mxu1 }
 0xa5b   :  { %v567_v62 = vpop.f32.mrb[10].mxu1 }
 0xa5c   :  { %4664 = vtanh.f32 %v565_v60  ;;  %v4220_v2 = vpop.f32.mrb[11].mxu1 }
 0xa66   :  { %v4665_v3 = vpop.eup %4664 }
 0xa67   :  { %v571_v4 = vmul.f32 %v4665_v3, %v5096_v23 }
 0xa69   :  { %577 = vrot.lane.b32.xlu0 %v571_v4, %s5001_s1  ;;  %v572_v6 = vsel %vm139_vm1, %v571_v4, 0.0 }
 0xa6a   :  { %573 = vadd.xlane.f32.xlu1 %v572_v6 }
 0xa6d   :  { %243 = vrot.lane.b32.xlu0 %v241_v8, %s5008_s16 }
 0xadb   :  { %v578_v9 = vpop.permute.xlu0 %577 }
 0xadc   :  { %v580_v10 = vsel %vm139_vm1, %v578_v9, 0.0 }
 0xadd   :  { %581 = vadd.xlane.f32.xlu0 %v580_v10  ;;  %v4562_v10 = vld [vmem:[#allocation4 + $0x30] sm:$0xff]  }
 0xade   :  { %4238 = vmatpush3.bf16.msra.mxu0 %v4562_v10 }
 0xadf   :  { %v244_v11 = vpop.permute.xlu0 %243  ;;  %4239 = vmatprep.subr.bf16.mxu0 %v4999_v0 }
 0xae0   :  { %v5212_v12 = vsub.f32 %v5067_v1, %v244_v11  ;;  %v4563_v11 = vld [vmem:[#allocation4 + $0x38] sm:$0xff]  }
 0xae2   :  { %590 = vrot.lane.b32.xlu1 %v5212_v12, %s5003_s8  ;;  %4240 = vmatpush3.bf16.msra.mxu0 %v4563_v11 }
 0xae3   :  { %4241 = vmatprep.subr.bf16.mxu0 %v4999_v0 }
 0xae6   :  { %4242 = vmatpush3.bf16.msra.mxu0 %v4564_v13 }
 0xae7   :  { %4243 = vmatprep.subr.bf16.mxu0 %v4999_v0 }
 0xaf3   :  { %585 = vrot.lane.b32.xlu0 %v5217_v14, %s5002_s7 }
 0xaf7   :  { %v574_v16 = vpop.xlane.xlu1 %573 }
 0xaf8   :  { %v575_v21 = vadd.f32 %v574_v16, %v5067_v1 }
 0xb54   :  { %v591_v24 = vpop.permute.xlu1 %590 }
 0xb6a   :  { %v582_v17 = vpop.xlane.xlu0 %581 }
 0xb6b   :  { %v583_v20 = vadd.f32 %v582_v17, %v5067_v1 }
 0xb6d   :  { %v593_v26 = vmul.f32 %v591_v24, %v583_v20 }
 0xb6e   :  { %v586_v25 = vpop.permute.xlu0 %585 }
 0xb6f   :  { %v588_v27 = vmul.f32 %v586_v25, %v575_v21 }
 0xb71   :  { %v594_v29 = vsub.f32 %v588_v27, %v593_v26 }
 0xb73   :  { %v3905_v30 = vmul.f32 -1.442695, %v594_v29 }
 0xb75   :  { %4666 = vpow2.f32 %v3905_v30 }
 0xb7f   :  { %v4667_v31 = vpop.eup %4666 }
 0xb80   :  { %v598_v32 = vadd.f32 1.0, %v4667_v31 }
 0xb82   :  { %4668 = vrcp.f32 %v598_v32 }
 0xb8c   :  { %v5223_v34 = vpop.eup %4668 }
 0xb8d   :  { %604 = vperm.xlu1 %4502, %v5223_v34  }
 0xc0c   :  { %v605_v37 = vpop.permute.xlu1 %604 }
 0xc0d   :  { %v607_v39 = vmul.f32 %v605_v37, %v5115_v48 }
 0xc0f   :  { %609 = vrot.lane.b32.xlu0 %v607_v39, %s5005_s9 }
 0xc81   :  { %v610_v44 = vpop.permute.xlu0 %609 }
 0xc82   :  { %v612_v19 = vadd.f32 %v610_v44, %v5067_v1 }
 0xc84   :  { %v4503_v45 = vpack.i.bf16 %v5161_v28, %v612_v19 }
 0xc86   :  { %4504 = vrot.lane.b32.xlu1 %v4503_v45, %s5001_s1  ;;  %v4566_v45 = vld [vmem:[#allocation4 + $0x50] sm:$0xff]  }
 0xcf8   :  { %v4505_v46 = vpop.permute.xlu1 %4504 }
 0xcf9   :  { %v4507_v49 = vunpack.i.h.bf16 %v4505_v46  ;;  %v4506_v50 = vunpack.i.l.bf16 %v4505_v46 }
 0xcfb   :  { %v642_v51 = vsel %vm139_vm1, %v634_v22, %v4506_v50  ;;  %v4567_v22 = vld [vmem:[#allocation4 + $0x58] sm:$0xff]  }
 0xcfc   :  { %v643_v52 = vsel %vm79_vm2, %v642_v51, %v4507_v49  ;;  %v613_v51 = vmul.f32 %v5223_v34, %v5191_v56 }
 0xcfd   :  { %v644_v53 = vpack.c.bf16 %v643_v52, %v643_v52 }
 0xcff   :  { %4234 = vmatmul.mubr.msk.bf16.vlgmr.msra.gmra.mrb[12].mxu1 %vm322_vm3, %v644_v53 }
 0xd00   :  { %4269 = vmatprep.mubr.msk.bf16.mxu1 %vm5000_vm0, %v4999_v0 }
 0xdd2   :  { %v730_v1 = vpop.f32.mrb[12].mxu1 }
 0xdd3   :  { %v731_v28 = vadd.f32 %v730_v1, %v5148_v63  ;;  %v4235_v55 = vpop.f32.mrb[13].mxu1 }
 0xdd4   :  { %v733_v57 = vpop.f32.mrb[14].mxu1 }
 0xdd5   :  { %4670 = vtanh.f32 %v731_v28  ;;  %v4236_v58 = vpop.f32.mrb[15].mxu1  ;;  %v3913_v60 = vmul.f32 -1.442695, %v731_v28 }
 0xdd7   :  { %4672 = vpow2.f32 %v3913_v60  ;;  %v601_v60 = vsub.f32 1.0, %v5223_v34 }
 0xddf   :  { %v4671_v59 = vpop.eup %4670 }
 0xde0   :  { %745 = vrot.lane.b32.xlu0 %v4671_v59, %s4997_s25 }
 0xde1   :  { %v4673_v61 = vpop.eup %4672 }
 0xde2   :  { %v739_v62 = vadd.f32 1.0, %v4673_v61 }
 0xde4   :  { %4674 = vrcp.f32 %v739_v62  ;;  %v619_v62 = vmul.f32 %v601_v60, %v5201_v5 }
 0xdee   :  { %v4675_v2 = vpop.eup %4674 }
 0xdef   :  { %v742_v6 = vmul.f32 %v4675_v2, %v5153_v18  ;;  %v4565_v18 = vld [vmem:[#allocation4 + $0x48] sm:$0xff]  }
 0xdf0   :  { %4244 = vmatpush3.bf16.msra.mxu0 %v4565_v18 }
 0xdf1   :  { %4249 = vmatprep.subr.bf16.mxu0 %v4999_v0 }
 0xe52   :  { %v746_v3 = vpop.permute.xlu0 %745 }
 0xe53   :  { %v748_v4 = vmul.f32 %v4675_v2, %v746_v3 }
 0xe55   :  { %750 = vrot.lane.b32.xlu1 %v748_v4, %s5005_s9 }
 0xec7   :  { %v751_v8 = vpop.permute.xlu1 %750 }
 0xec8   :  { %v5249_v9 = vadd.f32 %v751_v8, %v742_v6 }
 0xeca   :  { %4676 = vtanh.f32 %v5249_v9 }
 0xed4   :  { %v4677_v16 = vpop.eup %4676 }
 0xed5   :  { %756 = vrot.lane.b32.xlu0 %v4677_v16, %s4997_s25 }
 0xed9   :  { %764 = vrot.lane.b32.xlu0 %v5186_v54, %s4997_s25 }
 0xf47   :  { %v757_v17 = vpop.permute.xlu0 %756 }
 0xf48   :  { %v5259_v20 = vmul.f32 %v4675_v2, %v757_v17 }
 0xf4a   :  { %761 = vrot.lane.b32.xlu1 %v5259_v20, %s5005_s9 }
 0xf4b   :  { %v765_v21 = vpop.permute.xlu0 %764 }
 0xfbc   :  { %v762_v24 = vpop.permute.xlu1 %761 }
 0xfbd   :  { %v767_v25 = vsel %vm139_vm1, %v762_v24, %v765_v21 }
 0xfbe   :  { %v768_v26 = vpack.c.bf16 %v767_v25, %v767_v25 }
 0xfc0   :  { %4246 = vmatmul.mubr.msk.bf16.vlgmr.msra.gmra.mrb[8].mxu0 %vm79_vm2, %v768_v26 }
 0xfc1   :  { %4253 = vmatprep.mubr.msk.bf16.mxu0 %vm5000_vm0, %v4999_v0  ;;  %4250 = vmatpush3.bf16.msra.mxu0 %v4566_v45  ;;  %v1000_v45 = vld [vmem:[%s6358_s0 + $0x10] sm:$0xff] }
 0xfc2   :  { %4251 = vmatprep.subr.bf16.mxu0 %v4999_v0 }
 0xfc5   :  { %4252 = vmatpush3.bf16.msra.mxu0 %v4567_v22 }
 0xfc6   :  { %4273 = vmatprep.subr.bf16.mxu0 %v4999_v0 }
0x1093   :  { %v838_v27 = vpop.f32.mrb[8].mxu0 }
0x1094   :  { %v839_v29 = vadd.f32 %v838_v27, %v5172_v33  ;;  %v4247_v30 = vpop.f32.mrb[9].mxu0 }
0x1095   :  { %v841_v31 = vpop.f32.mrb[10].mxu0 }
0x1096   :  { %4678 = vtanh.f32 %v839_v29  ;;  %v4248_v32 = vpop.f32.mrb[11].mxu0  ;;  %v3919_v36 = vmul.f32 -1.442695, %v839_v29  ;;  %v4568_v31 = vld [vmem:[#allocation4] sm:$0xff]  }
0x1097   :  { %4258 = vmatpush3.bf16.msra.mxu1 %v4568_v31  ;;  %v4569_v32 = vld [vmem:[#allocation4 + $0x8] sm:$0xff]  }
0x1098   :  { %4680 = vpow2.f32 %v3919_v36  ;;  %4259 = vmatprep.subr.bf16.mxu1 %v4999_v0  ;;  %v4570_v36 = vld [vmem:[#allocation4 + $0x10] sm:$0xff]  }
0x109b   :  { %4260 = vmatpush3.bf16.msra.mxu1 %v4569_v32 }
0x109c   :  { %4261 = vmatprep.subr.bf16.mxu1 %v4999_v0 }
0x109f   :  { %4262 = vmatpush3.bf16.msra.mxu1 %v4570_v36 }
0x10a0   :  { %v4679_v35 = vpop.eup %4678  ;;  %4263 = vmatprep.subr.bf16.mxu1 %v4999_v0 }
0x10a1   :  { %853 = vrot.lane.b32.xlu1 %v4679_v35, %s4997_s25 }
0x10a2   :  { %v4681_v37 = vpop.eup %4680 }
0x10a3   :  { %v847_v38 = vadd.f32 1.0, %v4681_v37 }
0x10a5   :  { %4682 = vrcp.f32 %v847_v38  ;;  %v4571_v38 = vld [vmem:[#allocation4 + $0x18] sm:$0xff]  }
0x10a6   :  { %4264 = vmatpush3.bf16.msra.mxu1 %v4571_v38 }
0x10a7   :  { %4265 = vmatprep.subr.bf16.mxu1 %v4999_v0 }
0x10af   :  { %v4683_v39 = vpop.eup %4682 }
0x10b0   :  { %v850_v43 = vmul.f32 %v4683_v39, %v5178_v47 }
0x1113   :  { %v854_v40 = vpop.permute.xlu1 %853 }
0x1114   :  { %v856_v41 = vmul.f32 %v4683_v39, %v854_v40  ;;  %v4573_v40 = vld [vmem:[#allocation4 + $0x28] sm:$0xff]  }
0x1116   :  { %858 = vrot.lane.b32.xlu0 %v856_v41, %s5005_s9 }
0x1188   :  { %v859_v44 = vpop.permute.xlu0 %858 }
0x1189   :  { %v5271_v19 = vadd.f32 %v859_v44, %v850_v43 }
0x118b   :  { %4684 = vtanh.f32 %v5271_v19 }
0x1195   :  { %v4685_v46 = vpop.eup %4684 }
0x1196   :  { %864 = vrot.lane.b32.xlu1 %v4685_v46, %s4997_s25 }
0x1208   :  { %v865_v49 = vpop.permute.xlu1 %864 }
0x1209   :  { %v5277_v50 = vmul.f32 %v4683_v39, %v865_v49  ;;  %v4572_v39 = vld [vmem:[#allocation4 + $0x20] sm:$0xff]  }
0x120a   :  { %4266 = vmatpush3.bf16.msra.mxu1 %v4572_v39 }
0x120b   :  { %v873_v47 = vpack.c.bf16 %v5277_v50, %v5277_v50  ;;  %4267 = vmatprep.subr.bf16.mxu1 %v4999_v0 }
0x120d   :  { %879 = vrot.lane.b32.xlu0 %v873_v47, %s5005_s9 }
0x120e   :  { %4268 = vmatpush3.bf16.msra.mxu1 %v4573_v40 }
0x120f   :  { %4293 = vmatprep.subr.bf16.mxu1 %v4999_v0 }
0x1211   :  { %615 = vrot.lane.b32.xlu0 %v613_v51, %s5007_s15 }
0x127f   :  { %v880_v52 = vpop.permute.xlu0 %879 }
0x1280   :  { %4254 = vmatmul.mubr.msk.bf16.vlgmr.msra.gmra.mrb[12].mxu0 %vm139_vm1, %v880_v52 }
0x1281   :  { %4281 = vmatprep.mubr.msk.bf16.mxu0 %vm5000_vm0, %v4999_v0 }
0x1283   :  { %v616_v2 = vpop.permute.xlu0 %615 }
0x1284   :  { %v5298_v3 = vsub.f32 %v5217_v14, %v616_v2  ;;  %v5311_v14 = vld [vmem:[%s6360_s2] sm:$0xff] }
0x1353   :  { %v930_v53 = vpop.f32.mrb[12].mxu0 }
0x1354   :  { %v931_v1 = vadd.f32 %v930_v53, %v5084_v15  ;;  %v4255_v28 = vpop.f32.mrb[13].mxu0 }
0x1355   :  { %v933_v55 = vpop.f32.mrb[14].mxu0 }
0x1356   :  { %4686 = vtanh.f32 %v931_v1  ;;  %v4256_v57 = vpop.f32.mrb[15].mxu0 }
0x1360   :  { %v4687_v58 = vpop.eup %4686 }
0x1361   :  { %v937_v59 = vmul.f32 %v4687_v58, %v5096_v23 }
0x1363   :  { %943 = vrot.lane.b32.xlu1 %v937_v59, %s5001_s1  ;;  %v938_v61 = vsel %vm139_vm1, %v937_v59, 0.0 }
0x1364   :  { %939 = vadd.xlane.f32.xlu0 %v938_v61 }
0x1367   :  { %621 = vrot.lane.b32.xlu1 %v619_v62, %s5008_s16 }
0x137a   :  { %951 = vrot.lane.b32.xlu0 %v5298_v3, %s5002_s7 }
0x13d5   :  { %v944_v4 = vpop.permute.xlu1 %943 }
0x13d6   :  { %v946_v6 = vsel %vm139_vm1, %v944_v4, 0.0 }
0x13d7   :  { %947 = vadd.xlane.f32.xlu1 %v946_v6 }
0x13d9   :  { %v622_v8 = vpop.permute.xlu1 %621 }
0x13da   :  { %v5304_v10 = vsub.f32 %v5212_v12, %v622_v8 }
0x13e8   :  { %956 = vrot.lane.b32.xlu1 %v5304_v10, %s5003_s8 }
0x13f1   :  { %v940_v11 = vpop.xlane.xlu0 %939 }
0x13f2   :  { %v941_v18 = vadd.f32 %v5311_v14, %v940_v11 }
0x13f5   :  { %v952_v16 = vpop.permute.xlu0 %951 }
0x13f6   :  { %v954_v24 = vmul.f32 %v952_v16, %v941_v18  ;;  %v4575_v16 = vld [vmem:[#allocation4 + $0x38] sm:$0xff]   ;;  %v4576_v18 = vld [vmem:[#allocation4 + $0x40] sm:$0xff]  }
0x1464   :  { %v948_v13 = vpop.xlane.xlu1 %947 }
0x1465   :  { %v949_v17 = vadd.f32 %v5311_v14, %v948_v13  ;;  %v4574_v13 = vld [vmem:[#allocation4 + $0x30] sm:$0xff]  }
0x1466   :  { %4274 = vmatpush3.bf16.msra.mxu0 %v4574_v13 }
0x1467   :  { %4275 = vmatprep.subr.bf16.mxu0 %v4999_v0 }
0x1468   :  { %v957_v21 = vpop.permute.xlu1 %956 }
0x1469   :  { %v959_v25 = vmul.f32 %v957_v21, %v949_v17 }
0x146a   :  { %4276 = vmatpush3.bf16.msra.mxu0 %v4575_v16 }
0x146b   :  { %v960_v12 = vsub.f32 %v954_v24, %v959_v25  ;;  %4277 = vmatprep.subr.bf16.mxu0 %v4999_v0 }
0x146d   :  { %v3923_v26 = vmul.f32 -1.442695, %v960_v12 }
0x146e   :  { %4278 = vmatpush3.bf16.msra.mxu0 %v4576_v18 }
0x146f   :  { %4688 = vpow2.f32 %v3923_v26  ;;  %4279 = vmatprep.subr.bf16.mxu0 %v4999_v0 }
0x1479   :  { %v4689_v27 = vpop.eup %4688 }
0x147a   :  { %v964_v29 = vadd.f32 1.0, %v4689_v27 }
0x147c   :  { %4690 = vrcp.f32 %v964_v29 }
0x1486   :  { %v5315_v30 = vpop.eup %4690 }
0x1487   :  { %970 = vperm.xlu0 %4501, %v5315_v30  }
0x1506   :  { %v971_v35 = vpop.permute.xlu0 %970 }
0x1507   :  { %v973_v37 = vmul.f32 %v971_v35, %v5115_v48 }
0x1509   :  { %975 = vrot.lane.b32.xlu1 %v973_v37, %s5005_s9 }
0x157b   :  { %v976_v41 = vpop.permute.xlu1 %975 }
0x157c   :  { %v978_v43 = vadd.f32 %v5311_v14, %v976_v41 }
0x157e   :  { %v4508_v44 = vpack.i.bf16 %v5259_v20, %v978_v43 }
0x1580   :  { %4509 = vrot.lane.b32.xlu0 %v4508_v44, %s5001_s1 }
0x15f2   :  { %v4510_v22 = vpop.permute.xlu0 %4509 }
0x15f3   :  { %v4512_v46 = vunpack.i.h.bf16 %v4510_v22  ;;  %v4511_v49 = vunpack.i.l.bf16 %v4510_v22 }
0x15f5   :  { %v1008_v47 = vsel %vm139_vm1, %v1000_v45, %v4511_v49  ;;  %v4578_v49 = vld [vmem:[#allocation4 + $0x50] sm:$0xff]  }
0x15f6   :  { %v1009_v51 = vsel %vm79_vm2, %v1008_v47, %v4512_v46  ;;  %v4579_v47 = vld [vmem:[#allocation4 + $0x58] sm:$0xff]  }
0x15f7   :  { %v1010_v52 = vpack.c.bf16 %v1009_v51, %v1009_v51 }
0x15f9   :  { %4270 = vmatmul.mubr.msk.bf16.vlgmr.msra.gmra.mrb[16].mxu1 %vm322_vm3, %v1010_v52 }
0x15fa   :  { %4305 = vmatprep.mubr.msk.bf16.mxu1 %vm5000_vm0, %v4999_v0 }
0x16cc   :  { %v1096_v20 = vpop.f32.mrb[16].mxu1 }
0x16cd   :  { %v1097_v53 = vadd.f32 %v1096_v20, %v5148_v63  ;;  %v4271_v1 = vpop.f32.mrb[17].mxu1 }
0x16ce   :  { %v1099_v28 = vpop.f32.mrb[18].mxu1 }
0x16cf   :  { %4692 = vtanh.f32 %v1097_v53  ;;  %v4272_v55 = vpop.f32.mrb[19].mxu1  ;;  %v3931_v58 = vmul.f32 -1.442695, %v1097_v53  ;;  %v979_v53 = vmul.f32 %v5315_v30, %v5191_v56 }
0x16d1   :  { %4694 = vpow2.f32 %v3931_v58 }
0x16d9   :  { %v4693_v57 = vpop.eup %4692 }
0x16da   :  { %1111 = vrot.lane.b32.xlu1 %v4693_v57, %s4997_s25 }
0x16db   :  { %v4695_v59 = vpop.eup %4694 }
0x16dc   :  { %v1105_v61 = vadd.f32 1.0, %v4695_v59 }
0x16de   :  { %4696 = vrcp.f32 %v1105_v61 }
0x16e8   :  { %v4697_v62 = vpop.eup %4696 }
0x16e9   :  { %v1108_v6 = vmul.f32 %v4697_v62, %v5249_v9  ;;  %v4577_v9 = vld [vmem:[#allocation4 + $0x48] sm:$0xff]  }
0x16ea   :  { %4280 = vmatpush3.bf16.msra.mxu0 %v4577_v9 }
0x16eb   :  { %4285 = vmatprep.subr.bf16.mxu0 %v4999_v0 }
0x174c   :  { %v1112_v2 = vpop.permute.xlu1 %1111 }
0x174d   :  { %v1114_v4 = vmul.f32 %v4697_v62, %v1112_v2  ;;  %v967_v2 = vsub.f32 1.0, %v5315_v30 }
0x174f   :  { %1116 = vrot.lane.b32.xlu0 %v1114_v4, %s5005_s9 }
0x17c1   :  { %v1117_v8 = vpop.permute.xlu0 %1116 }
0x17c2   :  { %v5341_v11 = vadd.f32 %v1117_v8, %v1108_v6  ;;  %v985_v6 = vmul.f32 %v967_v2, %v5201_v5 }
0x17c4   :  { %4698 = vtanh.f32 %v5341_v11 }
0x17ce   :  { %v4699_v17 = vpop.eup %4698 }
0x17cf   :  { %1122 = vrot.lane.b32.xlu1 %v4699_v17, %s4997_s25 }
0x17d3   :  { %1130 = vrot.lane.b32.xlu1 %v5277_v50, %s4997_s25 }
0x1841   :  { %v1123_v21 = vpop.permute.xlu1 %1122 }
0x1842   :  { %v5351_v24 = vmul.f32 %v4697_v62, %v1123_v21 }
0x1844   :  { %1127 = vrot.lane.b32.xlu0 %v5351_v24, %s5005_s9 }
0x1845   :  { %v1131_v25 = vpop.permute.xlu1 %1130 }
0x18b6   :  { %v1128_v12 = vpop.permute.xlu0 %1127 }
0x18b7   :  { %v1133_v26 = vsel %vm139_vm1, %v1128_v12, %v1131_v25 }
0x18b8   :  { %v1134_v27 = vpack.c.bf16 %v1133_v26, %v1133_v26 }
0x18ba   :  { %4282 = vmatmul.mubr.msk.bf16.vlgmr.msra.gmra.mrb[16].mxu0 %vm79_vm2, %v1134_v27 }
0x18bb   :  { %4289 = vmatprep.mubr.msk.bf16.mxu0 %vm5000_vm0, %v4999_v0  ;;  %4286 = vmatpush3.bf16.msra.mxu0 %v4578_v49 }
0x18bc   :  { %4287 = vmatprep.subr.bf16.mxu0 %v4999_v0 }
0x18bf   :  { %4288 = vmatpush3.bf16.msra.mxu0 %v4579_v47 }
0x18c0   :  { %4309 = vmatprep.subr.bf16.mxu0 %v4999_v0 }
0x198d   :  { %v1204_v29 = vpop.f32.mrb[16].mxu0 }
0x198e   :  { %v1205_v31 = vadd.f32 %v1204_v29, %v5172_v33  ;;  %v4283_v32 = vpop.f32.mrb[17].mxu0 }
0x198f   :  { %v1207_v35 = vpop.f32.mrb[18].mxu0 }
0x1990   :  { %4700 = vtanh.f32 %v1205_v31  ;;  %v4284_v36 = vpop.f32.mrb[19].mxu0  ;;  %v3937_v38 = vmul.f32 -1.442695, %v1205_v31 }
0x1992   :  { %4702 = vpow2.f32 %v3937_v38  ;;  %v4580_v38 = vld [vmem:[#allocation4] sm:$0xff]  }
0x1993   :  { %4294 = vmatpush3.bf16.msra.mxu1 %v4580_v38 }
0x1994   :  { %4295 = vmatprep.subr.bf16.mxu1 %v4999_v0 }
0x199a   :  { %v4701_v37 = vpop.eup %4700 }
0x199b   :  { %1219 = vrot.lane.b32.xlu0 %v4701_v37, %s4997_s25 }
0x199c   :  { %v4703_v39 = vpop.eup %4702 }
0x199d   :  { %v1213_v40 = vadd.f32 1.0, %v4703_v39  ;;  %v4581_v39 = vld [vmem:[#allocation4 + $0x8] sm:$0xff]  }
0x199e   :  { %4296 = vmatpush3.bf16.msra.mxu1 %v4581_v39 }
0x199f   :  { %4704 = vrcp.f32 %v1213_v40  ;;  %4297 = vmatprep.subr.bf16.mxu1 %v4999_v0 }
0x19a9   :  { %v4705_v41 = vpop.eup %4704 }
0x19aa   :  { %v1216_v45 = vmul.f32 %v4705_v41, %v5271_v19 }
0x1a0d   :  { %v1220_v43 = vpop.permute.xlu0 %1219 }
0x1a0e   :  { %v1222_v44 = vmul.f32 %v4705_v41, %v1220_v43 }
0x1a10   :  { %1224 = vrot.lane.b32.xlu1 %v1222_v44, %s5005_s9  ;;  %v4583_v44 = vld [vmem:[#allocation4 + $0x18] sm:$0xff]  }
0x1a82   :  { %v1225_v22 = vpop.permute.xlu1 %1224 }
0x1a83   :  { %v5363_v46 = vadd.f32 %v1225_v22, %v1216_v45  ;;  %v4584_v45 = vld [vmem:[#allocation4 + $0x20] sm:$0xff]   ;;  %v4585_v22 = vld [vmem:[#allocation4 + $0x28] sm:$0xff]  }
0x1a85   :  { %4706 = vtanh.f32 %v5363_v46 }
0x1a8f   :  { %v4707_v51 = vpop.eup %4706 }
0x1a90   :  { %1230 = vrot.lane.b32.xlu0 %v4707_v51, %s4997_s25 }
0x1b02   :  { %v1231_v52 = vpop.permute.xlu0 %1230 }
0x1b03   :  { %v5369_v20 = vmul.f32 %v4705_v41, %v1231_v52  ;;  %v4582_v41 = vld [vmem:[#allocation4 + $0x10] sm:$0xff]   ;;  %v1366_v52 = vld [vmem:[%s6358_s0 + $0x18] sm:$0xff] }
0x1b04   :  { %4298 = vmatpush3.bf16.msra.mxu1 %v4582_v41 }
0x1b05   :  { %v1239_v19 = vpack.c.bf16 %v5369_v20, %v5369_v20  ;;  %4299 = vmatprep.subr.bf16.mxu1 %v4999_v0 }
0x1b07   :  { %1245 = vrot.lane.b32.xlu1 %v1239_v19, %s5005_s9 }
0x1b08   :  { %4300 = vmatpush3.bf16.msra.mxu1 %v4583_v44 }
0x1b09   :  { %4301 = vmatprep.subr.bf16.mxu1 %v4999_v0 }
0x1b0b   :  { %981 = vrot.lane.b32.xlu1 %v979_v53, %s5007_s15 }
0x1b0c   :  { %4302 = vmatpush3.bf16.msra.mxu1 %v4584_v45 }
0x1b0d   :  { %4303 = vmatprep.subr.bf16.mxu1 %v4999_v0 }
0x1b10   :  { %4304 = vmatpush3.bf16.msra.mxu1 %v4585_v22 }
0x1b11   :  { %4329 = vmatprep.subr.bf16.mxu1 %v4999_v0 }
0x1b79   :  { %v1246_v1 = vpop.permute.xlu1 %1245 }
0x1b7a   :  { %4290 = vmatmul.mubr.msk.bf16.vlgmr.msra.gmra.mrb[20].mxu0 %vm139_vm1, %v1246_v1 }
0x1b7b   :  { %4317 = vmatprep.mubr.msk.bf16.mxu0 %vm5000_vm0, %v4999_v0 }
0x1b7d   :  { %v982_v17 = vpop.permute.xlu1 %981 }
0x1b7e   :  { %v5396_v9 = vsub.f32 %v5298_v3, %v982_v17 }
0x1c4d   :  { %v1296_v28 = vpop.f32.mrb[20].mxu0 }
0x1c4e   :  { %v1297_v55 = vadd.f32 %v1296_v28, %v5084_v15  ;;  %v4291_v57 = vpop.f32.mrb[21].mxu0 }
0x1c4f   :  { %v1299_v58 = vpop.f32.mrb[22].mxu0 }
0x1c50   :  { %4708 = vtanh.f32 %v1297_v55  ;;  %v4292_v59 = vpop.f32.mrb[23].mxu0 }
0x1c5a   :  { %v4709_v61 = vpop.eup %4708 }
0x1c5b   :  { %v1303_v62 = vmul.f32 %v4709_v61, %v5096_v23 }
0x1c5d   :  { %1309 = vrot.lane.b32.xlu0 %v1303_v62, %s5001_s1  ;;  %v1304_v4 = vsel %vm139_vm1, %v1303_v62, 0.0 }
0x1c5e   :  { %1305 = vadd.xlane.f32.xlu1 %v1304_v4 }
0x1c61   :  { %987 = vrot.lane.b32.xlu0 %v985_v6, %s5008_s16 }
0x1ccf   :  { %v1310_v8 = vpop.permute.xlu0 %1309 }
0x1cd0   :  { %v1312_v13 = vsel %vm139_vm1, %v1310_v8, 0.0 }
0x1cd1   :  { %1313 = vadd.xlane.f32.xlu0 %v1312_v13 }
0x1cd3   :  { %v988_v16 = vpop.permute.xlu0 %987 }
0x1cd4   :  { %v5391_v18 = vsub.f32 %v5304_v10, %v988_v16 }
0x1cd6   :  { %1322 = vrot.lane.b32.xlu1 %v5391_v18, %s5003_s8 }
0x1ce7   :  { %1317 = vrot.lane.b32.xlu0 %v5396_v9, %s5002_s7 }
0x1ceb   :  { %v1306_v21 = vpop.xlane.xlu1 %1305 }
0x1cec   :  { %v1307_v26 = vadd.f32 %v5311_v14, %v1306_v21 }
0x1d48   :  { %v1323_v27 = vpop.permute.xlu1 %1322 }
0x1d5e   :  { %v1314_v25 = vpop.xlane.xlu0 %1313 }
0x1d5f   :  { %v1315_v12 = vadd.f32 %v5311_v14, %v1314_v25 }
0x1d61   :  { %v1325_v10 = vmul.f32 %v1323_v27, %v1315_v12  ;;  %v4586_v27 = vld [vmem:[#allocation4 + $0x30] sm:$0xff]  }
0x1d62   :  { %v1318_v29 = vpop.permute.xlu0 %1317  ;;  %4310 = vmatpush3.bf16.msra.mxu0 %v4586_v27 }
0x1d63   :  { %v1320_v31 = vmul.f32 %v1318_v29, %v1307_v26  ;;  %v4587_v29 = vld [vmem:[#allocation4 + $0x38] sm:$0xff]   ;;  %4311 = vmatprep.subr.bf16.mxu0 %v4999_v0 }
0x1d65   :  { %v1326_v32 = vsub.f32 %v1320_v31, %v1325_v10  ;;  %v4588_v10 = vld [vmem:[#allocation4 + $0x40] sm:$0xff]  }
0x1d66   :  { %4312 = vmatpush3.bf16.msra.mxu0 %v4587_v29 }
0x1d67   :  { %v3941_v35 = vmul.f32 -1.442695, %v1326_v32  ;;  %4313 = vmatprep.subr.bf16.mxu0 %v4999_v0 }
0x1d69   :  { %4710 = vpow2.f32 %v3941_v35 }
0x1d6a   :  { %4314 = vmatpush3.bf16.msra.mxu0 %v4588_v10 }
0x1d6b   :  { %4315 = vmatprep.subr.bf16.mxu0 %v4999_v0 }
0x1d73   :  { %v4711_v36 = vpop.eup %4710 }
0x1d74   :  { %v1330_v37 = vadd.f32 1.0, %v4711_v36 }
0x1d76   :  { %4712 = vrcp.f32 %v1330_v37 }
0x1d80   :  { %v5402_v3 = vpop.eup %4712 }
0x1d81   :  { %1336 = vperm.xlu1 %4502, %v5402_v3  }
0x1e00   :  { %v1337_v40 = vpop.permute.xlu1 %1336 }
0x1e01   :  { %v1339_v43 = vmul.f32 %v1337_v40, %v5115_v48 }
0x1e03   :  { %1341 = vrot.lane.b32.xlu0 %v1339_v43, %s5005_s9 }
0x1e75   :  { %v1342_v49 = vpop.permute.xlu0 %1341 }
0x1e76   :  { %v1344_v47 = vadd.f32 %v5311_v14, %v1342_v49 }
0x1e78   :  { %v4513_v51 = vpack.i.bf16 %v5351_v24, %v1344_v47 }
0x1e7a   :  { %4514 = vrot.lane.b32.xlu1 %v4513_v51, %s5001_s1 }
0x1eec   :  { %v4515_v19 = vpop.permute.xlu1 %4514 }
0x1eed   :  { %v4517_v53 = vunpack.i.h.bf16 %v4515_v19  ;;  %v4516_v1 = vunpack.i.l.bf16 %v4515_v19 }
0x1eef   :  { %v1374_v28 = vsel %vm139_vm1, %v1366_v52, %v4516_v1 }
0x1ef0   :  { %v1375_v55 = vsel %vm79_vm2, %v1374_v28, %v4517_v53 }
0x1ef1   :  { %v1376_v57 = vpack.c.bf16 %v1375_v55, %v1375_v55 }
0x1ef3   :  { %4306 = vmatmul.mubr.msk.bf16.vlgmr.msra.gmra.mrb[20].mxu1 %vm322_vm3, %v1376_v57  ;;  %v4590_v57 = vld [vmem:[#allocation4 + $0x50] sm:$0xff]  }
0x1ef4   :  { %4341 = vmatprep.mubr.msk.bf16.mxu1 %vm5000_vm0, %v4999_v0 }
0x1fc6   :  { %v1462_v24 = vpop.f32.mrb[20].mxu1 }
0x1fc7   :  { %v1463_v58 = vadd.f32 %v1462_v24, %v5148_v63  ;;  %v4307_v59 = vpop.f32.mrb[21].mxu1  ;;  %v4591_v24 = vld [vmem:[#allocation4 + $0x58] sm:$0xff]  }
0x1fc8   :  { %v1465_v61 = vpop.f32.mrb[22].mxu1 }
0x1fc9   :  { %4714 = vtanh.f32 %v1463_v58  ;;  %v4308_v62 = vpop.f32.mrb[23].mxu1  ;;  %v3949_v6 = vmul.f32 -1.442695, %v1463_v58 }
0x1fca   :  { %v1345_v62 = vmul.f32 %v5402_v3, %v5191_v56 }
0x1fcb   :  { %4716 = vpow2.f32 %v3949_v6 }
0x1fd3   :  { %v4715_v4 = vpop.eup %4714 }
0x1fd4   :  { %1477 = vrot.lane.b32.xlu0 %v4715_v4, %s4997_s25 }
0x1fd5   :  { %v4717_v8 = vpop.eup %4716 }
0x1fd6   :  { %v1471_v13 = vadd.f32 1.0, %v4717_v8 }
0x1fd8   :  { %4718 = vrcp.f32 %v1471_v13 }
0x1fe2   :  { %v4719_v16 = vpop.eup %4718 }
0x1fe3   :  { %v1474_v25 = vmul.f32 %v4719_v16, %v5341_v11  ;;  %v4589_v11 = vld [vmem:[#allocation4 + $0x48] sm:$0xff]  }
0x1fe4   :  { %4316 = vmatpush3.bf16.msra.mxu0 %v4589_v11 }
0x1fe5   :  { %4321 = vmatprep.subr.bf16.mxu0 %v4999_v0 }
0x2046   :  { %v1478_v17 = vpop.permute.xlu0 %1477 }
0x2047   :  { %v1480_v21 = vmul.f32 %v4719_v16, %v1478_v17 }
0x2049   :  { %1482 = vrot.lane.b32.xlu1 %v1480_v21, %s5005_s9 }
0x20bb   :  { %v1483_v12 = vpop.permute.xlu1 %1482 }
0x20bc   :  { %v5428_v26 = vadd.f32 %v1483_v12, %v1474_v25  ;;  %v1333_v12 = vsub.f32 1.0, %v5402_v3 }
0x20be   :  { %4720 = vtanh.f32 %v5428_v26  ;;  %v1351_v29 = vmul.f32 %v1333_v12, %v5201_v5 }
0x20c8   :  { %v4721_v31 = vpop.eup %4720 }
0x20c9   :  { %1488 = vrot.lane.b32.xlu0 %v4721_v31, %s4997_s25 }
0x20cd   :  { %1496 = vrot.lane.b32.xlu0 %v5369_v20, %s4997_s25 }
0x213b   :  { %v1489_v32 = vpop.permute.xlu0 %1488 }
0x213c   :  { %v5438_v35 = vmul.f32 %v4719_v16, %v1489_v32 }
0x213e   :  { %1493 = vrot.lane.b32.xlu1 %v5438_v35, %s5005_s9 }
0x213f   :  { %v1497_v36 = vpop.permute.xlu0 %1496 }
0x21b0   :  { %v1494_v37 = vpop.permute.xlu1 %1493 }
0x21b1   :  { %v1499_v38 = vsel %vm139_vm1, %v1494_v37, %v1497_v36 }
0x21b2   :  { %v1500_v39 = vpack.c.bf16 %v1499_v38, %v1499_v38 }
0x21b4   :  { %4318 = vmatmul.mubr.msk.bf16.vlgmr.msra.gmra.mrb[24].mxu0 %vm79_vm2, %v1500_v39 }
0x21b5   :  { %4325 = vmatprep.mubr.msk.bf16.mxu0 %vm5000_vm0, %v4999_v0  ;;  %4322 = vmatpush3.bf16.msra.mxu0 %v4590_v57  ;;  %v4595_v57 = vld [vmem:[#allocation4 + $0x18] sm:$0xff]  }
0x21b6   :  { %4323 = vmatprep.subr.bf16.mxu0 %v4999_v0 }
0x21b9   :  { %4324 = vmatpush3.bf16.msra.mxu0 %v4591_v24  ;;  %v4596_v24 = vld [vmem:[#allocation4 + $0x20] sm:$0xff]  }
0x21ba   :  { %4345 = vmatprep.subr.bf16.mxu0 %v4999_v0 }
0x2287   :  { %v1570_v40 = vpop.f32.mrb[24].mxu0 }
0x2288   :  { %v1571_v41 = vadd.f32 %v1570_v40, %v5172_v33  ;;  %v4319_v43 = vpop.f32.mrb[25].mxu0 }
0x2289   :  { %v1573_v44 = vpop.f32.mrb[26].mxu0 }
0x228a   :  { %4722 = vtanh.f32 %v1571_v41  ;;  %v4320_v45 = vpop.f32.mrb[27].mxu0  ;;  %v3955_v49 = vmul.f32 -1.442695, %v1571_v41 }
0x228c   :  { %4724 = vpow2.f32 %v3955_v49 }
0x2294   :  { %v4723_v22 = vpop.eup %4722 }
0x2295   :  { %1585 = vrot.lane.b32.xlu1 %v4723_v22, %s4997_s25 }
0x2296   :  { %v4725_v47 = vpop.eup %4724 }
0x2297   :  { %v1579_v51 = vadd.f32 1.0, %v4725_v47 }
0x2299   :  { %4726 = vrcp.f32 %v1579_v51 }
0x22a3   :  { %v4727_v52 = vpop.eup %4726 }
0x22a4   :  { %v1582_v1 = vmul.f32 %v4727_v52, %v5363_v46 }
0x2307   :  { %v1586_v19 = vpop.permute.xlu1 %1585 }
0x2308   :  { %v1588_v53 = vmul.f32 %v4727_v52, %v1586_v19  ;;  %v4593_v19 = vld [vmem:[#allocation4 + $0x8] sm:$0xff]  }
0x230a   :  { %1590 = vrot.lane.b32.xlu0 %v1588_v53, %s5005_s9 }
0x237c   :  { %v1591_v28 = vpop.permute.xlu0 %1590 }
0x237d   :  { %v5450_v55 = vadd.f32 %v1591_v28, %v1582_v1  ;;  %v4594_v1 = vld [vmem:[#allocation4 + $0x10] sm:$0xff]  }
0x237f   :  { %4728 = vtanh.f32 %v5450_v55 }
0x2389   :  { %v4729_v58 = vpop.eup %4728 }
0x238a   :  { %1596 = vrot.lane.b32.xlu1 %v4729_v58, %s4997_s25  ;;  %v4597_v58 = vld [vmem:[#allocation4 + $0x28] sm:$0xff]  }
0x23fc   :  { %v1597_v59 = vpop.permute.xlu1 %1596 }
0x23fd   :  { %v5456_v61 = vmul.f32 %v4727_v52, %v1597_v59  ;;  %v4592_v52 = vld [vmem:[#allocation4] sm:$0xff]  }
0x23fe   :  { %4330 = vmatpush3.bf16.msra.mxu1 %v4592_v52 }
0x23ff   :  { %v1605_v46 = vpack.c.bf16 %v5456_v61, %v5456_v61  ;;  %4331 = vmatprep.subr.bf16.mxu1 %v4999_v0 }
0x2401   :  { %1611 = vrot.lane.b32.xlu0 %v1605_v46, %s5005_s9 }
0x2402   :  { %4332 = vmatpush3.bf16.msra.mxu1 %v4593_v19 }
0x2403   :  { %4333 = vmatprep.subr.bf16.mxu1 %v4999_v0 }
0x2405   :  { %1347 = vrot.lane.b32.xlu0 %v1345_v62, %s5007_s15 }
0x2406   :  { %4334 = vmatpush3.bf16.msra.mxu1 %v4594_v1 }
0x2407   :  { %4335 = vmatprep.subr.bf16.mxu1 %v4999_v0 }
0x240a   :  { %4336 = vmatpush3.bf16.msra.mxu1 %v4595_v57 }
0x240b   :  { %4337 = vmatprep.subr.bf16.mxu1 %v4999_v0 }
0x240e   :  { %4338 = vmatpush3.bf16.msra.mxu1 %v4596_v24 }
0x240f   :  { %4339 = vmatprep.subr.bf16.mxu1 %v4999_v0 }
0x2412   :  { %4340 = vmatpush3.bf16.msra.mxu1 %v4597_v58 }
0x2413   :  { %4365 = vmatprep.subr.bf16.mxu1 %v4999_v0 }
0x2473   :  { %v1612_v4 = vpop.permute.xlu0 %1611 }
0x2474   :  { %4326 = vmatmul.mubr.msk.bf16.vlgmr.msra.gmra.mrb[28].mxu0 %vm139_vm1, %v1612_v4  ;;  %v1732_v4 = vld [vmem:[%s6358_s0 + $0x20] sm:$0xff] }
0x2475   :  { %4353 = vmatprep.mubr.msk.bf16.mxu0 %vm5000_vm0, %v4999_v0 }
0x2477   :  { %v1348_v10 = vpop.permute.xlu0 %1347 }
0x2478   :  { %v5477_v31 = vsub.f32 %v5396_v9, %v1348_v10 }
0x2547   :  { %v1662_v6 = vpop.f32.mrb[28].mxu0 }
0x2548   :  { %v1663_v8 = vadd.f32 %v1662_v6, %v5084_v15  ;;  %v4327_v13 = vpop.f32.mrb[29].mxu0 }
0x2549   :  { %v1665_v16 = vpop.f32.mrb[30].mxu0 }
0x254a   :  { %4730 = vtanh.f32 %v1663_v8  ;;  %v4328_v17 = vpop.f32.mrb[31].mxu0 }
0x2554   :  { %v4731_v21 = vpop.eup %4730 }
0x2555   :  { %v1669_v25 = vmul.f32 %v4731_v21, %v5096_v23 }
0x2557   :  { %1675 = vrot.lane.b32.xlu1 %v1669_v25, %s5001_s1  ;;  %v1670_v27 = vsel %vm139_vm1, %v1669_v25, 0.0 }
0x2558   :  { %1671 = vadd.xlane.f32.xlu0 %v1670_v27 }
0x255b   :  { %1353 = vrot.lane.b32.xlu1 %v1351_v29, %s5008_s16 }
0x256e   :  { %1683 = vrot.lane.b32.xlu0 %v5477_v31, %s5002_s7 }
0x25c9   :  { %v1676_v11 = vpop.permute.xlu1 %1675 }
0x25ca   :  { %v1678_v32 = vsel %vm139_vm1, %v1676_v11, 0.0 }
0x25cb   :  { %1679 = vadd.xlane.f32.xlu1 %v1678_v32 }
0x25cd   :  { %v1354_v36 = vpop.permute.xlu1 %1353 }
0x25ce   :  { %v5483_v37 = vsub.f32 %v5391_v18, %v1354_v36 }
0x25dc   :  { %1688 = vrot.lane.b32.xlu1 %v5483_v37, %s5003_s8 }
0x25e5   :  { %v1672_v38 = vpop.xlane.xlu0 %1671 }
0x25e6   :  { %v1673_v9 = vadd.f32 %v5311_v14, %v1672_v38 }
0x25e9   :  { %v1684_v40 = vpop.permute.xlu0 %1683 }
0x25ea   :  { %v1686_v44 = vmul.f32 %v1684_v40, %v1673_v9 }
0x2658   :  { %v1680_v39 = vpop.xlane.xlu1 %1679 }
0x2659   :  { %v1681_v41 = vadd.f32 %v5311_v14, %v1680_v39 }
0x265c   :  { %v1689_v43 = vpop.permute.xlu1 %1688 }
0x265d   :  { %v1691_v45 = vmul.f32 %v1689_v43, %v1681_v41 }
0x265f   :  { %v1692_v22 = vsub.f32 %v1686_v44, %v1691_v45  ;;  %v4598_v45 = vld [vmem:[#allocation4 + $0x30] sm:$0xff]  }
0x2660   :  { %4346 = vmatpush3.bf16.msra.mxu0 %v4598_v45 }
0x2661   :  { %v3959_v49 = vmul.f32 -1.442695, %v1692_v22  ;;  %v4599_v22 = vld [vmem:[#allocation4 + $0x38] sm:$0xff]   ;;  %4347 = vmatprep.subr.bf16.mxu0 %v4999_v0 }
0x2663   :  { %4732 = vpow2.f32 %v3959_v49  ;;  %v4600_v49 = vld [vmem:[#allocation4 + $0x40] sm:$0xff]  }
0x2664   :  { %4348 = vmatpush3.bf16.msra.mxu0 %v4599_v22 }
0x2665   :  { %4349 = vmatprep.subr.bf16.mxu0 %v4999_v0 }
0x2668   :  { %4350 = vmatpush3.bf16.msra.mxu0 %v4600_v49 }
0x2669   :  { %4351 = vmatprep.subr.bf16.mxu0 %v4999_v0 }
0x266d   :  { %v4733_v47 = vpop.eup %4732 }
0x266e   :  { %v1696_v51 = vadd.f32 1.0, %v4733_v47 }
0x2670   :  { %4734 = vrcp.f32 %v1696_v51 }
0x267a   :  { %v5489_v18 = vpop.eup %4734 }
0x267b   :  { %1702 = vperm.xlu0 %4501, %v5489_v18   ;;  %v1699_v49 = vsub.f32 1.0, %v5489_v18 }
0x26fa   :  { %v1703_v53 = vpop.permute.xlu0 %1702 }
0x26fb   :  { %v1705_v28 = vmul.f32 %v1703_v53, %v5115_v48 }
0x26fd   :  { %1707 = vrot.lane.b32.xlu1 %v1705_v28, %s5005_s9 }
0x276f   :  { %v1708_v59 = vpop.permute.xlu1 %1707 }
0x2770   :  { %v1710_v46 = vadd.f32 %v5311_v14, %v1708_v59 }
0x2772   :  { %v4518_v62 = vpack.i.bf16 %v5438_v35, %v1710_v46 }
0x2774   :  { %4519 = vrot.lane.b32.xlu0 %v4518_v62, %s5001_s1 }
0x27e6   :  { %v4520_v6 = vpop.permute.xlu0 %4519 }
0x27e7   :  { %v4522_v8 = vunpack.i.h.bf16 %v4520_v6  ;;  %v4521_v13 = vunpack.i.l.bf16 %v4520_v6 }
0x27e9   :  { %v1740_v16 = vsel %vm139_vm1, %v1732_v4, %v4521_v13 }
0x27ea   :  { %v1741_v17 = vsel %vm79_vm2, %v1740_v16, %v4522_v8 }
0x27eb   :  { %v1742_v21 = vpack.c.bf16 %v1741_v17, %v1741_v17 }
0x27ed   :  { %4342 = vmatmul.mubr.msk.bf16.vlgmr.msra.gmra.mrb[24].mxu1 %vm322_vm3, %v1742_v21 }
0x27ee   :  { %4377 = vmatprep.mubr.msk.bf16.mxu1 %vm5000_vm0, %v4999_v0 }
0x28c0   :  { %v1828_v35 = vpop.f32.mrb[24].mxu1 }
0x28c1   :  { %v1829_v25 = vadd.f32 %v1828_v35, %v5148_v63  ;;  %v4343_v27 = vpop.f32.mrb[25].mxu1 }
0x28c2   :  { %v1831_v29 = vpop.f32.mrb[26].mxu1  ;;  %v4602_v27 = vld [vmem:[#allocation4 + $0x50] sm:$0xff]  }
0x28c3   :  { %4736 = vtanh.f32 %v1829_v25  ;;  %v4344_v10 = vpop.f32.mrb[27].mxu1  ;;  %v3967_v32 = vmul.f32 -1.442695, %v1829_v25  ;;  %v4603_v29 = vld [vmem:[#allocation4 + $0x58] sm:$0xff]  }
0x28c5   :  { %4738 = vpow2.f32 %v3967_v32 }
0x28cd   :  { %v4737_v11 = vpop.eup %4736 }
0x28ce   :  { %1843 = vrot.lane.b32.xlu1 %v4737_v11, %s4997_s25 }
0x28cf   :  { %v4739_v36 = vpop.eup %4738 }
0x28d0   :  { %v1837_v38 = vadd.f32 1.0, %v4739_v36  ;;  %v1711_v36 = vmul.f32 %v5489_v18, %v5191_v56 }
0x28d2   :  { %4740 = vrcp.f32 %v1837_v38 }
0x28dc   :  { %v4741_v39 = vpop.eup %4740 }
0x28dd   :  { %v1840_v41 = vmul.f32 %v4741_v39, %v5428_v26  ;;  %v4601_v26 = vld [vmem:[#allocation4 + $0x48] sm:$0xff]  }
0x28de   :  { %4352 = vmatpush3.bf16.msra.mxu0 %v4601_v26  ;;  %v1717_v26 = vmul.f32 %v1699_v49, %v5201_v5 }
0x28df   :  { %4357 = vmatprep.subr.bf16.mxu0 %v4999_v0 }
0x2940   :  { %v1844_v40 = vpop.permute.xlu1 %1843 }
0x2941   :  { %v1846_v9 = vmul.f32 %v4741_v39, %v1844_v40 }
0x2943   :  { %1848 = vrot.lane.b32.xlu0 %v1846_v9, %s5005_s9 }
0x29b5   :  { %v1849_v43 = vpop.permute.xlu0 %1848 }
0x29b6   :  { %v5515_v44 = vadd.f32 %v1849_v43, %v1840_v41 }
0x29b8   :  { %4742 = vtanh.f32 %v5515_v44 }
0x29c2   :  { %v4743_v47 = vpop.eup %4742 }
0x29c3   :  { %1854 = vrot.lane.b32.xlu1 %v4743_v47, %s4997_s25 }
0x29c7   :  { %1862 = vrot.lane.b32.xlu1 %v5456_v61, %s4997_s25 }
0x2a35   :  { %v1855_v51 = vpop.permute.xlu1 %1854 }
0x2a36   :  { %v5525_v52 = vmul.f32 %v4741_v39, %v1855_v51 }
0x2a38   :  { %1859 = vrot.lane.b32.xlu0 %v5525_v52, %s5005_s9 }
0x2a39   :  { %v1863_v19 = vpop.permute.xlu1 %1862 }
0x2aaa   :  { %v1860_v53 = vpop.permute.xlu0 %1859 }
0x2aab   :  { %v1865_v1 = vsel %vm139_vm1, %v1860_v53, %v1863_v19 }
0x2aac   :  { %v1866_v28 = vpack.c.bf16 %v1865_v1, %v1865_v1 }
0x2aae   :  { %4354 = vmatmul.mubr.msk.bf16.vlgmr.msra.gmra.mrb[32].mxu0 %vm79_vm2, %v1866_v28 }
0x2aaf   :  { %4361 = vmatprep.mubr.msk.bf16.mxu0 %vm5000_vm0, %v4999_v0  ;;  %4358 = vmatpush3.bf16.msra.mxu0 %v4602_v27 }
0x2ab0   :  { %4359 = vmatprep.subr.bf16.mxu0 %v4999_v0 }
0x2ab3   :  { %4360 = vmatpush3.bf16.msra.mxu0 %v4603_v29  ;;  %v4606_v29 = vld [vmem:[#allocation4 + $0x10] sm:$0xff]  }
0x2ab4   :  { %4381 = vmatprep.subr.bf16.mxu0 %v4999_v0 }
0x2b81   :  { %v1936_v57 = vpop.f32.mrb[32].mxu0 }
0x2b82   :  { %v1937_v24 = vadd.f32 %v1936_v57, %v5172_v33  ;;  %v4355_v58 = vpop.f32.mrb[33].mxu0 }
0x2b83   :  { %v1939_v59 = vpop.f32.mrb[34].mxu0 }
0x2b84   :  { %4744 = vtanh.f32 %v1937_v24  ;;  %v4356_v46 = vpop.f32.mrb[35].mxu0  ;;  %v3973_v4 = vmul.f32 -1.442695, %v1937_v24 }
0x2b86   :  { %4746 = vpow2.f32 %v3973_v4 }
0x2b8e   :  { %v4745_v62 = vpop.eup %4744 }
0x2b8f   :  { %1951 = vrot.lane.b32.xlu0 %v4745_v62, %s4997_s25 }
0x2b90   :  { %v4747_v6 = vpop.eup %4746 }
0x2b91   :  { %v1945_v8 = vadd.f32 1.0, %v4747_v6 }
0x2b93   :  { %4748 = vrcp.f32 %v1945_v8 }
0x2b9d   :  { %v4749_v13 = vpop.eup %4748 }
0x2b9e   :  { %v1948_v21 = vmul.f32 %v4749_v13, %v5450_v55 }
0x2c01   :  { %v1952_v16 = vpop.permute.xlu0 %1951 }
0x2c02   :  { %v1954_v17 = vmul.f32 %v4749_v13, %v1952_v16 }
0x2c04   :  { %1956 = vrot.lane.b32.xlu1 %v1954_v17, %s5005_s9 }
0x2c76   :  { %v1957_v35 = vpop.permute.xlu1 %1956 }
0x2c77   :  { %v5537_v25 = vadd.f32 %v1957_v35, %v1948_v21  ;;  %v4604_v21 = vld [vmem:[#allocation4] sm:$0xff]   ;;  %v4605_v35 = vld [vmem:[#allocation4 + $0x8] sm:$0xff]  }
0x2c78   :  { %4366 = vmatpush3.bf16.msra.mxu1 %v4604_v21 }
0x2c79   :  { %4750 = vtanh.f32 %v5537_v25  ;;  %4367 = vmatprep.subr.bf16.mxu1 %v4999_v0 }
0x2c7c   :  { %4368 = vmatpush3.bf16.msra.mxu1 %v4605_v35 }
0x2c7d   :  { %4369 = vmatprep.subr.bf16.mxu1 %v4999_v0 }
0x2c80   :  { %4370 = vmatpush3.bf16.msra.mxu1 %v4606_v29 }
0x2c81   :  { %4371 = vmatprep.subr.bf16.mxu1 %v4999_v0 }
0x2c83   :  { %v4751_v10 = vpop.eup %4750 }
0x2c84   :  { %1962 = vrot.lane.b32.xlu0 %v4751_v10, %s4997_s25 }
0x2cf6   :  { %v1963_v11 = vpop.permute.xlu0 %1962 }
0x2cf7   :  { %v5543_v32 = vmul.f32 %v4749_v13, %v1963_v11  ;;  %v4607_v11 = vld [vmem:[#allocation4 + $0x18] sm:$0xff]  }
0x2cf8   :  { %4372 = vmatpush3.bf16.msra.mxu1 %v4607_v11 }
0x2cf9   :  { %v1971_v55 = vpack.c.bf16 %v5543_v32, %v5543_v32  ;;  %4373 = vmatprep.subr.bf16.mxu1 %v4999_v0 }
0x2cfb   :  { %1977 = vrot.lane.b32.xlu1 %v1971_v55, %s5005_s9  ;;  %v4608_v55 = vld [vmem:[#allocation4 + $0x20] sm:$0xff]  }
0x2cfc   :  { %4374 = vmatpush3.bf16.msra.mxu1 %v4608_v55 }
0x2cfd   :  { %4375 = vmatprep.subr.bf16.mxu1 %v4999_v0 }
0x2cff   :  { %1713 = vrot.lane.b32.xlu1 %v1711_v36, %s5007_s15  ;;  %v4609_v36 = vld [vmem:[#allocation4 + $0x28] sm:$0xff]  }
0x2d00   :  { %4376 = vmatpush3.bf16.msra.mxu1 %v4609_v36 }
0x2d01   :  { %4401 = vmatprep.subr.bf16.mxu1 %v4999_v0 }
0x2d6d   :  { %v1978_v38 = vpop.permute.xlu1 %1977 }
0x2d6e   :  { %4362 = vmatmul.mubr.msk.bf16.vlgmr.msra.gmra.mrb[36].mxu0 %vm139_vm1, %v1978_v38 }
0x2d6f   :  { %4389 = vmatprep.mubr.msk.bf16.mxu0 %vm5000_vm0, %v4999_v0 }
0x2d71   :  { %v1714_v28 = vpop.permute.xlu1 %1713 }
0x2d72   :  { %v5570_v57 = vsub.f32 %v5477_v31, %v1714_v28 }
0x2e41   :  { %v2028_v39 = vpop.f32.mrb[36].mxu0 }
0x2e42   :  { %v2029_v40 = vadd.f32 %v2028_v39, %v5084_v15  ;;  %v4363_v9 = vpop.f32.mrb[37].mxu0 }
0x2e43   :  { %v2031_v41 = vpop.f32.mrb[38].mxu0  ;;  %v2098_v9 = vld [vmem:[%s6358_s0 + $0x28] sm:$0xff] }
0x2e44   :  { %4752 = vtanh.f32 %v2029_v40  ;;  %v4364_v43 = vpop.f32.mrb[39].mxu0 }
0x2e4e   :  { %v4753_v45 = vpop.eup %4752 }
0x2e4f   :  { %v2035_v22 = vmul.f32 %v4753_v45, %v5096_v23 }
0x2e51   :  { %2041 = vrot.lane.b32.xlu0 %v2035_v22, %s5001_s1  ;;  %v2036_v47 = vsel %vm139_vm1, %v2035_v22, 0.0 }
0x2e52   :  { %2037 = vadd.xlane.f32.xlu1 %v2036_v47 }
0x2e55   :  { %1719 = vrot.lane.b32.xlu0 %v1717_v26, %s5008_s16 }
0x2ec3   :  { %v2042_v51 = vpop.permute.xlu0 %2041 }
0x2ec4   :  { %v2044_v19 = vsel %vm139_vm1, %v2042_v51, 0.0 }
0x2ec5   :  { %2045 = vadd.xlane.f32.xlu0 %v2044_v19 }
0x2ec7   :  { %v1720_v53 = vpop.permute.xlu0 %1719 }
0x2ec8   :  { %v5565_v1 = vsub.f32 %v5483_v37, %v1720_v53 }
0x2eca   :  { %2054 = vrot.lane.b32.xlu1 %v5565_v1, %s5003_s8 }
0x2edb   :  { %2049 = vrot.lane.b32.xlu0 %v5570_v57, %s5002_s7 }
0x2edf   :  { %v2038_v24 = vpop.xlane.xlu1 %2037 }
0x2ee0   :  { %v2039_v46 = vadd.f32 %v5311_v14, %v2038_v24 }
0x2f3c   :  { %v2055_v62 = vpop.permute.xlu1 %2054 }
0x2f52   :  { %v2046_v58 = vpop.xlane.xlu0 %2045 }
0x2f53   :  { %v2047_v59 = vadd.f32 %v5311_v14, %v2046_v58 }
0x2f55   :  { %v2057_v37 = vmul.f32 %v2055_v62, %v2047_v59 }
0x2f56   :  { %v2050_v4 = vpop.permute.xlu0 %2049 }
0x2f57   :  { %v2052_v6 = vmul.f32 %v2050_v4, %v2039_v46 }
0x2f59   :  { %v2058_v8 = vsub.f32 %v2052_v6, %v2057_v37 }
0x2f5b   :  { %v3977_v13 = vmul.f32 -1.442695, %v2058_v8 }
0x2f5d   :  { %4754 = vpow2.f32 %v3977_v13  ;;  %v4610_v13 = vld [vmem:[#allocation4 + $0x30] sm:$0xff]  }
0x2f5e   :  { %4382 = vmatpush3.bf16.msra.mxu0 %v4610_v13 }
0x2f5f   :  { %4383 = vmatprep.subr.bf16.mxu0 %v4999_v0 }
0x2f67   :  { %v4755_v16 = vpop.eup %4754 }
0x2f68   :  { %v2062_v17 = vadd.f32 1.0, %v4755_v16  ;;  %v4611_v16 = vld [vmem:[#allocation4 + $0x38] sm:$0xff]  }
0x2f69   :  { %4384 = vmatpush3.bf16.msra.mxu0 %v4611_v16 }
0x2f6a   :  { %4756 = vrcp.f32 %v2062_v17  ;;  %v4612_v17 = vld [vmem:[#allocation4 + $0x40] sm:$0xff]   ;;  %4385 = vmatprep.subr.bf16.mxu0 %v4999_v0 }
0x2f6d   :  { %4386 = vmatpush3.bf16.msra.mxu0 %v4612_v17 }
0x2f6e   :  { %4387 = vmatprep.subr.bf16.mxu0 %v4999_v0 }
0x2f74   :  { %v5576_v31 = vpop.eup %4756 }
0x2f75   :  { %2068 = vperm.xlu1 %4502, %v5576_v31  }
0x2ff4   :  { %v2069_v27 = vpop.permute.xlu1 %2068 }
0x2ff5   :  { %v2071_v10 = vmul.f32 %v2069_v27, %v5115_v48 }
0x2ff7   :  { %2073 = vrot.lane.b32.xlu0 %v2071_v10, %s5005_s9 }
0x3069   :  { %v2074_v38 = vpop.permute.xlu0 %2073 }
0x306a   :  { %v2076_v39 = vadd.f32 %v5311_v14, %v2074_v38 }
0x306c   :  { %v4523_v40 = vpack.i.bf16 %v5525_v52, %v2076_v39 }
0x306e   :  { %4524 = vrot.lane.b32.xlu1 %v4523_v40, %s5001_s1 }
0x30e0   :  { %v4525_v41 = vpop.permute.xlu1 %4524 }
0x30e1   :  { %v4527_v43 = vunpack.i.h.bf16 %v4525_v41  ;;  %v4526_v45 = vunpack.i.l.bf16 %v4525_v41 }
0x30e3   :  { %v2106_v22 = vsel %vm139_vm1, %v2098_v9, %v4526_v45 }
0x30e4   :  { %v2107_v47 = vsel %vm79_vm2, %v2106_v22, %v4527_v43 }
0x30e5   :  { %v2108_v26 = vpack.c.bf16 %v2107_v47, %v2107_v47 }
0x30e7   :  { %4378 = vmatmul.mubr.msk.bf16.vlgmr.msra.gmra.mrb[28].mxu1 %vm322_vm3, %v2108_v26 }
0x30e8   :  { %4413 = vmatprep.mubr.msk.bf16.mxu1 %vm5000_vm0, %v4999_v0 }
0x31ba   :  { %v2194_v14 = vpop.f32.mrb[28].mxu1 }
0x31bb   :  { %v2195_v52 = vadd.f32 %v2194_v14, %v5148_v63  ;;  %v4379_v51 = vpop.f32.mrb[29].mxu1 }
0x31bc   :  { %v2197_v19 = vpop.f32.mrb[30].mxu1 }
0x31bd   :  { %4758 = vtanh.f32 %v2195_v52  ;;  %v4380_v53 = vpop.f32.mrb[31].mxu1  ;;  %v3985_v24 = vmul.f32 -1.442695, %v2195_v52 }
0x31be   :  { %v4614_v53 = vld [vmem:[#allocation4 + $0x50] sm:$0xff]  }
0x31bf   :  { %4760 = vpow2.f32 %v3985_v24 }
0x31c7   :  { %v4759_v28 = vpop.eup %4758 }
0x31c8   :  { %2209 = vrot.lane.b32.xlu0 %v4759_v28, %s4997_s25  ;;  %v4615_v28 = vld [vmem:[#allocation4 + $0x58] sm:$0xff]  }
0x31c9   :  { %v4761_v58 = vpop.eup %4760 }
0x31ca   :  { %v2203_v59 = vadd.f32 1.0, %v4761_v58 }
0x31cc   :  { %4762 = vrcp.f32 %v2203_v59 }
0x31d6   :  { %v4763_v46 = vpop.eup %4762 }
0x31d7   :  { %v2206_v37 = vmul.f32 %v4763_v46, %v5515_v44  ;;  %v4613_v44 = vld [vmem:[#allocation4 + $0x48] sm:$0xff]  }
0x31d8   :  { %4388 = vmatpush3.bf16.msra.mxu0 %v4613_v44  ;;  %v2065_v44 = vsub.f32 1.0, %v5576_v31 }
0x31d9   :  { %4393 = vmatprep.subr.bf16.mxu0 %v4999_v0 }
0x323a   :  { %v2210_v62 = vpop.permute.xlu0 %2209 }
0x323b   :  { %v2212_v4 = vmul.f32 %v4763_v46, %v2210_v62 }
0x323d   :  { %2214 = vrot.lane.b32.xlu1 %v2212_v4, %s5005_s9 }
0x32af   :  { %v2215_v6 = vpop.permute.xlu1 %2214 }
0x32b0   :  { %v5602_v8 = vadd.f32 %v2215_v6, %v2206_v37 }
0x32b2   :  { %4764 = vtanh.f32 %v5602_v8 }
0x32bc   :  { %v4765_v21 = vpop.eup %4764 }
0x32bd   :  { %2220 = vrot.lane.b32.xlu0 %v4765_v21, %s4997_s25 }
0x32c1   :  { %2228 = vrot.lane.b32.xlu0 %v5543_v32, %s4997_s25 }
0x332f   :  { %v2221_v35 = vpop.permute.xlu0 %2220 }
0x3330   :  { %v5612_v27 = vmul.f32 %v4763_v46, %v2221_v35  ;;  %v2077_v46 = vmul.f32 %v5576_v31, %v5191_v56 }
0x3332   :  { %2225 = vrot.lane.b32.xlu1 %v5612_v27, %s5005_s9 }
0x3333   :  { %v2229_v29 = vpop.permute.xlu0 %2228 }
0x33a4   :  { %v2226_v10 = vpop.permute.xlu1 %2225 }
0x33a5   :  { %v2231_v11 = vsel %vm139_vm1, %v2226_v10, %v2229_v29  ;;  %v2083_v29 = vmul.f32 %v2065_v44, %v5201_v5 }
0x33a6   :  { %v2232_v55 = vpack.c.bf16 %v2231_v11, %v2231_v11 }
0x33a8   :  { %4390 = vmatmul.mubr.msk.bf16.vlgmr.msra.gmra.mrb[40].mxu0 %vm79_vm2, %v2232_v55 }
0x33a9   :  { %4397 = vmatprep.mubr.msk.bf16.mxu0 %vm5000_vm0, %v4999_v0  ;;  %4394 = vmatpush3.bf16.msra.mxu0 %v4614_v53 }
0x33aa   :  { %4395 = vmatprep.subr.bf16.mxu0 %v4999_v0 }
0x33ad   :  { %4396 = vmatpush3.bf16.msra.mxu0 %v4615_v28  ;;  %v4616_v28 = vld [vmem:[#allocation4] sm:$0xff]  }
0x33ae   :  { %4417 = vmatprep.subr.bf16.mxu0 %v4999_v0  ;;  %4402 = vmatpush3.bf16.msra.mxu1 %v4616_v28 }
0x33af   :  { %4403 = vmatprep.subr.bf16.mxu1 %v4999_v0 }
0x347b   :  { %v2302_v36 = vpop.f32.mrb[40].mxu0 }
0x347c   :  { %v2303_v38 = vadd.f32 %v2302_v36, %v5172_v33  ;;  %v4391_v39 = vpop.f32.mrb[41].mxu0 }
0x347d   :  { %v2305_v40 = vpop.f32.mrb[42].mxu0 }
0x347e   :  { %4766 = vtanh.f32 %v2303_v38  ;;  %v4392_v9 = vpop.f32.mrb[43].mxu0  ;;  %v3991_v43 = vmul.f32 -1.442695, %v2303_v38 }
0x3480   :  { %4768 = vpow2.f32 %v3991_v43 }
0x3488   :  { %v4767_v41 = vpop.eup %4766 }
0x3489   :  { %2317 = vrot.lane.b32.xlu1 %v4767_v41, %s4997_s25 }
0x348a   :  { %v4769_v45 = vpop.eup %4768 }
0x348b   :  { %v2311_v22 = vadd.f32 1.0, %v4769_v45 }
0x348d   :  { %4770 = vrcp.f32 %v2311_v22 }
0x3497   :  { %v4771_v47 = vpop.eup %4770 }
0x3498   :  { %v2314_v52 = vmul.f32 %v4771_v47, %v5537_v25 }
0x34fb   :  { %v2318_v26 = vpop.permute.xlu1 %2317 }
0x34fc   :  { %v2320_v14 = vmul.f32 %v4771_v47, %v2318_v26 }
0x34fe   :  { %2322 = vrot.lane.b32.xlu0 %v2320_v14, %s5005_s9 }
0x3570   :  { %v2323_v51 = vpop.permute.xlu0 %2322 }
0x3571   :  { %v5624_v19 = vadd.f32 %v2323_v51, %v2314_v52 }
0x3573   :  { %4772 = vtanh.f32 %v5624_v19 }
0x357d   :  { %v4773_v24 = vpop.eup %4772 }
0x357e   :  { %2328 = vrot.lane.b32.xlu1 %v4773_v24, %s4997_s25  ;;  %v4617_v24 = vld [vmem:[#allocation4 + $0x8] sm:$0xff]  }
0x357f   :  { %4404 = vmatpush3.bf16.msra.mxu1 %v4617_v24  ;;  %v4622_v24 = vld [vmem:[#allocation4 + $0x30] sm:$0xff]  }
0x3580   :  { %4405 = vmatprep.subr.bf16.mxu1 %v4999_v0 }
0x35f0   :  { %v2329_v58 = vpop.permute.xlu1 %2328 }
0x35f1   :  { %v5630_v59 = vmul.f32 %v4771_v47, %v2329_v58 }
0x35f3   :  { %v2337_v25 = vpack.c.bf16 %v5630_v59, %v5630_v59 }
0x35f5   :  { %2343 = vrot.lane.b32.xlu0 %v2337_v25, %s5005_s9  ;;  %v4618_v25 = vld [vmem:[#allocation4 + $0x10] sm:$0xff]  }
0x35f6   :  { %4406 = vmatpush3.bf16.msra.mxu1 %v4618_v25  ;;  %v4624_v25 = vld [vmem:[#allocation4 + $0x40] sm:$0xff]  }
0x35f7   :  { %4407 = vmatprep.subr.bf16.mxu1 %v4999_v0 }
0x35f9   :  { %2079 = vrot.lane.b32.xlu0 %v2077_v46, %s5007_s15 }
0x3667   :  { %v2344_v62 = vpop.permute.xlu0 %2343 }
0x3668   :  { %4398 = vmatmul.mubr.msk.bf16.vlgmr.msra.gmra.mrb[44].mxu0 %vm139_vm1, %v2344_v62  ;;  %v4619_v62 = vld [vmem:[#allocation4 + $0x18] sm:$0xff]  }
0x3669   :  { %4425 = vmatprep.mubr.msk.bf16.mxu0 %vm5000_vm0, %v4999_v0  ;;  %4408 = vmatpush3.bf16.msra.mxu1 %v4619_v62 }
0x366a   :  { %4409 = vmatprep.subr.bf16.mxu1 %v4999_v0  ;;  %4418 = vmatpush3.bf16.msra.mxu0 %v4622_v24 }
0x366b   :  { %v2080_v10 = vpop.permute.xlu0 %2079  ;;  %4419 = vmatprep.subr.bf16.mxu0 %v4999_v0 }
0x366c   :  { %v5651_v11 = vsub.f32 %v5570_v57, %v2080_v10  ;;  %v5664_v57 = vld [vmem:[%s6360_s2] sm:$0xff] }
0x373b   :  { %v2394_v4 = vpop.f32.mrb[44].mxu0 }
0x373c   :  { %v2395_v37 = vadd.f32 %v2394_v4, %v5084_v15  ;;  %v4399_v6 = vpop.f32.mrb[45].mxu0  ;;  %v4620_v4 = vld [vmem:[#allocation4 + $0x20] sm:$0xff]  }
0x373d   :  { %v2397_v13 = vpop.f32.mrb[46].mxu0  ;;  %4410 = vmatpush3.bf16.msra.mxu1 %v4620_v4 }
0x373e   :  { %4774 = vtanh.f32 %v2395_v37  ;;  %v4400_v16 = vpop.f32.mrb[47].mxu0  ;;  %4411 = vmatprep.subr.bf16.mxu1 %v4999_v0  ;;  %v4621_v37 = vld [vmem:[#allocation4 + $0x28] sm:$0xff]  }
0x3741   :  { %4412 = vmatpush3.bf16.msra.mxu1 %v4621_v37 }
0x3742   :  { %4437 = vmatprep.subr.bf16.mxu1 %v4999_v0 }
0x3748   :  { %v4775_v17 = vpop.eup %4774 }
0x3749   :  { %v2401_v21 = vmul.f32 %v4775_v17, %v5096_v23  ;;  %v2464_v17 = vld [vmem:[%s6358_s0 + $0x30] sm:$0xff] }
0x374b   :  { %2407 = vrot.lane.b32.xlu1 %v2401_v21, %s5001_s1  ;;  %v2402_v35 = vsel %vm139_vm1, %v2401_v21, 0.0 }
0x374c   :  { %2403 = vadd.xlane.f32.xlu0 %v2402_v35 }
0x374f   :  { %2085 = vrot.lane.b32.xlu1 %v2083_v29, %s5008_s16 }
0x3762   :  { %2415 = vrot.lane.b32.xlu0 %v5651_v11, %s5002_s7 }
0x37bd   :  { %v2408_v55 = vpop.permute.xlu1 %2407 }
0x37be   :  { %v2410_v36 = vsel %vm139_vm1, %v2408_v55, 0.0 }
0x37bf   :  { %2411 = vadd.xlane.f32.xlu1 %v2410_v36 }
0x37c1   :  { %v2086_v38 = vpop.permute.xlu1 %2085 }
0x37c2   :  { %v5657_v39 = vsub.f32 %v5565_v1, %v2086_v38 }
0x37d0   :  { %2420 = vrot.lane.b32.xlu1 %v5657_v39, %s5003_s8 }
0x37d9   :  { %v2404_v40 = vpop.xlane.xlu0 %2403 }
0x37da   :  { %v2405_v43 = vadd.f32 %v5664_v57, %v2404_v40 }
0x37dd   :  { %v2416_v41 = vpop.permute.xlu0 %2415 }
0x37de   :  { %v2418_v47 = vmul.f32 %v2416_v41, %v2405_v43 }
0x384c   :  { %v2412_v9 = vpop.xlane.xlu1 %2411 }
0x384d   :  { %v2413_v45 = vadd.f32 %v5664_v57, %v2412_v9 }
0x3850   :  { %v2421_v22 = vpop.permute.xlu1 %2420 }
0x3851   :  { %v2423_v26 = vmul.f32 %v2421_v22, %v2413_v45 }
0x3853   :  { %v2424_v1 = vsub.f32 %v2418_v47, %v2423_v26 }
0x3855   :  { %v3995_v14 = vmul.f32 -1.442695, %v2424_v1 }
0x3857   :  { %4776 = vpow2.f32 %v3995_v14 }
0x3861   :  { %v4777_v52 = vpop.eup %4776 }
0x3862   :  { %v2428_v51 = vadd.f32 1.0, %v4777_v52 }
0x3864   :  { %4778 = vrcp.f32 %v2428_v51 }
0x386e   :  { %v5668_v53 = vpop.eup %4778 }
0x386f   :  { %2434 = vperm.xlu0 %4501, %v5668_v53  }
0x38ee   :  { %v2435_v58 = vpop.permute.xlu0 %2434 }
0x38ef   :  { %v2437_v46 = vmul.f32 %v2435_v58, %v5115_v48  ;;  %v4623_v58 = vld [vmem:[#allocation4 + $0x38] sm:$0xff]  }
0x38f0   :  { %4420 = vmatpush3.bf16.msra.mxu0 %v4623_v58 }
0x38f1   :  { %2439 = vrot.lane.b32.xlu1 %v2437_v46, %s5005_s9  ;;  %4421 = vmatprep.subr.bf16.mxu0 %v4999_v0 }
0x38f4   :  { %4422 = vmatpush3.bf16.msra.mxu0 %v4624_v25 }
0x38f5   :  { %4423 = vmatprep.subr.bf16.mxu0 %v4999_v0 }
0x3963   :  { %v2440_v6 = vpop.permute.xlu1 %2439 }
0x3964   :  { %v2442_v13 = vadd.f32 %v5664_v57, %v2440_v6 }
0x3966   :  { %v4528_v16 = vpack.i.bf16 %v5612_v27, %v2442_v13 }
0x3968   :  { %4529 = vrot.lane.b32.xlu0 %v4528_v16, %s5001_s1 }
0x39da   :  { %v4530_v21 = vpop.permute.xlu0 %4529 }
0x39db   :  { %v4532_v35 = vunpack.i.h.bf16 %v4530_v21  ;;  %v4531_v29 = vunpack.i.l.bf16 %v4530_v21 }
0x39dd   :  { %v2472_v10 = vsel %vm139_vm1, %v2464_v17, %v4531_v29 }
0x39de   :  { %v2473_v55 = vsel %vm79_vm2, %v2472_v10, %v4532_v35 }
0x39df   :  { %v2474_v36 = vpack.c.bf16 %v2473_v55, %v2473_v55 }
0x39e1   :  { %4414 = vmatmul.mubr.msk.bf16.vlgmr.msra.gmra.mrb[32].mxu1 %vm322_vm3, %v2474_v36 }
0x39e2   :  { %4449 = vmatprep.mubr.msk.bf16.mxu1 %vm5000_vm0, %v4999_v0 }
0x3ab4   :  { %v2560_v27 = vpop.f32.mrb[32].mxu1 }
0x3ab5   :  { %v2561_v38 = vadd.f32 %v2560_v27, %v5148_v63  ;;  %v4415_v40 = vpop.f32.mrb[33].mxu1 }
0x3ab6   :  { %v2563_v9 = vpop.f32.mrb[34].mxu1 }
0x3ab7   :  { %4780 = vtanh.f32 %v2561_v38  ;;  %v4416_v41 = vpop.f32.mrb[35].mxu1  ;;  %v4003_v45 = vmul.f32 -1.442695, %v2561_v38 }
0x3ab9   :  { %4782 = vpow2.f32 %v4003_v45 }
0x3ac1   :  { %v4781_v43 = vpop.eup %4780 }
0x3ac2   :  { %2575 = vrot.lane.b32.xlu1 %v4781_v43, %s4997_s25 }
0x3ac3   :  { %v4783_v22 = vpop.eup %4782 }
0x3ac4   :  { %v2569_v47 = vadd.f32 1.0, %v4783_v22 }
0x3ac6   :  { %4784 = vrcp.f32 %v2569_v47  ;;  %v4626_v47 = vld [vmem:[#allocation4 + $0x50] sm:$0xff]  }
0x3ad0   :  { %v4785_v26 = vpop.eup %4784 }
0x3ad1   :  { %v2572_v52 = vmul.f32 %v4785_v26, %v5602_v8  ;;  %v4625_v8 = vld [vmem:[#allocation4 + $0x48] sm:$0xff]  }
0x3ad2   :  { %4424 = vmatpush3.bf16.msra.mxu0 %v4625_v8 }
0x3ad3   :  { %4429 = vmatprep.subr.bf16.mxu0 %v4999_v0 }
0x3b34   :  { %v2576_v1 = vpop.permute.xlu1 %2575 }
0x3b35   :  { %v2578_v14 = vmul.f32 %v4785_v26, %v2576_v1 }
0x3b37   :  { %2580 = vrot.lane.b32.xlu0 %v2578_v14, %s5005_s9 }
0x3ba9   :  { %v2581_v51 = vpop.permute.xlu0 %2580 }
0x3baa   :  { %v5694_v28 = vadd.f32 %v2581_v51, %v2572_v52  ;;  %v2443_v51 = vmul.f32 %v5668_v53, %v5191_v56 }
0x3bac   :  { %4786 = vtanh.f32 %v5694_v28 }
0x3bb6   :  { %v4787_v46 = vpop.eup %4786 }
0x3bb7   :  { %2586 = vrot.lane.b32.xlu1 %v4787_v46, %s4997_s25 }
0x3bbb   :  { %2594 = vrot.lane.b32.xlu1 %v5630_v59, %s4997_s25 }
0x3c29   :  { %v2587_v62 = vpop.permute.xlu1 %2586 }
0x3c2a   :  { %v5704_v4 = vmul.f32 %v4785_v26, %v2587_v62  ;;  %v4627_v26 = vld [vmem:[#allocation4 + $0x58] sm:$0xff]  }
0x3c2c   :  { %2591 = vrot.lane.b32.xlu0 %v5704_v4, %s5005_s9 }
0x3c2d   :  { %v2595_v37 = vpop.permute.xlu1 %2594 }
0x3c9e   :  { %v2592_v6 = vpop.permute.xlu0 %2591 }
0x3c9f   :  { %v2597_v13 = vsel %vm139_vm1, %v2592_v6, %v2595_v37 }
0x3ca0   :  { %v2598_v16 = vpack.c.bf16 %v2597_v13, %v2597_v13  ;;  %v2431_v13 = vsub.f32 1.0, %v5668_v53 }
0x3ca2   :  { %4426 = vmatmul.mubr.msk.bf16.vlgmr.msra.gmra.mrb[48].mxu0 %vm79_vm2, %v2598_v16 }
0x3ca3   :  { %4433 = vmatprep.mubr.msk.bf16.mxu0 %vm5000_vm0, %v4999_v0  ;;  %4430 = vmatpush3.bf16.msra.mxu0 %v4626_v47 }
0x3ca4   :  { %4431 = vmatprep.subr.bf16.mxu0 %v4999_v0 }
0x3ca7   :  { %4432 = vmatpush3.bf16.msra.mxu0 %v4627_v26 }
0x3ca8   :  { %4453 = vmatprep.subr.bf16.mxu0 %v4999_v0 }
0x3d75   :  { %v2668_v17 = vpop.f32.mrb[48].mxu0 }
0x3d76   :  { %v2669_v21 = vadd.f32 %v2668_v17, %v5172_v33  ;;  %v4427_v35 = vpop.f32.mrb[49].mxu0  ;;  %v2449_v17 = vmul.f32 %v2431_v13, %v5201_v5 }
0x3d77   :  { %v2671_v29 = vpop.f32.mrb[50].mxu0 }
0x3d78   :  { %4788 = vtanh.f32 %v2669_v21  ;;  %v4428_v10 = vpop.f32.mrb[51].mxu0  ;;  %v4009_v36 = vmul.f32 -1.442695, %v2669_v21 }
0x3d7a   :  { %4790 = vpow2.f32 %v4009_v36 }
0x3d82   :  { %v4789_v55 = vpop.eup %4788 }
0x3d83   :  { %2683 = vrot.lane.b32.xlu0 %v4789_v55, %s4997_s25 }
0x3d84   :  { %v4791_v27 = vpop.eup %4790 }
0x3d85   :  { %v2677_v38 = vadd.f32 1.0, %v4791_v27 }
0x3d87   :  { %4792 = vrcp.f32 %v2677_v38 }
0x3d91   :  { %v4793_v40 = vpop.eup %4792 }
0x3d92   :  { %v2680_v43 = vmul.f32 %v4793_v40, %v5624_v19 }
0x3df5   :  { %v2684_v9 = vpop.permute.xlu0 %2683 }
0x3df6   :  { %v2686_v41 = vmul.f32 %v4793_v40, %v2684_v9 }
0x3df8   :  { %2688 = vrot.lane.b32.xlu1 %v2686_v41, %s5005_s9 }
0x3e6a   :  { %v2689_v45 = vpop.permute.xlu1 %2688 }
0x3e6b   :  { %v5716_v22 = vadd.f32 %v2689_v45, %v2680_v43 }
0x3e6d   :  { %4794 = vtanh.f32 %v5716_v22 }
0x3e77   :  { %v4795_v1 = vpop.eup %4794 }
0x3e78   :  { %2694 = vrot.lane.b32.xlu0 %v4795_v1, %s4997_s25  ;;  %v4628_v1 = vld [vmem:[#allocation4] sm:$0xff]  }
0x3e79   :  { %4438 = vmatpush3.bf16.msra.mxu1 %v4628_v1  ;;  %v4635_v1 = vld [vmem:[#allocation4 + $0x38] sm:$0xff]  }
0x3e7a   :  { %4439 = vmatprep.subr.bf16.mxu1 %v4999_v0 }
0x3eea   :  { %v2695_v14 = vpop.permute.xlu0 %2694 }
0x3eeb   :  { %v5722_v52 = vmul.f32 %v4793_v40, %v2695_v14  ;;  %v4629_v14 = vld [vmem:[#allocation4 + $0x8] sm:$0xff]  }
0x3eec   :  { %4440 = vmatpush3.bf16.msra.mxu1 %v4629_v14  ;;  %v4636_v14 = vld [vmem:[#allocation4 + $0x40] sm:$0xff]  }
0x3eed   :  { %v2703_v19 = vpack.c.bf16 %v5722_v52, %v5722_v52  ;;  %4441 = vmatprep.subr.bf16.mxu1 %v4999_v0 }
0x3eef   :  { %2709 = vrot.lane.b32.xlu1 %v2703_v19, %s5005_s9 }
0x3ef3   :  { %2445 = vrot.lane.b32.xlu1 %v2443_v51, %s5007_s15  ;;  %v4630_v51 = vld [vmem:[#allocation4 + $0x10] sm:$0xff]  }
0x3ef4   :  { %4442 = vmatpush3.bf16.msra.mxu1 %v4630_v51 }
0x3ef5   :  { %4443 = vmatprep.subr.bf16.mxu1 %v4999_v0 }
0x3f61   :  { %v2710_v24 = vpop.permute.xlu1 %2709 }
0x3f62   :  { %4434 = vmatmul.mubr.msk.bf16.vlgmr.msra.gmra.mrb[52].mxu0 %vm139_vm1, %v2710_v24 }
0x3f63   :  { %4461 = vmatprep.mubr.msk.bf16.mxu0 %vm5000_vm0, %v4999_v0 }
0x3f65   :  { %v2446_v29 = vpop.permute.xlu1 %2445 }
0x3f66   :  { %v5749_v10 = vsub.f32 %v5651_v11, %v2446_v29 }
0x4035   :  { %v2760_v58 = vpop.f32.mrb[52].mxu0 }
0x4036   :  { %v2761_v25 = vadd.f32 %v2760_v58, %v5084_v15  ;;  %v4435_v46 = vpop.f32.mrb[53].mxu0  ;;  %v4631_v58 = vld [vmem:[#allocation4 + $0x18] sm:$0xff]  }
0x4037   :  { %v2763_v8 = vpop.f32.mrb[54].mxu0  ;;  %4444 = vmatpush3.bf16.msra.mxu1 %v4631_v58  ;;  %v4633_v46 = vld [vmem:[#allocation4 + $0x28] sm:$0xff]  }
0x4038   :  { %4796 = vtanh.f32 %v2761_v25  ;;  %v4436_v62 = vpop.f32.mrb[55].mxu0  ;;  %v4632_v25 = vld [vmem:[#allocation4 + $0x20] sm:$0xff]   ;;  %4445 = vmatprep.subr.bf16.mxu1 %v4999_v0 }
0x403b   :  { %4446 = vmatpush3.bf16.msra.mxu1 %v4632_v25 }
0x403c   :  { %4447 = vmatprep.subr.bf16.mxu1 %v4999_v0 }
0x403f   :  { %4448 = vmatpush3.bf16.msra.mxu1 %v4633_v46 }
0x4042   :  { %v4797_v37 = vpop.eup %4796 }
0x4043   :  { %v2767_v6 = vmul.f32 %v4797_v37, %v5096_v23  ;;  %v2830_v37 = vld [vmem:[%s6358_s0 + $0x38] sm:$0xff]  ;;  %s5009_s0 = smov 28  }
0x4045   :  { %2773 = vrot.lane.b32.xlu0 %v2767_v6, %s5001_s1  ;;  %v2768_v16 = vsel %vm139_vm1, %v2767_v6, 0.0 }
0x4046   :  { %2769 = vadd.xlane.f32.xlu1 %v2768_v16 }
0x4049   :  { %2451 = vrot.lane.b32.xlu0 %v2449_v17, %s5008_s16 }
0x40b7   :  { %v2774_v15 = vpop.permute.xlu0 %2773 }
0x40b8   :  { %v2776_v21 = vsel %vm139_vm1, %v2774_v15, 0.0 }
0x40b9   :  { %2777 = vadd.xlane.f32.xlu0 %v2776_v21 }
0x40bb   :  { %v2452_v35 = vpop.permute.xlu0 %2451 }
0x40bc   :  { %v5744_v23 = vsub.f32 %v5657_v39, %v2452_v35 }
0x40be   :  { %2786 = vrot.lane.b32.xlu1 %v5744_v23, %s5003_s8 }
0x40cf   :  { %2781 = vrot.lane.b32.xlu0 %v5749_v10, %s5002_s7 }
0x40d3   :  { %v2770_v55 = vpop.xlane.xlu1 %2769 }
0x40d4   :  { %v2771_v38 = vadd.f32 %v5664_v57, %v2770_v55 }
0x4130   :  { %v2787_v40 = vpop.permute.xlu1 %2786 }
0x4146   :  { %v2778_v36 = vpop.xlane.xlu0 %2777 }
0x4147   :  { %v2779_v27 = vadd.f32 %v5664_v57, %v2778_v36 }
0x4149   :  { %v2789_v39 = vmul.f32 %v2787_v40, %v2779_v27 }
0x414a   :  { %v2782_v9 = vpop.permute.xlu0 %2781 }
0x414b   :  { %v2784_v41 = vmul.f32 %v2782_v9, %v2771_v38 }
0x414d   :  { %v2790_v43 = vsub.f32 %v2784_v41, %v2789_v39 }
0x414f   :  { %v4013_v45 = vmul.f32 -1.442695, %v2790_v43 }
0x4151   :  { %4798 = vpow2.f32 %v4013_v45 }
0x415b   :  { %v4799_v47 = vpop.eup %4798 }
0x415c   :  { %v2794_v26 = vadd.f32 1.0, %v4799_v47 }
0x415e   :  { %4800 = vrcp.f32 %v2794_v26  ;;  %v4634_v26 = vld [vmem:[#allocation4 + $0x30] sm:$0xff]  }
0x415f   :  { %4454 = vmatpush3.bf16.msra.mxu0 %v4634_v26 }
0x4160   :  { %4455 = vmatprep.subr.bf16.mxu0 %v4999_v0 }
0x4163   :  { %4456 = vmatpush3.bf16.msra.mxu0 %v4635_v1 }
0x4164   :  { %4457 = vmatprep.subr.bf16.mxu0 %v4999_v0 }
0x4167   :  { %4458 = vmatpush3.bf16.msra.mxu0 %v4636_v14 }
0x4168   :  { %v5755_v11 = vpop.eup %4800  ;;  %4459 = vmatprep.subr.bf16.mxu0 %v4999_v0 }
0x4169   :  { %2800 = vperm.xlu1 %4502, %v5755_v11  }
0x41e8   :  { %v2801_v19 = vpop.permute.xlu1 %2800 }
0x41e9   :  { %v2803_v24 = vmul.f32 %v2801_v19, %v5115_v48 }
0x41eb   :  { %2805 = vrot.lane.b32.xlu0 %v2803_v24, %s5005_s9 }
0x425d   :  { %v2806_v8 = vpop.permute.xlu0 %2805 }
0x425e   :  { %v2808_v48 = vadd.f32 %v5664_v57, %v2806_v8 }
0x4260   :  { %v4533_v62 = vpack.i.bf16 %v5704_v4, %v2808_v48 }
0x4262   :  { %4534 = vrot.lane.b32.xlu1 %v4533_v62, %s5001_s1  ;;  %s5010_s1 = smov 29  }
0x42d4   :  { %v4535_v6 = vpop.permute.xlu1 %4534 }
0x42d5   :  { %v4537_v16 = vunpack.i.h.bf16 %v4535_v6  ;;  %v4536_v17 = vunpack.i.l.bf16 %v4535_v6 }
0x42d7   :  { %v2838_v15 = vsel %vm139_vm1, %v2830_v37, %v4536_v17 }
0x42d8   :  { %v2839_v21 = vsel %vm79_vm2, %v2838_v15, %v4537_v16 }
0x42d9   :  { %v2840_v35 = vpack.c.bf16 %v2839_v21, %v2839_v21 }
0x42db   :  { %4450 = vmatmul.mubr.msk.bf16.vlgmr.msra.gmra.mrb[36].mxu1 %vm322_vm3, %v2840_v35 }
0x43ae   :  { %v2926_v29 = vpop.f32.mrb[36].mxu1 }
0x43af   :  { %v2927_v57 = vadd.f32 %v2926_v29, %v5148_v63  ;;  %v4451_v4 = vpop.f32.mrb[37].mxu1 }
0x43b0   :  { %v2929_v55 = vpop.f32.mrb[38].mxu1 }
0x43b1   :  { %4802 = vtanh.f32 %v2927_v57  ;;  %v4452_v36 = vpop.f32.mrb[39].mxu1  ;;  %v4021_v38 = vmul.f32 -1.442695, %v2927_v57  ;;  %v4638_v55 = vld [vmem:[#allocation4 + $0x80] sm:$0xff]  }
0x43b3   :  { %4804 = vpow2.f32 %v4021_v38 }
0x43bb   :  { %v4803_v27 = vpop.eup %4802 }
0x43bc   :  { %2941 = vrot.lane.b32.xlu0 %v4803_v27, %s4997_s25  ;;  %v4639_v27 = vld [vmem:[#allocation4 + $0x88] sm:$0xff]  }
0x43bd   :  { %v4805_v40 = vpop.eup %4804 }
0x43be   :  { %v2935_v9 = vadd.f32 1.0, %v4805_v40 }
0x43c0   :  { %4806 = vrcp.f32 %v2935_v9 }
0x43ca   :  { %v4807_v39 = vpop.eup %4806 }
0x43cb   :  { %v2938_v45 = vmul.f32 %v4807_v39, %v5694_v28  ;;  %v4637_v28 = vld [vmem:[#allocation4 + $0x48] sm:$0xff]  }
0x43cc   :  { %4460 = vmatpush3.bf16.msra.mxu0 %v4637_v28 }
0x43cd   :  { %4465 = vmatprep.subr.bf16.mxu0 %v4638_v55 }
0x442e   :  { %v2942_v41 = vpop.permute.xlu0 %2941 }
0x442f   :  { %v2944_v43 = vmul.f32 %v4807_v39, %v2942_v41 }
0x4431   :  { %2946 = vrot.lane.b32.xlu1 %v2944_v43, %s5005_s9 }
0x44a3   :  { %v2947_v63 = vpop.permute.xlu1 %2946 }
0x44a4   :  { %v5778_v47 = vadd.f32 %v2947_v63, %v2938_v45  ;;  %v2797_v63 = vsub.f32 1.0, %v5755_v11 }
0x44a6   :  { %4808 = vtanh.f32 %v5778_v47 }
0x44b0   :  { %v4809_v19 = vpop.eup %4808 }
0x44b1   :  { %2952 = vrot.lane.b32.xlu0 %v4809_v19, %s4997_s25 }
0x44b5   :  { %2960 = vrot.lane.b32.xlu0 %v5722_v52, %s4997_s25 }
0x4523   :  { %v2953_v51 = vpop.permute.xlu0 %2952 }
0x4524   :  { %v2955_v24 = vmul.f32 %v4807_v39, %v2953_v51 }
0x4526   :  { %2957 = vrot.lane.b32.xlu1 %v2955_v24, %s5005_s9 }
0x4527   :  { %v2961_v58 = vpop.permute.xlu0 %2960 }
0x4598   :  { %v5788_v25 = vpop.permute.xlu1 %2957 }
0x4599   :  { %v2963_v46 = vsel %vm139_vm1, %v5788_v25, %v2961_v58 }
0x459a   :  { %v2964_v8 = vpack.c.bf16 %v2963_v46, %v2963_v46 }
0x459c   :  { %4462 = vmatmul.mubr.msk.bf16.vlgmr.msra.gmra.mrb[56].mxu0 %vm79_vm2, %v2964_v8 }
0x459d   :  { %4466 = vmatpush3.bf16.msra.mxu0 %v4638_v55 }
0x459e   :  { %4467 = vmatprep.subr.bf16.mxu0 %v4639_v27 }
0x45a1   :  { %4468 = vmatpush3.bf16.msra.mxu0 %v4639_v27 }
0x466f   :  { %v3034_v48 = vpop.f32.mrb[56].mxu0 }
0x4670   :  { %v3035_v0 = vadd.f32 %v3034_v48, %v5172_v33  ;;  %v4463_v62 = vpop.f32.mrb[57].mxu0  ;;  %v2809_v33 = vmul.f32 %v5755_v11, %v5191_v56 }
0x4671   :  { %v3037_v37 = vpop.f32.mrb[58].mxu0 }
0x4672   :  { %4810 = vtanh.f32 %v3035_v0  ;;  %v4464_v6 = vpop.f32.mrb[59].mxu0  ;;  %v4027_v17 = vmul.f32 -1.442695, %v3035_v0 }
0x4674   :  { %4812 = vpow2.f32 %v4027_v17 }
0x467c   :  { %v4811_v16 = vpop.eup %4810 }
0x467d   :  { %3049 = vrot.lane.b32.xlu1 %v4811_v16, %s4997_s25 }
0x467e   :  { %v4813_v15 = vpop.eup %4812 }
0x467f   :  { %v3043_v21 = vadd.f32 1.0, %v4813_v15 }
0x4681   :  { %4814 = vrcp.f32 %v3043_v21 }
0x468b   :  { %v4815_v35 = vpop.eup %4814 }
0x46ef   :  { %v3050_v29 = vpop.permute.xlu1 %3049 }
0x46f0   :  { %v3052_v57 = vmul.f32 %v4815_v35, %v3050_v29 }
0x46f2   :  { %3054 = vrot.lane.b32.xlu0 %v3052_v57, %s5005_s9 }
0x46f6   :  { %503 = vrot.lane.b32.xlu0 %v5186_v54, %s5005_s9  ;;  %v3046_v54 = vmul.f32 %v4815_v35, %v5716_v22 }
0x46fa   :  { %1235 = vrot.lane.b32.xlu0 %v5369_v20, %s5005_s9 }
0x46fe   :  { %1967 = vrot.lane.b32.xlu0 %v5543_v32, %s5005_s9 }
0x4702   :  { %2699 = vrot.lane.b32.xlu0 %v5722_v52, %s5005_s9 }
0x4706   :  { %247 = vrot.lane.b32.xlu0 %v5108_v42, %s5009_s0 }
0x470a   :  { %625 = vrot.lane.b32.xlu0 %v5223_v34, %s5009_s0 }
0x470e   :  { %991 = vrot.lane.b32.xlu0 %v5315_v30, %s5009_s0 }
0x4712   :  { %1357 = vrot.lane.b32.xlu0 %v5402_v3, %s5009_s0 }
0x4716   :  { %1723 = vrot.lane.b32.xlu0 %v5489_v18, %s5009_s0 }
0x471a   :  { %2089 = vrot.lane.b32.xlu0 %v5576_v31, %s5009_s0  ;;  %v2815_v31 = vmul.f32 %v2797_v63, %v5201_v5 }
0x471e   :  { %2455 = vrot.lane.b32.xlu0 %v5668_v53, %s5009_s0 }
0x4722   :  { %2811 = vrot.lane.b32.xlu0 %v2809_v33, %s5007_s15 }
0x4726   :  { %2821 = vrot.lane.b32.xlu0 %v5755_v11, %s5009_s0 }
0x4764   :  { %v3055_v20 = vpop.permute.xlu0 %3054 }
0x4765   :  { %v5816_v32 = vadd.f32 %v3055_v20, %v3046_v54 }
0x4767   :  { %4816 = vtanh.f32 %v5816_v32 }
0x4768   :  { %v504_v52 = vpop.permute.xlu0 %503 }
0x4769   :  { %506 = vst.msk [vmem:[#allocation2] sm:$0xff] %vm139_vm1, %v504_v52 }
0x476c   :  { %v1236_v4 = vpop.permute.xlu0 %1235 }
0x476d   :  { %1238 = vst.msk [vmem:[#allocation2 + $0x10] sm:$0xff] %vm139_vm1, %v1236_v4 }
0x4770   :  { %v1968_v56 = vpop.permute.xlu0 %1967 }
0x4771   :  { %v4817_v36 = vpop.eup %4816  ;;  %1970 = vst.msk [vmem:[#allocation2 + $0x20] sm:$0xff] %vm139_vm1, %v1968_v56 }
0x4772   :  { %3060 = vrot.lane.b32.xlu1 %v4817_v36, %s4997_s25 }
0x4774   :  { %v2700_v22 = vpop.permute.xlu0 %2699 }
0x4775   :  { %2702 = vst.msk [vmem:[#allocation2 + $0x30] sm:$0xff] %vm139_vm1, %v2700_v22 }
0x4776   :  { %869 = vrot.lane.b32.xlu1 %v5277_v50, %s5005_s9 }
0x477a   :  { %1601 = vrot.lane.b32.xlu1 %v5456_v61, %s5005_s9 }
0x477e   :  { %2333 = vrot.lane.b32.xlu1 %v5630_v59, %s5005_s9  ;;  %v248_v59 = vpop.permute.xlu0 %247 }
0x4782   :  { %251 = vrot.lane.b32.xlu1 %v216_v7, %s5010_s1  ;;  %v3069_v7 = vld [vmem:[#allocation2] sm:$0xff]  ;;  %v626_v39 = vpop.permute.xlu0 %625 }
0x4786   :  { %629 = vrot.lane.b32.xlu1 %v601_v60, %s5010_s1 }
0x47e4   :  { %v3061_v38 = vpop.permute.xlu1 %3060 }
0x47e5   :  { %v5836_v40 = vmul.f32 %v4815_v35, %v3061_v38 }
0x47e7   :  { %3065 = vrot.lane.b32.xlu1 %v5836_v40, %s5005_s9 }
0x47e8   :  { %v870_v50 = vpop.permute.xlu1 %869 }
0x47e9   :  { %872 = vst.msk [vmem:[#allocation2 + $0x8] sm:$0xff] %vm139_vm1, %v870_v50 }
0x47eb   :  { %995 = vrot.lane.b32.xlu1 %v967_v2, %s5010_s1  ;;  %v3071_v2 = vld [vmem:[#allocation2 + $0x10] sm:$0xff] }
0x47ec   :  { %v1602_v61 = vpop.permute.xlu1 %1601 }
0x47ed   :  { %1604 = vst.msk [vmem:[#allocation2 + $0x18] sm:$0xff] %vm139_vm1, %v1602_v61 }
0x47ef   :  { %1361 = vrot.lane.b32.xlu1 %v1333_v12, %s5010_s1 }
0x47f0   :  { %v2334_v42 = vpop.permute.xlu1 %2333  ;;  %v3070_v34 = vld [vmem:[#allocation2 + $0x8] sm:$0xff] }
0x47f1   :  { %2336 = vst.msk [vmem:[#allocation2 + $0x28] sm:$0xff] %vm139_vm1, %v2334_v42  ;;  %v3077_v60 = vpack.c.bf16 %v3070_v34, %v3069_v7 }
0x47f3   :  { %1727 = vrot.lane.b32.xlu1 %v1699_v49, %s5010_s1  ;;  %4469 = vmatprep.mubr.msk.bf16.mxu0 %vm139_vm1, %v3077_v60  ;;  %v3073_v49 = vld [vmem:[#allocation2 + $0x20] sm:$0xff] }
0x47f4   :  { %v252_v30 = vpop.permute.xlu1 %251  ;;  %v3072_v9 = vld [vmem:[#allocation2 + $0x18] sm:$0xff] }
0x47f5   :  { %v255_v3 = vsel %vm254_vm4, %v248_v59, %v252_v30  ;;  %v3078_v12 = vpack.c.bf16 %v3072_v9, %v3071_v2 }
0x47f6   :  { %257 = vst.msk [vmem:[#allocation3] sm:$0xff] %vm256_vm5, %v255_v3 }
0x47f7   :  { %2093 = vrot.lane.b32.xlu1 %v2065_v44, %s5010_s1  ;;  %4470 = vmatmul.mubr.msk.bf16.vlgmr.msra.gmra.mrb[60].mxu0 %vm139_vm1, %v3078_v12  ;;  %v992_v44 = vpop.permute.xlu0 %991 }
0x47f8   :  { %v630_v18 = vpop.permute.xlu1 %629  ;;  %v3074_v41 = vld [vmem:[#allocation2 + $0x28] sm:$0xff] }
0x47f9   :  { %v632_v43 = vsel %vm254_vm4, %v626_v39, %v630_v18  ;;  %v3079_v45 = vpack.c.bf16 %v3074_v41, %v3073_v49 }
0x47fa   :  { %633 = vst.msk [vmem:[#allocation3 + $0x8] sm:$0xff] %vm256_vm5, %v632_v43 }
0x47fb   :  { %2459 = vrot.lane.b32.xlu1 %v2431_v13, %s5010_s1  ;;  %4473 = vmatprep.mubr.msk.bf16.mxu0 %vm139_vm1, %v3079_v45  ;;  %v1358_v26 = vpop.permute.xlu0 %1357  ;;  %v3075_v13 = vld [vmem:[#allocation2 + $0x30] sm:$0xff] }
0x47ff   :  { %2817 = vrot.lane.b32.xlu1 %v2815_v31, %s5008_s16  ;;  %v1724_v11 = vpop.permute.xlu0 %1723 }
0x4803   :  { %2825 = vrot.lane.b32.xlu1 %v2797_v63, %s5010_s1  ;;  %v2090_v24 = vpop.permute.xlu0 %2089 }
0x4807   :  { %v2456_v8 = vpop.permute.xlu0 %2455 }
0x480b   :  { %v5880_v6 = vpop.permute.xlu0 %2811 }
0x480f   :  { %v2822_v17 = vpop.permute.xlu0 %2821 }
0x4859   :  { %v3066_v1 = vpop.permute.xlu1 %3065 }
0x485a   :  { %3068 = vst.msk [vmem:[#allocation2 + $0x38] sm:$0xff] %vm139_vm1, %v3066_v1 }
0x485d   :  { %v996_v14 = vpop.permute.xlu1 %995 }
0x485e   :  { %v998_v19 = vsel %vm254_vm4, %v992_v44, %v996_v14 }
0x485f   :  { %999 = vst.msk [vmem:[#allocation3 + $0x10] sm:$0xff] %vm256_vm5, %v998_v19 }
0x4861   :  { %v1362_v53 = vpop.permute.xlu1 %1361  ;;  %v3076_v28 = vld [vmem:[#allocation2 + $0x38] sm:$0xff] }
0x4862   :  { %v1364_v5 = vsel %vm254_vm4, %v1358_v26, %v1362_v53  ;;  %v3080_v51 = vpack.c.bf16 %v3076_v28, %v3075_v13 }
0x4863   :  { %1365 = vst.msk [vmem:[#allocation3 + $0x18] sm:$0xff] %vm256_vm5, %v1364_v5 }
0x4864   :  { %4474 = vmatmul.mubr.msk.bf16.gmra.mrb[64].mxu0 %vm139_vm1, %v3080_v51 }
0x4865   :  { %v1728_v58 = vpop.permute.xlu1 %1727 }
0x4866   :  { %v1730_v46 = vsel %vm254_vm4, %v1724_v11, %v1728_v58 }
0x4867   :  { %1731 = vst.msk [vmem:[#allocation3 + $0x20] sm:$0xff] %vm256_vm5, %v1730_v46 }
0x4869   :  { %v2094_v48 = vpop.permute.xlu1 %2093 }
0x486a   :  { %v2096_v0 = vsel %vm254_vm4, %v2090_v24, %v2094_v48 }
0x486b   :  { %2097 = vst.msk [vmem:[#allocation3 + $0x28] sm:$0xff] %vm256_vm5, %v2096_v0 }
0x486d   :  { %v2460_v62 = vpop.permute.xlu1 %2459 }
0x486e   :  { %v2462_v37 = vsel %vm254_vm4, %v2456_v8, %v2460_v62 }
0x486f   :  { %2463 = vst.msk [vmem:[#allocation3 + $0x30] sm:$0xff] %vm256_vm5, %v2462_v37 }
0x4871   :  { %v5883_v16 = vpop.permute.xlu1 %2817 }
0x4875   :  { %v2826_v15 = vpop.permute.xlu1 %2825 }
0x4876   :  { %v2828_v21 = vsel %vm254_vm4, %v2822_v17, %v2826_v15 }
0x4877   :  { %2829 = vst.msk [vmem:[#allocation3 + $0x38] sm:$0xff] %vm256_vm5, %v2828_v21 }
0x48ca   :  { %v5887_v35 = vpop.f32.mrb[60].mxu0 }
0x48cb   :  { %v5889_v29 = vpop.f32.mrb[61].mxu0  ;;  %v3278_v55 = vsel %vm3271_vm7, %v5887_v35, -inf  ;;  %v3181_v27 = vsel %vm3174_vm6, %v5887_v35, -inf  ;;  %v3408_v22 = vsel %vm3401_vm8, %v5887_v35, -inf }
0x48cc   :  { %v5891_v57 = vpop.f32.mrb[62].mxu0  ;;  %v3175_v33 = vsel %vm3174_vm6, %v5889_v29, -inf  ;;  %v3272_v54 = vsel %vm3271_vm7, %v5889_v29, -inf  ;;  %v3402_v4 = vsel %vm3401_vm8, %v5889_v29, -inf }
0x48cd   :  { %v5897_v20 = vpop.f32.mrb[63].mxu0  ;;  %3176 = vmax.xlane.f32.xlu0 %v3175_v33  ;;  %3273 = vmax.xlane.f32.xlu1 %v3272_v54  ;;  %v3281_v56 = vsel %vm3271_vm7, %v5891_v57, -inf  ;;  %v3411_v38 = vsel %vm3401_vm8, %v5891_v57, -inf  ;;  %v3184_v61 = vsel %vm3174_vm6, %v5891_v57, -inf }
0x48ce   :  { %v3275_v52 = vsel %vm3271_vm7, %v5897_v20, -inf  ;;  %v3405_v36 = vsel %vm3401_vm8, %v5897_v20, -inf  ;;  %v3178_v50 = vsel %vm3174_vm6, %v5897_v20, -inf }
0x48d1   :  { %3276 = vmax.xlane.f32.xlu0 %v3275_v52  ;;  %3403 = vmax.xlane.f32.xlu1 %v3402_v4 }
0x48d5   :  { %3279 = vmax.xlane.f32.xlu0 %v3278_v55  ;;  %3282 = vmax.xlane.f32.xlu1 %v3281_v56 }
0x48d9   :  { %3406 = vmax.xlane.f32.xlu0 %v3405_v36  ;;  %3182 = vmax.xlane.f32.xlu1 %v3181_v27 }
0x48dd   :  { %3409 = vmax.xlane.f32.xlu0 %v3408_v22 }
0x48e1   :  { %3412 = vmax.xlane.f32.xlu0 %v3411_v38 }
0x48e5   :  { %3179 = vmax.xlane.f32.xlu0 %v3178_v50 }
0x48e9   :  { %3185 = vmax.xlane.f32.xlu0 %v3184_v61 }
0x4937   :  { %v5919_v42 = vpop.f32.mrb[64].mxu0 }
0x4938   :  { %v5921_v7 = vpop.f32.mrb[65].mxu0 }
0x4939   :  { %v5923_v34 = vpop.f32.mrb[66].mxu0 }
0x493a   :  { %v5925_v60 = vpop.f32.mrb[67].mxu0 }
0x495a   :  { %v3177_v59 = vpop.xlane.xlu0 %3176  ;;  %v3274_v30 = vpop.xlane.xlu1 %3273 }
0x495b   :  { %v5928_v2 = vsub.f32 %v5889_v29, %v3177_v59  ;;  %v5941_v53 = vsub.f32 %v5889_v29, %v3274_v30 }
0x495d   :  { %v3207_v9 = vmul.f32 1.442695, %v5928_v2  ;;  %v3304_v24 = vmul.f32 1.442695, %v5941_v53 }
0x495e   :  { %v3277_v3 = vpop.xlane.xlu0 %3276  ;;  %v3404_v12 = vpop.xlane.xlu1 %3403 }
0x495f   :  { %4818 = vpow2.f32 %v3207_v9  ;;  %v5957_v0 = vsub.f32 %v5889_v29, %v3404_v12  ;;  %v5968_v29 = vsub.f32 %v5897_v20, %v3277_v3 }
0x4961   :  { %v3434_v15 = vmul.f32 1.442695, %v5957_v0  ;;  %v3306_v55 = vmul.f32 1.442695, %v5968_v29 }
0x4962   :  { %v3280_v39 = vpop.xlane.xlu0 %3279  ;;  %v3283_v18 = vpop.xlane.xlu1 %3282 }
0x4963   :  { %v5950_v58 = vsub.f32 %v5887_v35, %v3280_v39  ;;  %v5954_v8 = vsub.f32 %v5891_v57, %v3283_v18 }
0x4965   :  { %v3308_v46 = vmul.f32 1.442695, %v5950_v58  ;;  %v3310_v62 = vmul.f32 1.442695, %v5954_v8 }
0x4966   :  { %v3407_v49 = vpop.xlane.xlu0 %3406  ;;  %v3183_v41 = vpop.xlane.xlu1 %3182 }
0x4967   :  { %v5932_v43 = vsub.f32 %v5887_v35, %v3183_v41 }
0x4969   :  { %v4819_v45 = vpop.eup %4818  ;;  %v3211_v63 = vmul.f32 1.442695, %v5932_v43 }
0x496a   :  { %v3410_v31 = vpop.xlane.xlu0 %3409  ;;  %v3223_v44 = vsel %vm3174_vm6, %v4819_v45, 0.0 }
0x496b   :  { %3224 = vadd.xlane.f32.xlu1 %v3223_v44  ;;  %4820 = vpow2.f32 %v3211_v63  ;;  %v5963_v21 = vsub.f32 %v5887_v35, %v3410_v31  ;;  %v5974_v35 = vsub.f32 %v5897_v20, %v3407_v49 }
0x496d   :  { %v3438_v52 = vmul.f32 1.442695, %v5963_v21  ;;  %v3436_v36 = vmul.f32 1.442695, %v5974_v35 }
0x496e   :  { %v3413_v26 = vpop.xlane.xlu0 %3412 }
0x496f   :  { %v5979_v27 = vsub.f32 %v5891_v57, %v3413_v26 }
0x4971   :  { %v3440_v38 = vmul.f32 1.442695, %v5979_v27 }
0x4972   :  { %v3180_v1 = vpop.xlane.xlu0 %3179 }
0x4973   :  { %v5937_v11 = vsub.f32 %v5897_v20, %v3180_v1 }
0x4975   :  { %v3209_v14 = vmul.f32 1.442695, %v5937_v11  ;;  %v4821_v19 = vpop.eup %4820 }
0x4976   :  { %v3186_v13 = vpop.xlane.xlu0 %3185  ;;  %v3229_v5 = vsel %vm3174_vm6, %v4821_v19, 0.0 }
0x4977   :  { %4822 = vpow2.f32 %v3209_v14  ;;  %v5944_v28 = vsub.f32 %v5891_v57, %v3186_v13  ;;  %3230 = vadd.xlane.f32.xlu1 %v3229_v5 }
0x4979   :  { %v3213_v51 = vmul.f32 1.442695, %v5944_v28 }
0x497b   :  { %4824 = vpow2.f32 %v3213_v51 }
0x497c   :  { %4826 = vpow2.f32 %v3304_v24 }
0x497d   :  { %4828 = vpow2.f32 %v3308_v46 }
0x497e   :  { %4830 = vpow2.f32 %v3310_v62  ;;  %v5997_v62 = vld [vmem:[%s6360_s2 + $0x18] sm:$0xff] }
0x497f   :  { %4832 = vpow2.f32 %v3434_v15  ;;  %v6003_v15 = vld [vmem:[%s6360_s2 + $0x20] sm:$0xff] }
0x4980   :  { %4834 = vpow2.f32 %v3438_v52 }
0x4981   :  { %v4823_v48 = vpop.eup %4822  ;;  %4836 = vpow2.f32 %v3306_v55 }
0x4982   :  { %v3226_v37 = vsel %vm3174_vm6, %v4823_v48, 0.0  ;;  %4838 = vpow2.f32 %v3436_v36 }
0x4983   :  { %3227 = vadd.xlane.f32.xlu0 %v3226_v37  ;;  %4840 = vpow2.f32 %v3440_v38  ;;  %v6019_v38 = vld [vmem:[%s6360_s2 + $0x28] sm:$0xff] }
0x4985   :  { %v4825_v17 = vpop.eup %4824 }
0x4986   :  { %v3232_v33 = vsel %vm3174_vm6, %v4825_v17, 0.0  ;;  %v4827_v54 = vpop.eup %4826 }
0x4987   :  { %3233 = vadd.xlane.f32.xlu0 %v3232_v33  ;;  %v4829_v4 = vpop.eup %4828 }
0x4988   :  { %3328 = vrot.lane.b32.xlu1 %v4827_v54, %s5011_s11  ;;  %v4831_v56 = vpop.eup %4830 }
0x4989   :  { %v4833_v22 = vpop.eup %4832 }
0x498a   :  { %v4835_v50 = vpop.eup %4834 }
0x498b   :  { %v4837_v20 = vpop.eup %4836 }
0x498c   :  { %3332 = vrot.lane.b32.xlu1 %v4829_v4, %s5011_s11  ;;  %v4839_v61 = vpop.eup %4838 }
0x498d   :  { %v4841_v59 = vpop.eup %4840 }
0x4990   :  { %3334 = vrot.lane.b32.xlu1 %v4831_v56, %s5011_s11 }
0x4994   :  { %3458 = vrot.lane.b32.xlu1 %v4833_v22, %s5012_s12  ;;  %v6014_v22 = vld [vmem:[%s6360_s2 + $0x30] sm:$0xff] }
0x4998   :  { %3462 = vrot.lane.b32.xlu1 %v4835_v50, %s5012_s12 }
0x499d   :  { %3330 = vrot.lane.b32.xlu0 %v4837_v20, %s5011_s11 }
0x49a1   :  { %3460 = vrot.lane.b32.xlu0 %v4839_v61, %s5012_s12 }
0x49a5   :  { %3464 = vrot.lane.b32.xlu0 %v4841_v59, %s5012_s12 }
0x49f8   :  { %v3225_v57 = vpop.xlane.xlu1 %3224 }
0x49f9   :  { %4842 = vlog2.f32 %v3225_v57 }
0x4a03   :  { %v4843_v63 = vpop.eup %4842 }
0x4a04   :  { %v3231_v30 = vpop.xlane.xlu1 %3230  ;;  %v3248_v31 = vmul.f32 0.6931472, %v4843_v63 }
0x4a05   :  { %4844 = vlog2.f32 %v3231_v30 }
0x4a06   :  { %v3263_v51 = vsub.f32 %v5928_v2, %v3248_v31 }
0x4a08   :  { %v3329_v9 = vpop.permute.xlu1 %3328  ;;  %v3539_v52 = vmul.f32 %v5997_v62, %v3263_v51  ;;  %v3414_v51 = vsel %vm3401_vm8, %v5921_v7, -inf }
0x4a09   :  { %v3353_v3 = vsel %vm3352_vm9, %v3329_v9, 0.0 }
0x4a0a   :  { %3354 = vadd.xlane.f32.xlu0 %v3353_v3  ;;  %v3547_v20 = vsel %vm3174_vm6, %v3539_v52, 0.0 }
0x4a0c   :  { %v3333_v12 = vpop.permute.xlu1 %3332 }
0x4a0d   :  { %v3359_v39 = vsel %vm3352_vm9, %v3333_v12, 0.0 }
0x4a0e   :  { %3360 = vadd.xlane.f32.xlu0 %v3359_v39 }
0x4a0f   :  { %v4845_v14 = vpop.eup %4844 }
0x4a10   :  { %v3228_v18 = vpop.xlane.xlu0 %3227  ;;  %v3335_v49 = vpop.permute.xlu1 %3334  ;;  %v3252_v24 = vmul.f32 0.6931472, %v4845_v14 }
0x4a11   :  { %4846 = vlog2.f32 %v3228_v18  ;;  %v3362_v41 = vsel %vm3352_vm9, %v3335_v49, 0.0 }
0x4a12   :  { %3363 = vadd.xlane.f32.xlu0 %v3362_v41  ;;  %v3265_v36 = vsub.f32 %v5932_v43, %v3252_v24  ;;  %v3196_v24 = vsel %vm3174_vm6, %v5923_v34, -inf }
0x4a14   :  { %v3234_v45 = vpop.xlane.xlu0 %3233  ;;  %v3459_v44 = vpop.permute.xlu1 %3458  ;;  %v3541_v61 = vmul.f32 %v6019_v38, %v3265_v36 }
0x4a15   :  { %4848 = vlog2.f32 %v3234_v45  ;;  %v3483_v48 = vsel %vm3482_vm10, %v3459_v44, 0.0 }
0x4a16   :  { %v3553_v59 = vsel %vm3174_vm6, %v3541_v61, 0.0 }
0x4a18   :  { %v3331_v26 = vpop.permute.xlu0 %3330  ;;  %v3463_v37 = vpop.permute.xlu1 %3462 }
0x4a19   :  { %v3356_v1 = vsel %vm3352_vm9, %v3331_v26, 0.0  ;;  %v3489_v4 = vsel %vm3482_vm10, %v3463_v37, 0.0  ;;  %v3187_v37 = vsel %vm3174_vm6, %v5921_v7, -inf }
0x4a1a   :  { %3357 = vadd.xlane.f32.xlu1 %v3356_v1 }
0x4a1b   :  { %v4847_v19 = vpop.eup %4846 }
0x4a1c   :  { %v3250_v13 = vmul.f32 0.6931472, %v4847_v19  ;;  %v3461_v5 = vpop.permute.xlu0 %3460 }
0x4a1d   :  { %v3486_v46 = vsel %vm3482_vm10, %v3461_v5, 0.0  ;;  %v3420_v5 = vsel %vm3401_vm8, %v5919_v42, -inf }
0x4a1e   :  { %3487 = vadd.xlane.f32.xlu0 %v3486_v46  ;;  %3484 = vadd.xlane.f32.xlu1 %v3483_v48  ;;  %v3264_v17 = vsub.f32 %v5937_v11, %v3250_v13  ;;  %v3284_v46 = vsel %vm3271_vm7, %v5921_v7, -inf  ;;  %v3417_v48 = vsel %vm3401_vm8, %v5925_v60, -inf }
0x4a1f   :  { %v4849_v2 = vpop.eup %4848 }
0x4a20   :  { %v3254_v33 = vmul.f32 0.6931472, %v4849_v2  ;;  %v3465_v54 = vpop.permute.xlu0 %3464  ;;  %v3540_v56 = vmul.f32 %v6003_v15, %v3264_v17  ;;  %v3190_v17 = vsel %vm3174_vm6, %v5925_v60, -inf  ;;  %v3293_v2 = vsel %vm3271_vm7, %v5923_v34, -inf }
0x4a21   :  { %v3492_v55 = vsel %vm3482_vm10, %v3465_v54, 0.0  ;;  %v3287_v54 = vsel %vm3271_vm7, %v5925_v60, -inf }
0x4a22   :  { %3493 = vadd.xlane.f32.xlu0 %v3492_v55  ;;  %3490 = vadd.xlane.f32.xlu1 %v3489_v4  ;;  %v3266_v11 = vsub.f32 %v5944_v28, %v3254_v33  ;;  %v3550_v50 = vsel %vm3174_vm6, %v3540_v56, 0.0  ;;  %v3423_v33 = vsel %vm3401_vm8, %v5923_v34, -inf }
0x4a24   :  { %v3542_v43 = vmul.f32 %v6014_v22, %v3266_v11 }
0x4a26   :  { %3551 = vadd.xlane.f32.xlu0 %v3550_v50  ;;  %3548 = vadd.xlane.f32.xlu1 %v3547_v20  ;;  %v3556_v28 = vsel %vm3174_vm6, %v3542_v43, 0.0 }
0x4a2a   :  { %3557 = vadd.xlane.f32.xlu0 %v3556_v28  ;;  %3554 = vadd.xlane.f32.xlu1 %v3553_v59 }
0x4a97   :  { %v3355_v57 = vpop.xlane.xlu0 %3354 }
0x4a98   :  { %4850 = vlog2.f32 %v3355_v57 }
0x4a9b   :  { %v3361_v30 = vpop.xlane.xlu0 %3360 }
0x4a9c   :  { %4852 = vlog2.f32 %v3361_v30 }
0x4a9f   :  { %v3364_v9 = vpop.xlane.xlu0 %3363 }
0x4aa0   :  { %4854 = vlog2.f32 %v3364_v9 }
0x4aa2   :  { %v4851_v3 = vpop.eup %4850 }
0x4aa3   :  { %v3378_v18 = vmul.f32 0.6931472, %v4851_v3 }
0x4aa5   :  { %v3393_v63 = vsub.f32 %v5941_v53, %v3378_v18 }
0x4aa6   :  { %v4853_v12 = vpop.eup %4852 }
0x4aa7   :  { %v3358_v39 = vpop.xlane.xlu1 %3357  ;;  %v3382_v49 = vmul.f32 0.6931472, %v4853_v12  ;;  %v3571_v26 = vmul.f32 %v5997_v62, %v3393_v63 }
0x4aa8   :  { %4856 = vlog2.f32 %v3358_v39 }
0x4aa9   :  { %v3395_v41 = vsub.f32 %v5950_v58, %v3382_v49 }
0x4aaa   :  { %v4855_v45 = vpop.eup %4854 }
0x4aab   :  { %v3573_v31 = vmul.f32 %v6019_v38, %v3395_v41  ;;  %v3384_v44 = vmul.f32 0.6931472, %v4855_v45  ;;  %v6063_v52 = vpop.xlane.xlu1 %3484  ;;  %v6067_v55 = vpop.xlane.xlu0 %3487 }
0x4aad   :  { %3591 = vrot.lane.b32.xlu1 %v3573_v31, %s5011_s11  ;;  %v3396_v1 = vsub.f32 %v5954_v8, %v3384_v44  ;;  %v3290_v8 = vsel %vm3271_vm7, %v5919_v42, -inf }
0x4aaf   :  { %v3574_v13 = vmul.f32 %v6014_v22, %v3396_v1  ;;  %v6065_v4 = vpop.xlane.xlu1 %3490  ;;  %v6071_v36 = vpop.xlane.xlu0 %3493 }
0x4ab1   :  { %3587 = vrot.lane.b32.xlu1 %v3571_v26, %s5011_s11 }
0x4ab2   :  { %v4857_v14 = vpop.eup %4856 }
0x4ab3   :  { %v3380_v19 = vmul.f32 0.6931472, %v4857_v14  ;;  %v6069_v56 = vpop.xlane.xlu1 %3548  ;;  %v6075_v50 = vpop.xlane.xlu0 %3551 }
0x4ab5   :  { %v3394_v58 = vsub.f32 %v5968_v29, %v3380_v19  ;;  %3593 = vrot.lane.b32.xlu1 %v3574_v13, %s5011_s11  ;;  %v3193_v29 = vsel %vm3174_vm6, %v5919_v42, -inf }
0x4ab7   :  { %v3572_v53 = vmul.f32 %v6003_v15, %v3394_v58  ;;  %v6073_v11 = vpop.xlane.xlu1 %3554  ;;  %v6079_v43 = vpop.xlane.xlu0 %3557 }
0x4ab9   :  { %3589 = vrot.lane.b32.xlu0 %v3572_v53, %s5011_s11 }
0x4ad8   :  { %3421 = vmax.xlane.f32.xlu0 %v3420_v5 }
0x4ad9   :  { %3291 = vmax.xlane.f32.xlu1 %v3290_v8 }
0x4adc   :  { %3415 = vmax.xlane.f32.xlu0 %v3414_v51 }
0x4add   :  { %3194 = vmax.xlane.f32.xlu1 %v3193_v29 }
0x4ae0   :  { %3197 = vmax.xlane.f32.xlu0 %v3196_v24 }
0x4ae1   :  { %3285 = vmax.xlane.f32.xlu1 %v3284_v46 }
0x4ae4   :  { %3418 = vmax.xlane.f32.xlu0 %v3417_v48 }
0x4ae5   :  { %3188 = vmax.xlane.f32.xlu1 %v3187_v37 }
0x4ae8   :  { %3191 = vmax.xlane.f32.xlu0 %v3190_v17 }
0x4ae9   :  { %3294 = vmax.xlane.f32.xlu1 %v3293_v2 }
0x4aed   :  { %3424 = vmax.xlane.f32.xlu1 %v3423_v33 }
0x4af1   :  { %3288 = vmax.xlane.f32.xlu1 %v3287_v54 }
0x4b1f   :  { %v6077_v20 = vpop.permute.xlu1 %3591 }
0x4b23   :  { %v6081_v61 = vpop.permute.xlu1 %3587 }
0x4b27   :  { %v6085_v59 = vpop.permute.xlu1 %3593 }
0x4b2b   :  { %v6083_v28 = vpop.permute.xlu0 %3589 }
0x4b65   :  { %v3422_v57 = vpop.xlane.xlu0 %3421 }
0x4b66   :  { %v6088_v30 = vsub.f32 %v5919_v42, %v3422_v57  ;;  %v3292_v9 = vpop.xlane.xlu1 %3291 }
0x4b67   :  { %v6092_v12 = vsub.f32 %v5919_v42, %v3292_v9 }
0x4b68   :  { %v3446_v3 = vmul.f32 1.442695, %v6088_v30 }
0x4b69   :  { %v3316_v39 = vmul.f32 1.442695, %v6092_v12  ;;  %v3416_v49 = vpop.xlane.xlu0 %3415 }
0x4b6a   :  { %4858 = vpow2.f32 %v3446_v3  ;;  %v3195_v18 = vpop.xlane.xlu1 %3194  ;;  %v6096_v45 = vsub.f32 %v5921_v7, %v3416_v49 }
0x4b6b   :  { %4860 = vpow2.f32 %v3316_v39  ;;  %v6108_v13 = vsub.f32 %v5919_v42, %v3195_v18 }
0x4b6c   :  { %v3442_v26 = vmul.f32 1.442695, %v6096_v45 }
0x4b6d   :  { %v3219_v53 = vmul.f32 1.442695, %v6108_v13  ;;  %v3198_v5 = vpop.xlane.xlu0 %3197 }
0x4b6e   :  { %v3286_v41 = vpop.xlane.xlu1 %3285  ;;  %v6115_v51 = vsub.f32 %v5923_v34, %v3198_v5  ;;  %v3611_v5 = vsel %vm3352_vm9, %v6081_v61, 0.0 }
0x4b6f   :  { %v6099_v63 = vsub.f32 %v5921_v7, %v3286_v41 }
0x4b70   :  { %v3221_v24 = vmul.f32 1.442695, %v6115_v51 }
0x4b71   :  { %v3312_v31 = vmul.f32 1.442695, %v6099_v63  ;;  %v3419_v54 = vpop.xlane.xlu0 %3418 }
0x4b72   :  { %v3189_v58 = vpop.xlane.xlu1 %3188  ;;  %v6130_v18 = vsub.f32 %v5925_v60, %v3419_v54 }
0x4b73   :  { %4862 = vpow2.f32 %v3312_v31  ;;  %v6112_v8 = vsub.f32 %v5921_v7, %v3189_v58 }
0x4b74   :  { %v4859_v44 = vpop.eup %4858  ;;  %4864 = vpow2.f32 %v3442_v26  ;;  %v3444_v31 = vmul.f32 1.442695, %v6130_v18 }
0x4b75   :  { %3470 = vrot.lane.b32.xlu0 %v4859_v44, %s5012_s12  ;;  %v4861_v1 = vpop.eup %4860  ;;  %4866 = vpow2.f32 %v3219_v53  ;;  %v3215_v29 = vmul.f32 1.442695, %v6112_v8 }
0x4b76   :  { %3340 = vrot.lane.b32.xlu1 %v4861_v1, %s5011_s11  ;;  %v3295_v46 = vpop.xlane.xlu1 %3294 }
0x4b77   :  { %4868 = vpow2.f32 %v3215_v29  ;;  %v6121_v7 = vsub.f32 %v5923_v34, %v3295_v46  ;;  %v3617_v29 = vsel %vm3352_vm9, %v6077_v20, 0.0 }
0x4b78   :  { %4870 = vpow2.f32 %v3221_v24  ;;  %v3614_v24 = vsel %vm3352_vm9, %v6083_v28, 0.0 }
0x4b79   :  { %v3318_v57 = vmul.f32 1.442695, %v6121_v7 }
0x4b7a   :  { %v3425_v17 = vpop.xlane.xlu1 %3424 }
0x4b7b   :  { %v6126_v9 = vsub.f32 %v5923_v34, %v3425_v17  ;;  %4872 = vpow2.f32 %v3318_v57 }
0x4b7d   :  { %v4863_v14 = vpop.eup %4862  ;;  %v3448_v49 = vmul.f32 1.442695, %v6126_v9 }
0x4b7e   :  { %3336 = vrot.lane.b32.xlu0 %v4863_v14, %s5011_s11  ;;  %v4865_v19 = vpop.eup %4864  ;;  %v3289_v39 = vpop.xlane.xlu1 %3288 }
0x4b7f   :  { %v4867_v42 = vpop.eup %4866  ;;  %v6134_v41 = vsub.f32 %v5925_v60, %v3289_v39  ;;  %4874 = vpow2.f32 %v3448_v49 }
0x4b80   :  { %v3241_v48 = vsel %vm3174_vm6, %v4867_v42, 0.0  ;;  %4876 = vpow2.f32 %v3444_v31 }
0x4b81   :  { %v4869_v37 = vpop.eup %4868  ;;  %v3314_v44 = vmul.f32 1.442695, %v6134_v41 }
0x4b82   :  { %3466 = vrot.lane.b32.xlu0 %v4865_v19, %s5012_s12  ;;  %v4871_v2 = vpop.eup %4870  ;;  %v3235_v33 = vsel %vm3174_vm6, %v4869_v37, 0.0  ;;  %v3192_v19 = vpop.xlane.xlu0 %3191 }
0x4b83   :  { %v3244_v3 = vsel %vm3174_vm6, %v4871_v2, 0.0  ;;  %4878 = vpow2.f32 %v3314_v44  ;;  %v6143_v58 = vsub.f32 %v5925_v60, %v3192_v19  ;;  %v3620_v60 = vsel %vm3352_vm9, %v6085_v59, 0.0 }
0x4b85   :  { %v4873_v34 = vpop.eup %4872  ;;  %v3217_v53 = vmul.f32 1.442695, %v6143_v58 }
0x4b87   :  { %4880 = vpow2.f32 %v3217_v53 }
0x4b88   :  { %4882 = vlog2.f32 %v6063_v52 }
0x4b89   :  { %v4875_v26 = vpop.eup %4874  ;;  %4884 = vlog2.f32 %v6065_v4 }
0x4b8a   :  { %v4877_v1 = vpop.eup %4876  ;;  %4886 = vlog2.f32 %v6071_v36 }
0x4b8d   :  { %v4879_v14 = vpop.eup %4878 }
0x4b91   :  { %v4881_v46 = vpop.eup %4880 }
0x4b92   :  { %v4883_v42 = vpop.eup %4882  ;;  %v3238_v52 = vsel %vm3174_vm6, %v4881_v46, 0.0 }
0x4b9a   :  { %3242 = vadd.xlane.f32.xlu1 %v3241_v48  ;;  %v3508_v48 = vmul.f32 0.6931472, %v4883_v42 }
0x4b9c   :  { %v3523_v61 = vsub.f32 %v5957_v0, %v3508_v48 }
0x4b9e   :  { %3236 = vadd.xlane.f32.xlu1 %v3235_v33  ;;  %v3643_v37 = vmul.f32 %v5997_v62, %v3523_v61  ;;  %v4885_v62 = vpop.eup %4884  ;;  %v3537_v61 = vld [vmem:[%s6360_s2 + $0x48] sm:$0xff] }
0x4b9f   :  { %v3512_v57 = vmul.f32 0.6931472, %v4885_v62 }
0x4ba1   :  { %3245 = vadd.xlane.f32.xlu0 %v3244_v3  ;;  %v4887_v3 = vpop.eup %4886  ;;  %v3525_v49 = vsub.f32 %v5963_v21, %v3512_v57 }
0x4ba2   :  { %v3514_v39 = vmul.f32 0.6931472, %v4887_v3 }
0x4ba3   :  { %v3645_v4 = vmul.f32 %v6019_v38, %v3525_v49 }
0x4ba4   :  { %v3526_v44 = vsub.f32 %v5979_v27, %v3514_v39 }
0x4baf   :  { %3342 = vrot.lane.b32.xlu1 %v4873_v34, %s5011_s11 }
0x4bb3   :  { %3472 = vrot.lane.b32.xlu1 %v4875_v26, %s5012_s12  ;;  %v3646_v26 = vmul.f32 %v6014_v22, %v3526_v44 }
0x4bb7   :  { %3468 = vrot.lane.b32.xlu0 %v4877_v1, %s5012_s12  ;;  %3338 = vrot.lane.b32.xlu1 %v4879_v14, %s5011_s11 }
0x4bd6   :  { %3612 = vadd.xlane.f32.xlu0 %v3611_v5 }
0x4bda   :  { %3618 = vadd.xlane.f32.xlu0 %v3617_v29 }
0x4bdb   :  { %3615 = vadd.xlane.f32.xlu1 %v3614_v24 }
0x4bde   :  { %3621 = vadd.xlane.f32.xlu0 %v3620_v60 }
0x4be2   :  { %3239 = vadd.xlane.f32.xlu0 %v3238_v52 }
0x4be7   :  { %v3471_v28 = vpop.permute.xlu0 %3470 }
0x4be8   :  { %v3341_v20 = vpop.permute.xlu1 %3340  ;;  %v3501_v59 = vsel %vm3482_vm10, %v3471_v28, 0.0  ;;  %v3535_v28 = vld [vmem:[%s6360_s2 + $0x38] sm:$0xff] }
0x4be9   :  { %v3371_v17 = vsel %vm3352_vm9, %v3341_v20, 0.0 }
0x4bec   :  { %3659 = vrot.lane.b32.xlu1 %v3643_v37, %s5012_s12 }
0x4bf0   :  { %v3337_v2 = vpop.permute.xlu0 %3336 }
0x4bf1   :  { %v3365_v33 = vsel %vm3352_vm9, %v3337_v2, 0.0 }
0x4bf4   :  { %v3467_v54 = vpop.permute.xlu0 %3466 }
0x4bf5   :  { %v3495_v0 = vsel %vm3482_vm10, %v3467_v54, 0.0  ;;  %v6197_v54 = vld [vmem:[%s6360_s2 + $0x50] sm:$0xff] }
0x4c10   :  { %3372 = vadd.xlane.f32.xlu1 %v3371_v17 }
0x4c14   :  { %3502 = vadd.xlane.f32.xlu1 %v3501_v59 }
0x4c18   :  { %3366 = vadd.xlane.f32.xlu1 %v3365_v33 }
0x4c1c   :  { %3496 = vadd.xlane.f32.xlu1 %v3495_v0 }
0x4c27   :  { %v3243_v31 = vpop.xlane.xlu1 %3242 }
0x4c28   :  { %4888 = vlog2.f32 %v3243_v31 }
0x4c29   :  { %4890 = vlog2.f32 %v6067_v55 }
0x4c2b   :  { %v3237_v34 = vpop.xlane.xlu1 %3236 }
0x4c2c   :  { %4892 = vlog2.f32 %v3237_v34 }
0x4c2d   :  { %3663 = vrot.lane.b32.xlu1 %v3645_v4, %s5012_s12 }
0x4c2e   :  { %v3246_v14 = vpop.xlane.xlu0 %3245 }
0x4c2f   :  { %v3343_v36 = vpop.permute.xlu1 %3342  ;;  %4894 = vlog2.f32 %v3246_v14 }
0x4c30   :  { %v3374_v1 = vsel %vm3352_vm9, %v3343_v36, 0.0 }
0x4c31   :  { %3665 = vrot.lane.b32.xlu1 %v3646_v26, %s5012_s12  ;;  %3375 = vadd.xlane.f32.xlu0 %v3374_v1 }
0x4c32   :  { %v3469_v38 = vpop.permute.xlu0 %3468  ;;  %v4889_v5 = vpop.eup %4888 }
0x4c33   :  { %v3473_v19 = vpop.permute.xlu1 %3472  ;;  %v3498_v22 = vsel %vm3482_vm10, %v3469_v38, 0.0  ;;  %v4891_v29 = vpop.eup %4890  ;;  %v3260_v24 = vmul.f32 0.6931472, %v4889_v5 }
0x4c34   :  { %v3504_v21 = vsel %vm3482_vm10, %v3473_v19, 0.0  ;;  %v3510_v46 = vmul.f32 0.6931472, %v4891_v29 }
0x4c35   :  { %3505 = vadd.xlane.f32.xlu0 %v3504_v21  ;;  %v3269_v42 = vsub.f32 %v6108_v13, %v3260_v24 }
0x4c36   :  { %v4893_v60 = vpop.eup %4892  ;;  %v3524_v48 = vsub.f32 %v5974_v35, %v3510_v46 }
0x4c37   :  { %v3339_v53 = vpop.permute.xlu1 %3338  ;;  %v3256_v52 = vmul.f32 0.6931472, %v4893_v60  ;;  %v3545_v37 = vmul.f32 %v3537_v61, %v3269_v42 }
0x4c38   :  { %v3368_v27 = vsel %vm3352_vm9, %v3339_v53, 0.0  ;;  %v3644_v20 = vmul.f32 %v6003_v15, %v3524_v48 }
0x4c39   :  { %3369 = vadd.xlane.f32.xlu0 %v3368_v27  ;;  %v3267_v55 = vsub.f32 %v6112_v8, %v3256_v52  ;;  %v3565_v13 = vsel %vm3174_vm6, %v3545_v37, 0.0  ;;  %v4895_v2 = vpop.eup %4894 }
0x4c3a   :  { %v3262_v8 = vmul.f32 0.6931472, %v4895_v2 }
0x4c3b   :  { %v3543_v17 = vmul.f32 %v3535_v28, %v3267_v55 }
0x4c3c   :  { %v3270_v15 = vsub.f32 %v6115_v51, %v3262_v8  ;;  %v3536_v51 = vld [vmem:[%s6360_s2 + $0x40] sm:$0xff]  ;;  %s5013_s2 = smov 30  }
0x4c3d   :  { %3499 = vadd.xlane.f32.xlu0 %v3498_v22  ;;  %v3559_v35 = vsel %vm3174_vm6, %v3543_v17, 0.0 }
0x4c3e   :  { %v3546_v62 = vmul.f32 %v6197_v54, %v3270_v15 }
0x4c40   :  { %v3568_v3 = vsel %vm3174_vm6, %v3546_v62, 0.0 }
0x4c53   :  { %3661 = vrot.lane.b32.xlu0 %v3644_v20, %s5012_s12 }
0x4c55   :  { %3566 = vadd.xlane.f32.xlu1 %v3565_v13 }
0x4c59   :  { %3560 = vadd.xlane.f32.xlu1 %v3559_v35 }
0x4c63   :  { %v6189_v59 = vpop.xlane.xlu0 %3612 }
0x4c67   :  { %v6191_v33 = vpop.xlane.xlu0 %3618 }
0x4c68   :  { %v6208_v34 = vpop.xlane.xlu1 %3615 }
0x4c6b   :  { %v6199_v0 = vpop.xlane.xlu0 %3621 }
0x4c6c   :  { %v3660_v26 = vpop.permute.xlu1 %3659 }
0x4c6f   :  { %v3240_v57 = vpop.xlane.xlu0 %3239 }
0x4c70   :  { %4896 = vlog2.f32 %v3240_v57 }
0x4c72   :  { %3569 = vadd.xlane.f32.xlu0 %v3568_v3 }
0x4c7a   :  { %v4897_v39 = vpop.eup %4896 }
0x4c7b   :  { %v3258_v49 = vmul.f32 0.6931472, %v4897_v39 }
0x4c7d   :  { %v3268_v31 = vsub.f32 %v6143_v58, %v3258_v49 }
0x4c7f   :  { %v3544_v44 = vmul.f32 %v3536_v51, %v3268_v31 }
0x4c81   :  { %v3562_v4 = vsel %vm3174_vm6, %v3544_v44, 0.0  ;;  %v3683_v44 = vsel %vm3482_vm10, %v3660_v26, 0.0 }
0x4c82   :  { %3563 = vadd.xlane.f32.xlu0 %v3562_v4 }
0x4c9d   :  { %v3373_v36 = vpop.xlane.xlu1 %3372 }
0x4c9e   :  { %4898 = vlog2.f32 %v3373_v36 }
0x4ca1   :  { %v3503_v1 = vpop.xlane.xlu1 %3502 }
0x4ca5   :  { %v3367_v14 = vpop.xlane.xlu1 %3366 }
0x4ca6   :  { %4900 = vlog2.f32 %v3367_v14 }
0x4ca7   :  { %4902 = vlog2.f32 %v3503_v1 }
0x4ca8   :  { %v4899_v19 = vpop.eup %4898 }
0x4ca9   :  { %v3390_v21 = vmul.f32 0.6931472, %v4899_v19  ;;  %v3497_v53 = vpop.xlane.xlu1 %3496 }
0x4caa   :  { %4904 = vlog2.f32 %v3497_v53 }
0x4cab   :  { %v3399_v27 = vsub.f32 %v6092_v12, %v3390_v21 }
0x4cad   :  { %v3577_v58 = vmul.f32 %v3537_v61, %v3399_v27  ;;  %v3664_v31 = vpop.permute.xlu1 %3663 }
0x4caf   :  { %3599 = vrot.lane.b32.xlu0 %v3577_v58, %s5011_s11 }
0x4cb0   :  { %v4901_v38 = vpop.eup %4900 }
0x4cb1   :  { %v3386_v22 = vmul.f32 0.6931472, %v4901_v38  ;;  %v4903_v5 = vpop.eup %4902  ;;  %v3666_v36 = vpop.permute.xlu1 %3665 }
0x4cb2   :  { %v3520_v60 = vmul.f32 0.6931472, %v4903_v5 }
0x4cb3   :  { %v3397_v29 = vsub.f32 %v6099_v63, %v3386_v22 }
0x4cb4   :  { %v4905_v24 = vpop.eup %4904  ;;  %v3529_v48 = vsub.f32 %v6088_v30, %v3520_v60 }
0x4cb5   :  { %v3575_v46 = vmul.f32 %v3535_v28, %v3397_v29  ;;  %v3516_v42 = vmul.f32 0.6931472, %v4905_v24 }
0x4cb6   :  { %v3649_v12 = vmul.f32 %v3537_v61, %v3529_v48 }
0x4cb7   :  { %v3527_v52 = vsub.f32 %v6096_v45, %v3516_v42  ;;  %3595 = vrot.lane.b32.xlu0 %v3575_v46, %s5011_s11 }
0x4cb9   :  { %v3647_v55 = vmul.f32 %v3535_v28, %v3527_v52 }
0x4cbb   :  { %3667 = vrot.lane.b32.xlu0 %v3647_v55, %s5012_s12 }
0x4cbe   :  { %v3376_v37 = vpop.xlane.xlu0 %3375 }
0x4cbf   :  { %4906 = vlog2.f32 %v3376_v37  ;;  %3671 = vrot.lane.b32.xlu0 %v3649_v12, %s5012_s12  ;;  %v3744_v12 = vld [vmem:[#allocation3] sm:$0xff]  ;;  %v3747_v37 = vld [vmem:[#allocation3 + $0x18] sm:$0xff] }
0x4cc2   :  { %v3506_v20 = vpop.xlane.xlu0 %3505 }
0x4cc6   :  { %v3370_v63 = vpop.xlane.xlu0 %3369 }
0x4cc7   :  { %4908 = vlog2.f32 %v3370_v63  ;;  %v3751_v63 = vld [vmem:[#allocation3 + $0x38] sm:$0xff] }
0x4cc8   :  { %4910 = vlog2.f32 %v3506_v20  ;;  %v3749_v20 = vld [vmem:[#allocation3 + $0x28] sm:$0xff] }
0x4cc9   :  { %v4907_v13 = vpop.eup %4906 }
0x4cca   :  { %v3392_v17 = vmul.f32 0.6931472, %v4907_v13  ;;  %v3500_v35 = vpop.xlane.xlu0 %3499  ;;  %v2814_v13 = vsub.f32 %v5749_v10, %v5880_v6  ;;  %v3638_v10 = vadd.f32 %v6199_v0, %v6079_v43 }
0x4ccb   :  { %4912 = vlog2.f32 %v3500_v35 }
0x4ccc   :  { %v3400_v45 = vsub.f32 %v6121_v7, %v3392_v17 }
0x4cce   :  { %v3578_v30 = vmul.f32 %v6197_v54, %v3400_v45  ;;  %v3662_v1 = vpop.permute.xlu0 %3661  ;;  %v3635_v45 = vadd.f32 %v6189_v59, %v6069_v56 }
0x4cd0   :  { %3601 = vrot.lane.b32.xlu1 %v3578_v30, %s5011_s11  ;;  %v3637_v30 = vadd.f32 %v6191_v33, %v6073_v11 }
0x4cd1   :  { %v4909_v28 = vpop.eup %4908 }
0x4cd2   :  { %v3388_v61 = vmul.f32 0.6931472, %v4909_v28  ;;  %v4911_v2 = vpop.eup %4910  ;;  %v3636_v28 = vadd.f32 %v6208_v34, %v6075_v50 }
0x4cd3   :  { %v3522_v62 = vmul.f32 0.6931472, %v4911_v2 }
0x4cd4   :  { %v3398_v8 = vsub.f32 %v6134_v41, %v3388_v61  ;;  %v3689_v41 = vsel %vm3482_vm10, %v3664_v31, 0.0 }
0x4cd5   :  { %v4913_v15 = vpop.eup %4912  ;;  %v3530_v49 = vsub.f32 %v6126_v9, %v3522_v62  ;;  %v3686_v9 = vsel %vm3482_vm10, %v3662_v1, 0.0 }
0x4cd6   :  { %v3576_v57 = vmul.f32 %v3536_v51, %v3398_v8  ;;  %v3518_v3 = vmul.f32 0.6931472, %v4913_v15 }
0x4cd7   :  { %v3650_v4 = vmul.f32 %v6197_v54, %v3530_v49 }
0x4cd8   :  { %v3528_v39 = vsub.f32 %v6130_v18, %v3518_v3  ;;  %3597 = vrot.lane.b32.xlu1 %v3576_v57, %s5011_s11  ;;  %v3692_v18 = vsel %vm3482_vm10, %v3666_v36, 0.0 }
0x4cda   :  { %v3648_v7 = vmul.f32 %v3536_v51, %v3528_v39 }
0x4cdc   :  { %3669 = vrot.lane.b32.xlu1 %v3648_v7, %s5012_s12 }
0x4cde   :  { %3684 = vadd.xlane.f32.xlu0 %v3683_v44 }
0x4ce0   :  { %3673 = vrot.lane.b32.xlu1 %v3650_v4, %s5012_s12 }
0x4ce2   :  { %3690 = vadd.xlane.f32.xlu0 %v3689_v41  ;;  %v3567_v22 = vpop.xlane.xlu1 %3566 }
0x4ce6   :  { %3693 = vadd.xlane.f32.xlu0 %v3692_v18  ;;  %v3561_v5 = vpop.xlane.xlu1 %3560 }
0x4cff   :  { %v6232_v51 = vpop.xlane.xlu0 %3569 }
0x4d04   :  { %3687 = vadd.xlane.f32.xlu1 %v3686_v9 }
0x4d0f   :  { %v6234_v14 = vpop.xlane.xlu0 %3563 }
0x4d21   :  { %v3600_v26 = vpop.permute.xlu0 %3599 }
0x4d22   :  { %v3629_v54 = vsel %vm3352_vm9, %v3600_v26, 0.0 }
0x4d23   :  { %3630 = vadd.xlane.f32.xlu1 %v3629_v54 }
0x4d29   :  { %v3596_v19 = vpop.permute.xlu0 %3595 }
0x4d2a   :  { %v3623_v21 = vsel %vm3352_vm9, %v3596_v19, 0.0 }
0x4d2b   :  { %3624 = vadd.xlane.f32.xlu1 %v3623_v21 }
0x4d2d   :  { %v3668_v53 = vpop.permute.xlu0 %3667 }
0x4d2e   :  { %v3695_v27 = vsel %vm3482_vm10, %v3668_v53, 0.0 }
0x4d2f   :  { %3696 = vadd.xlane.f32.xlu1 %v3695_v27 }
0x4d31   :  { %v3672_v58 = vpop.permute.xlu0 %3671 }
0x4d32   :  { %v3701_v38 = vsel %vm3482_vm10, %v3672_v58, 0.0 }
0x4d33   :  { %3702 = vadd.xlane.f32.xlu1 %v3701_v38 }
0x4d42   :  { %v3602_v29 = vpop.permute.xlu1 %3601 }
0x4d43   :  { %v3632_v24 = vsel %vm3352_vm9, %v3602_v29, 0.0 }
0x4d44   :  { %3633 = vadd.xlane.f32.xlu0 %v3632_v24 }
0x4d4a   :  { %v3598_v60 = vpop.permute.xlu1 %3597 }
0x4d4b   :  { %v3626_v46 = vsel %vm3352_vm9, %v3598_v60, 0.0 }
0x4d4c   :  { %3627 = vadd.xlane.f32.xlu0 %v3626_v46  ;;  %v4917_v46 = vld [vmem:[#allocation2 + $0x18] sm:$0xff] }
0x4d4e   :  { %v3670_v42 = vpop.permute.xlu1 %3669 }
0x4d4f   :  { %v3698_v52 = vsel %vm3482_vm10, %v3670_v42, 0.0 }
0x4d50   :  { %3699 = vadd.xlane.f32.xlu0 %v3698_v52 }
0x4d52   :  { %v3674_v48 = vpop.permute.xlu1 %3673 }
0x4d53   :  { %v3704_v55 = vsel %vm3482_vm10, %v3674_v48, 0.0 }
0x4d54   :  { %3705 = vadd.xlane.f32.xlu0 %v3704_v55 }
0x4d6a   :  { %3760 = vrot.lane.b32.xlu0 %v3744_v12, %s5005_s9  ;;  %v4918_v12 = vld [vmem:[#allocation2 + $0x28] sm:$0xff] }
0x4d6b   :  { %v3685_v17 = vpop.xlane.xlu0 %3684 }
0x4d6c   :  { %v3707_v61 = vadd.f32 %v3685_v17, %v3635_v45  ;;  %v4919_v17 = vld [vmem:[#allocation2 + $0x38] sm:$0xff] }
0x4d6e   :  { %3766 = vrot.lane.b32.xlu0 %v3747_v37, %s5005_s9  ;;  %v3715_v15 = vsel %vm254_vm4, %v3707_v61, 0.0 }
0x4d6f   :  { %v3691_v35 = vpop.xlane.xlu0 %3690 }
0x4d70   :  { %v6261_v6 = vadd.f32 %v3691_v35, %v3637_v30 }
0x4d72   :  { %3770 = vrot.lane.b32.xlu0 %v3749_v20, %s5005_s9  ;;  %v3718_v50 = vsel %vm254_vm4, %v6261_v6, 0.0 }
0x4d73   :  { %v3694_v2 = vpop.xlane.xlu0 %3693 }
0x4d74   :  { %v3710_v62 = vadd.f32 %v3694_v2, %v3638_v10  ;;  %v3748_v2 = vld [vmem:[#allocation3 + $0x20] sm:$0xff]  ;;  %v2820_v10 = vsub.f32 %v5744_v23, %v5883_v16 }
0x4d76   :  { %3774 = vrot.lane.b32.xlu0 %v3751_v63, %s5005_s9  ;;  %v3720_v33 = vsel %vm254_vm4, %v3710_v62, 0.0 }
0x4d7a   :  { %3822 = vrot.lane.b32.xlu0 %v5778_v47, %s5005_s9 }
0x4d7e   :  { %3834 = vrot.lane.b32.xlu0 %v2814_v13, %s5013_s2 }
0x4d91   :  { %v3688_v47 = vpop.xlane.xlu1 %3687 }
0x4d92   :  { %v6263_v8 = vadd.f32 %v3688_v47, %v3636_v28  ;;  %v3745_v28 = vld [vmem:[#allocation3 + $0x8] sm:$0xff]  ;;  %v3750_v47 = vld [vmem:[#allocation3 + $0x30] sm:$0xff] }
0x4d94   :  { %v3716_v56 = vsel %vm254_vm4, %v6263_v8, 0.0 }
0x4d95   :  { %v3717_v11 = vadd.f32 %v3716_v56, %v3715_v15 }
0x4d97   :  { %v3719_v59 = vadd.f32 %v3718_v50, %v3717_v11 }
0x4d99   :  { %v3721_v34 = vadd.f32 %v3720_v33, %v3719_v59  ;;  %v4920_v59 = vld [vmem:[#allocation2 + $0x8] sm:$0xff] }
0x4db0   :  { %v3631_v57 = vpop.xlane.xlu1 %3630 }
0x4db1   :  { %v3641_v44 = vadd.f32 %v3631_v57, %v3567_v22 }
0x4db8   :  { %v3625_v43 = vpop.xlane.xlu1 %3624 }
0x4db9   :  { %v3639_v39 = vadd.f32 %v3625_v43, %v3561_v5  ;;  %v4916_v5 = vld [vmem:[#allocation2] sm:$0xff]  ;;  %v4921_v43 = vld [vmem:[#allocation2 + $0x10] sm:$0xff] }
0x4dbc   :  { %v3697_v0 = vpop.xlane.xlu1 %3696 }
0x4dbd   :  { %v6271_v49 = vadd.f32 %v3697_v0, %v3639_v39 }
0x4dbf   :  { %v3722_v4 = vsel %vm254_vm4, %v6271_v49, 0.0 }
0x4dc0   :  { %v3703_v31 = vpop.xlane.xlu1 %3702  ;;  %v3723_v9 = vadd.f32 %v3722_v4, %v3721_v34 }
0x4dc1   :  { %v6276_v18 = vadd.f32 %v3703_v31, %v3641_v44  ;;  %v4922_v31 = vld [vmem:[#allocation2 + $0x20] sm:$0xff] }
0x4dc3   :  { %v3726_v53 = vsel %vm254_vm4, %v6276_v18, 0.0 }
0x4dd1   :  { %v3634_v3 = vpop.xlane.xlu0 %3633 }
0x4dd2   :  { %v3642_v26 = vadd.f32 %v3634_v3, %v6232_v51 }
0x4dd9   :  { %v3628_v7 = vpop.xlane.xlu0 %3627 }
0x4dda   :  { %v3640_v41 = vadd.f32 %v3628_v7, %v6234_v14 }
0x4ddd   :  { %v3700_v36 = vpop.xlane.xlu0 %3699 }
0x4dde   :  { %v3712_v1 = vadd.f32 %v3700_v36, %v3640_v41  ;;  %v4923_v36 = vld [vmem:[#allocation2 + $0x30] sm:$0xff] }
0x4de0   :  { %v3724_v54 = vsel %vm254_vm4, %v3712_v1, 0.0 }
0x4de1   :  { %v3725_v19 = vadd.f32 %v3724_v54, %v3723_v9  ;;  %v3706_v21 = vpop.xlane.xlu0 %3705 }
0x4de2   :  { %v3714_v27 = vadd.f32 %v3706_v21, %v3642_v26 }
0x4de3   :  { %v3727_v58 = vadd.f32 %v3726_v53, %v3725_v19 }
0x4de4   :  { %v3728_v38 = vsel %vm254_vm4, %v3714_v27, 0.0 }
0x4de5   :  { %v3729_v14 = vadd.f32 %v3728_v38, %v3727_v58  ;;  %v3761_v22 = vpop.permute.xlu0 %3760 }
0x4de6   :  { %v3784_v29 = vsel %vm139_vm1, %v4916_v5, %v3761_v22 }
0x4de7   :  { %v3793_v51 = vsel %vm3792_vm11, %v3784_v29, %v3707_v61  ;;  %3730 = vadd.xlane.f32.xlu1 %v3729_v14  ;;  %v3746_v61 = vld [vmem:[#allocation3 + $0x10] sm:$0xff] }
0x4de8   :  { %v3802_v24 = vsel %vm3801_vm12, %v3793_v51, 0.0 }
0x4de9   :  { %3810 = vst [vmem:[#allocation7] sm:$0xff] %v3802_v24  ;;  %v3767_v60 = vpop.permute.xlu0 %3766 }
0x4dea   :  { %v3787_v42 = vsel %vm139_vm1, %v4917_v46, %v3767_v60 }
0x4deb   :  { %v3796_v52 = vsel %vm3792_vm11, %v3787_v42, %v3710_v62 }
0x4dec   :  { %v3805_v48 = vsel %vm3801_vm12, %v3796_v52, 0.0 }
0x4ded   :  { %3813 = vst [vmem:[#allocation7 + $0x18] sm:$0xff] %v3805_v48  ;;  %v3771_v55 = vpop.permute.xlu0 %3770 }
0x4dee   :  { %v3789_v37 = vsel %vm139_vm1, %v4918_v12, %v3771_v55 }
0x4def   :  { %v3798_v20 = vsel %vm3792_vm11, %v3789_v37, %v3712_v1 }
0x4df0   :  { %v3807_v63 = vsel %vm3801_vm12, %v3798_v20, 0.0 }
0x4df1   :  { %3815 = vst [vmem:[#allocation7 + $0x28] sm:$0xff] %v3807_v63  ;;  %v3775_v13 = vpop.permute.xlu0 %3774 }
0x4df2   :  { %v3791_v35 = vsel %vm139_vm1, %v4919_v17, %v3775_v13 }
0x4df3   :  { %v3800_v45 = vsel %vm3792_vm11, %v3791_v35, %v3714_v27 }
0x4df4   :  { %v3809_v30 = vsel %vm3801_vm12, %v3800_v45, 0.0 }
0x4df5   :  { %3817 = vst [vmem:[#allocation7 + $0x38] sm:$0xff] %v3809_v30 }
0x4df8   :  { %3762 = vrot.lane.b32.xlu1 %v3745_v28, %s5005_s9 }
0x4dfc   :  { %3764 = vrot.lane.b32.xlu1 %v3746_v61, %s5005_s9 }
0x4e00   :  { %3768 = vrot.lane.b32.xlu1 %v3748_v2, %s5005_s9 }
0x4e04   :  { %3772 = vrot.lane.b32.xlu1 %v3750_v47, %s5005_s9 }
0x4e08   :  { %3818 = vrot.lane.b32.xlu1 %v5836_v40, %s4997_s25 }
0x4e0c   :  { %3826 = vrot.lane.b32.xlu1 %v5816_v32, %s4997_s25  ;;  %s5014_s25 = smov [#allocation7]  }
0x4e0d   :  { %s3851_s9 = sshll.u32 %s5014_s25, 4  ;;  %s3852_s9 = int_to_ptr.vmem [resolvable:$true] %s3851_s9 }
0x4e0e   :  { %s4946_s30 = scalar_lea.vmem %s3852_s9, 1024  ;;  %p4951_p9 = scmp.lt.s32.totalorder %s3852_s9, %s3852_s9 }
0x4e0f   :  { %p4947_p8 = scmp.ne.s32.totalorder %s3852_s9, %s4946_s30  ;;  %p4952_p10 = scmp.lt.s32.totalorder %s4946_s30, %s4946_s30 }
0x4e10   :  { %3838 = vrot.lane.b32.xlu1 %v2820_v10, %s5013_s2 }
0x4e11   :  { %p4953_p11 = por %p4952_p10, %p4951_p9 }
0x4e13   :  { %p4954_p12 = pnand %p4953_p11, %p4947_p8 }
0x4e74   :  { %v3731_v15 = vpop.xlane.xlu1 %3730 }
0x4e75   :  { %v3732_v62 = vrot.slane %v3731_v15, 4 }
0x4e77   :  { %v3733_v56 = vadd.f32 %v3732_v62, %v3731_v15 }
0x4e78   :  { %v3763_v11 = vpop.permute.xlu1 %3762 }
0x4e79   :  { %v3734_v50 = vrot.slane %v3733_v56, 2  ;;  %v3785_v33 = vsel %vm139_vm1, %v4920_v59, %v3763_v11 }
0x4e7a   :  { %v3794_v34 = vsel %vm3792_vm11, %v3785_v33, %v6263_v8 }
0x4e7b   :  { %v3803_v40 = vsel %vm3801_vm12, %v3794_v34, 0.0  ;;  %v3735_v57 = vadd.f32 %v3734_v50, %v3733_v56 }
0x4e7c   :  { %3811 = vst [vmem:[#allocation7 + $0x8] sm:$0xff] %v3803_v40  ;;  %v3765_v32 = vpop.permute.xlu1 %3764 }
0x4e7d   :  { %v3786_v23 = vsel %vm139_vm1, %v4921_v43, %v3765_v32  ;;  %v3736_v16 = vrot.slane %v3735_v57, 1 }
0x4e7e   :  { %v3795_v0 = vsel %vm3792_vm11, %v3786_v23, %v6261_v6 }
0x4e7f   :  { %v3804_v3 = vsel %vm3801_vm12, %v3795_v0, 0.0  ;;  %v3737_v39 = vadd.f32 %v3736_v16, %v3735_v57 }
0x4e80   :  { %3812 = vst [vmem:[#allocation7 + $0x10] sm:$0xff] %v3804_v3  ;;  %v3769_v7 = vpop.permute.xlu1 %3768 }
0x4e81   :  { %v3788_v8 = vsel %vm139_vm1, %v4922_v31, %v3769_v7  ;;  %4477 = vpush %v3737_v39 }
0x4e82   :  { %v3797_v44 = vsel %vm3792_vm11, %v3788_v8, %v6271_v49 }
0x4e83   :  { %v3806_v4 = vsel %vm3801_vm12, %v3797_v44, 0.0 }
0x4e84   :  { %3814 = vst [vmem:[#allocation7 + $0x20] sm:$0xff] %v3806_v4  ;;  %v3773_v41 = vpop.permute.xlu1 %3772 }
0x4e85   :  { %v3790_v6 = vsel %vm139_vm1, %v4923_v36, %v3773_v41 }
0x4e86   :  { %v3799_v1 = vsel %vm3792_vm11, %v3790_v6, %v6276_v18 }
0x4e87   :  { %v3808_v9 = vsel %vm3801_vm12, %v3799_v1, 0.0 }
0x4e88   :  { %3816 = vst [vmem:[#allocation7 + $0x30] sm:$0xff] %v3808_v9  ;;  %v3819_v26 = vpop.permute.xlu1 %3818 }
0x4e89   :  { %v3829_v49 = vsel %vm139_vm1, %v5788_v25, %v3819_v26 }
0x4e8a   :  { %4957 = shalt.err (!%p4954_p12)
}
0x4e8b   :  { %s4958_s10 = scalar_lea.hbm %s6361_s3, 1024 }
0x4e8c   :  { %p4959_p13 = scmp.ne.s32.totalorder %s6361_s3, %s4958_s10  ;;  %p4962_p0 = scmp.lt.u32.totalorder %s4958_s10, %s6361_s3 }
0x4e8e   :  { %p4964_p1 = pnand %p4962_p0, %p4959_p13 }
0x4e90   :  { %4967 = shalt.err (!%p4964_p1)
}
0x4e91   :  { %s5015_s11 = smov 128   ;;  %s5016_s12 = smov 8   ;;  %v3823_v25 = vpop.permute.xlu0 %3822  ;;  %v3827_v54 = vpop.permute.xlu1 %3826  ;;  %vm3843_vm13 = vcmask 23552  }
0x4e92   :  { %3857 = dma.vmem_to_hbm [thread:$0]  %s3852_s9, 1024, %s6361_s3, [#allocation6], %s5015_s11, %s5015_s11, %s5016_s12   ;;  %v3830_v18 = vsel %vm79_vm2, %v3829_v49, %v3823_v25 }
0x4e93   :  { %v3831_v19 = vsel %vm322_vm3, %v3830_v18, %v3827_v54  ;;  %s5017_s16 = smov [#allocation8]  }
0x4e94   :  { %3832 = vst [vmem:[#allocation8] sm:$0xff] %v3831_v19  ;;  %s3863_s17 = sshll.u32 %s5017_s16, 4  ;;  %s3864_s17 = int_to_ptr.vmem [resolvable:$true] %s3863_s17 }
0x4e95   :  { %v3839_v53 = vpop.permute.xlu1 %3838  ;;  %v3835_v58 = vpop.permute.xlu0 %3834  ;;  %s4968_s3 = scalar_lea.vmem %s3864_s17, 256  ;;  %p4973_p3 = scmp.lt.s32.totalorder %s3864_s17, %s3864_s17 }
0x4e96   :  { %v3841_v14 = vsel %vm254_vm4, %v3835_v58, %v3839_v53  ;;  %p4969_p2 = scmp.ne.s32.totalorder %s3864_s17, %s4968_s3  ;;  %p4974_p4 = scmp.lt.s32.totalorder %s4968_s3, %s4968_s3 }
0x4e98   :  { %p4975_p5 = por %p4974_p4, %p4973_p3 }
0x4e9a   :  { %p4976_p6 = pnand %p4975_p5, %p4969_p2 }
0x4eb2   :  { %s4478_s15 = spop %4477 }
0x4eb3   :  { %v3739_v21 = vstv %s4478_s15 }
0x4eb4   :  { %v3741_v27 = vmul.f32 0.015625, %v3739_v21 }
0x4eb6   :  { %v3742_v38 = vsub.f32 0.0, %v3741_v27 }
0x4eb8   :  { %v3842_v22 = vsel %vm256_vm5, %v3841_v14, %v3742_v38 }
0x4eb9   :  { %v3844_v5 = vsel %vm3843_vm13, %v3842_v22, 0.0 }
0x4eba   :  { %3845 = vst [vmem:[#allocation8 + $0x8] sm:$0xff] %v3844_v5 }
0x4ebb   :  { %4979 = shalt.err (!%p4976_p6)
}
0x4ebc   :  { %s4980_s20 = scalar_lea.hbm %s6362_s4, 256 }
0x4ebd   :  { %p4981_p7 = scmp.ne.s32.totalorder %s6362_s4, %s4980_s20  ;;  %p4984_p8 = scmp.lt.u32.totalorder %s4980_s20, %s6362_s4 }
0x4ebf   :  { %p4986_p9 = pnand %p4984_p8, %p4981_p7 }
0x4ec1   :  { %4989 = shalt.err (!%p4986_p9)
}
0x4ec2   :  { %3869 = dma.vmem_to_hbm [thread:$0]  %s3864_s17, 256, %s6362_s4, [#allocation9], %s5015_s11, %s5015_s11, %s5016_s12  }
0x4ec3   :  { %4992 = dma.done.wait [#allocation6], 1024  }
0x4ec4   :  { %4993 = vsyncadd [#allocation6], 4294966272 }
0x4ec5   :  { %4994 = dma.done.wait [#allocation9], 256  }
0x4ec6   :  { %4995 = vsyncadd [#allocation9], 4294967040 }
0x4ec7   :  { %3876 = vsyncpa [#allocation5], 1 }
0x4ec8   :  { %3877 = vsyncpa [#allocation6], 1 }
0x4ec9   :  { %3878 = vsyncpa [#allocation9], 1 }

</bundles_post_ra>
